<compile_context>
chip_gen: v6e
topology: v6e:2x2x1
jax: 0.10.0
libtpu: 0.0.40
codegen_flags: <defaults>
</compile_context>

<pallas_src>
import jax
import jax.numpy as jnp
import numpy as np
from jax.experimental import pallas as pl
from jax.experimental.pallas import tpu as pltpu

# --- logical model dims (from the PyTorch spec) -----------------------------
D_MODEL = 300          # d_model
DFF = 300              # dim_feedforward
N_LAYERS = 3           # num_layers
INPUT_DIM = 55         # 5 days x 11 features flattened
FC_HIDDEN = 64
LN_EPS = 1e-5          # nn.LayerNorm default

# --- lane-aligned (padded) dims ---------------------------------------------
INPUT_PAD = 128        # 55  -> 128
D_PAD = 384            # 300 -> 384
DFF_PAD = 384          # 300 -> 384
FC_PAD = 128           # 64  -> 128


def _layernorm_padded(x, gamma, beta):
    """LayerNorm over the true D_MODEL=300 features of a zero-padded 384-lane
    activation.  Padded lanes stay exactly 0 because gamma/beta are 0 there."""
    mu = jnp.sum(x, axis=-1, keepdims=True) * (1.0 / D_MODEL)
    var = jnp.sum(x * x, axis=-1, keepdims=True) * (1.0 / D_MODEL) - mu * mu
    return (x - mu) * jax.lax.rsqrt(var + LN_EPS) * gamma + beta


def stock_transformer_kernel(x_ref, emb_w_ref, emb_b_ref,
                             wvo_ref, bvo_ref,
                             w1_ref, b1_ref, w2_ref, b2_ref,
                             g1_ref, be1_ref, g2_ref, be2_ref,
                             fc_w_ref, fc_b_ref, fc2_w_ref, fc2_b_ref,
                             out_ref):
    bf16 = jnp.bfloat16
    f32 = jnp.float32

    # embedding: (TB, 128) @ (128, 384) + b
    h = jnp.dot(x_ref[...].astype(bf16), emb_w_ref[...],
                preferred_element_type=f32) + emb_b_ref[...]

    # 3 post-norm encoder layers (seq_len == 1: attention == out_proj(v_proj))
    for l in range(N_LAYERS):
        attn = jnp.dot(h.astype(bf16), wvo_ref[l],
                       preferred_element_type=f32) + bvo_ref[l]
        h = _layernorm_padded(h + attn, g1_ref[l], be1_ref[l])

        ff = jnp.maximum(
            jnp.dot(h.astype(bf16), w1_ref[l],
                    preferred_element_type=f32) + b1_ref[l], 0.0)
        ff = jnp.dot(ff.astype(bf16), w2_ref[l],
                     preferred_element_type=f32) + b2_ref[l]
        h = _layernorm_padded(h + ff, g2_ref[l], be2_ref[l])

    # head: fc -> relu -> fc2 (fc2 done as VPU multiply + lane reduction)
    y = jnp.maximum(
        jnp.dot(h.astype(bf16), fc_w_ref[...],
                preferred_element_type=f32) + fc_b_ref[...], 0.0)
    out_ref[...] = (jnp.sum(y * fc2_w_ref[...], axis=-1, keepdims=True)
                    + fc2_b_ref[...])


# ----------------------------------------------------------------------------
# Parameters (PyTorch-style f32) and inference-prepared kernel args.
# ----------------------------------------------------------------------------
def _xavier(key, fan_in, fan_out):
    limit = np.sqrt(6.0 / (fan_in + fan_out))
    return jax.random.uniform(key, (fan_in, fan_out), jnp.float32, -limit, limit)


def make_params(key):
    """f32 params in PyTorch layout (weights pre-transposed to (in, out))."""
    ks = jax.random.split(key, 16)
    p = {}
    p["emb_w"] = _xavier(ks[0], INPUT_DIM, D_MODEL)
    p["emb_b"] = jnp.zeros((1, D_MODEL), jnp.float32)

    p["wv"] = jnp.stack([_xavier(ks[1 + l], D_MODEL, D_MODEL) for l in range(N_LAYERS)])
    p["bv"] = jnp.zeros((N_LAYERS, 1, D_MODEL), jnp.float32)
    p["wo"] = jnp.stack([_xavier(ks[4 + l], D_MODEL, D_MODEL) for l in range(N_LAYERS)])
    p["bo"] = jnp.zeros((N_LAYERS, 1, D_MODEL), jnp.float32)
    p["w1"] = jnp.stack([_xavier(ks[7 + l], D_MODEL, DFF) for l in range(N_LAYERS)])
    p["b1"] = jnp.zeros((N_LAYERS, 1, DFF), jnp.float32)
    p["w2"] = jnp.stack([_xavier(ks[10 + l], DFF, D_MODEL) for l in range(N_LAYERS)])
    p["b2"] = jnp.zeros((N_LAYERS, 1, D_MODEL), jnp.float32)
    p["g1"] = jnp.ones((N_LAYERS, 1, D_MODEL), jnp.float32)
    p["be1"] = jnp.zeros((N_LAYERS, 1, D_MODEL), jnp.float32)
    p["g2"] = jnp.ones((N_LAYERS, 1, D_MODEL), jnp.float32)
    p["be2"] = jnp.zeros((N_LAYERS, 1, D_MODEL), jnp.float32)

    p["fc_w"] = _xavier(ks[13], D_MODEL, FC_HIDDEN)
    p["fc_b"] = jnp.zeros((1, FC_HIDDEN), jnp.float32)
    p["fc2_w"] = _xavier(ks[14], FC_HIDDEN, 1)
    p["fc2_b"] = jnp.zeros((1, 1), jnp.float32)
    return p


def _pad_to(a, shape):
    pads = [(0, s - d) for d, s in zip(a.shape, shape)]
    return jnp.pad(a, pads)


def prepare_params(p):
    """Fuse, zero-pad to lane-aligned shapes, and cast weights to bf16."""
    kp = {}
    # fuse attention (f32), then pad + cast
    wvo = jnp.matmul(p["wv"], p["wo"])                     # (L, 300, 300)
    bvo = jnp.matmul(p["bv"], p["wo"]) + p["bo"]           # (L, 1, 300)

    kp["emb_w"] = _pad_to(p["emb_w"], (INPUT_PAD, D_PAD)).astype(jnp.bfloat16)
    kp["emb_b"] = _pad_to(p["emb_b"], (1, D_PAD))
    kp["wvo"] = _pad_to(wvo, (N_LAYERS, D_PAD, D_PAD)).astype(jnp.bfloat16)
    kp["bvo"] = _pad_to(bvo, (N_LAYERS, 1, D_PAD))
    kp["w1"] = _pad_to(p["w1"], (N_LAYERS, D_PAD, DFF_PAD)).astype(jnp.bfloat16)
    kp["b1"] = _pad_to(p["b1"], (N_LAYERS, 1, DFF_PAD))
    kp["w2"] = _pad_to(p["w2"], (N_LAYERS, DFF_PAD, D_PAD)).astype(jnp.bfloat16)
    kp["b2"] = _pad_to(p["b2"], (N_LAYERS, 1, D_PAD))
    # gamma/beta are zero-padded so padded lanes remain exactly 0 after LN
    kp["g1"] = _pad_to(p["g1"], (N_LAYERS, 1, D_PAD))
    kp["be1"] = _pad_to(p["be1"], (N_LAYERS, 1, D_PAD))
    kp["g2"] = _pad_to(p["g2"], (N_LAYERS, 1, D_PAD))
    kp["be2"] = _pad_to(p["be2"], (N_LAYERS, 1, D_PAD))
    kp["fc_w"] = _pad_to(p["fc_w"], (D_PAD, FC_PAD)).astype(jnp.bfloat16)
    kp["fc_b"] = _pad_to(p["fc_b"], (1, FC_PAD))
    kp["fc2_w"] = _pad_to(p["fc2_w"].T, (1, FC_PAD))       # row vector, f32
    kp["fc2_b"] = p["fc2_b"]
    return kp


_KARG_ORDER = ["emb_w", "emb_b", "wvo", "bvo", "w1", "b1", "w2", "b2",
               "g1", "be1", "g2", "be2", "fc_w", "fc_b", "fc2_w", "fc2_b"]


def stock_price_transformer(x, kp):
    """x: (B, INPUT_DIM) f32 -> (B,) f32."""
    B = x.shape[0]
    TB = min(256, -(-B // 8) * 8)          # sublane-aligned batch tile, <= 256
    Bp = -(-B // TB) * TB
    xp = jnp.pad(x.astype(jnp.float32),
                 ((0, Bp - B), (0, INPUT_PAD - INPUT_DIM)))

    weights = [kp[k] for k in _KARG_ORDER]

    def resident_spec(a):
        nd = a.ndim
        return pl.BlockSpec(a.shape, lambda i, _nd=nd: (0,) * _nd)

    in_specs = ([pl.BlockSpec((TB, INPUT_PAD), lambda i: (i, 0))]
                + [resident_spec(w) for w in weights])
    out_specs = pl.BlockSpec((TB, 1), lambda i: (i, 0))

    out = pl.pallas_call(
        stock_transformer_kernel,
        out_shape=jax.ShapeDtypeStruct((Bp, 1), jnp.float32),
        grid=(Bp // TB,),
        in_specs=in_specs,
        out_specs=out_specs,
        compiler_params=pltpu.CompilerParams(
            dimension_semantics=("parallel",),
            vmem_limit_bytes=24 << 20),
    )(xp, *weights)
    return out[:B, 0]


# ----------------------------------------------------------------------------
# References for correctness.
# ----------------------------------------------------------------------------
def reference_forward_f32(x, p):
    """Pure-f32 reference of the original PyTorch math (unfused, unpadded)."""
    def ln(v, g, b):
        mu = jnp.mean(v, axis=-1, keepdims=True)
        vc = v - mu
        var = jnp.mean(vc * vc, axis=-1, keepdims=True)
        return vc * jax.lax.rsqrt(var + LN_EPS) * g + b

    h = x @ p["emb_w"] + p["emb_b"]
    for l in range(N_LAYERS):
        v = h @ p["wv"][l] + p["bv"][l]
        attn = v @ p["wo"][l] + p["bo"][l]
        h = ln(h + attn, p["g1"][l], p["be1"][l])
        ff = jnp.maximum(h @ p["w1"][l] + p["b1"][l], 0.0) @ p["w2"][l] + p["b2"][l]
        h = ln(h + ff, p["g2"][l], p["be2"][l])
    y = jnp.maximum(h @ p["fc_w"] + p["fc_b"], 0.0)
    return (y @ p["fc2_w"] + p["fc2_b"])[:, 0]


def reference_kernel_math(x, kp):
    """Plain-JAX replica of the exact kernel math (padded, fused, bf16 dots)."""
    bf16, f32 = jnp.bfloat16, jnp.float32
    xp = jnp.pad(x, ((0, 0), (0, INPUT_PAD - INPUT_DIM)))
    h = jnp.dot(xp.astype(bf16), kp["emb_w"],
                preferred_element_type=f32) + kp["emb_b"]
    for l in range(N_LAYERS):
        attn = jnp.dot(h.astype(bf16), kp["wvo"][l],
                       preferred_element_type=f32) + kp["bvo"][l]
        h = _layernorm_padded(h + attn, kp["g1"][l], kp["be1"][l])
        ff = jnp.maximum(jnp.dot(h.astype(bf16), kp["w1"][l],
                                 preferred_element_type=f32) + kp["b1"][l], 0.0)
        ff = jnp.dot(ff.astype(bf16), kp["w2"][l],
                     preferred_element_type=f32) + kp["b2"][l]
        h = _layernorm_padded(h + ff, kp["g2"][l], kp["be2"][l])
    y = jnp.maximum(jnp.dot(h.astype(bf16), kp["fc_w"],
                            preferred_element_type=f32) + kp["fc_b"], 0.0)
    return jnp.sum(y * kp["fc2_w"], axis=-1) + kp["fc2_b"][0, 0]


if __name__ == "__main__":
    key = jax.random.PRNGKey(0)
    k_x, k_p = jax.random.split(key)
    B = 8
    x = jax.random.normal(k_x, (B, INPUT_DIM), dtype=jnp.float32)

    params = make_params(k_p)
    kparams = prepare_params(params)

    out = stock_price_transformer(x, kparams)
    jax.block_until_ready(out)
    assert out.shape == (B,)

    # 1) kernel matches a plain-JAX replica of the same (bf16/padded) math.
    ref_exact = reference_kernel_math(x, kparams)
    np.testing.assert_allclose(np.asarray(out), np.asarray(ref_exact),
                               rtol=1e-3, atol=1e-3)

    # 2) kernel stays close to the full-f32 PyTorch-equivalent forward
    #    (looser tolerance due to bf16 weights/matmuls).
    ref_f32 = reference_forward_f32(x, params)
    np.testing.assert_allclose(np.asarray(out), np.asarray(ref_f32),
                               rtol=5e-2, atol=5e-2)

    print("KERNEL_OK")
</pallas_src>

<mosaic_0001>
module attributes {stable_mosaic.version = 11 : i64} {
  func.func @stock_transformer_kernel(%arg0: i32, %arg1: memref<8x128xf32, #tpu.memory_space<vmem>>, %arg2: memref<128x384xbf16, #tpu.memory_space<vmem>>, %arg3: memref<1x384xf32, #tpu.memory_space<vmem>>, %arg4: memref<3x384x384xbf16, #tpu.memory_space<vmem>>, %arg5: memref<3x1x384xf32, #tpu.memory_space<vmem>>, %arg6: memref<3x384x384xbf16, #tpu.memory_space<vmem>>, %arg7: memref<3x1x384xf32, #tpu.memory_space<vmem>>, %arg8: memref<3x384x384xbf16, #tpu.memory_space<vmem>>, %arg9: memref<3x1x384xf32, #tpu.memory_space<vmem>>, %arg10: memref<3x1x384xf32, #tpu.memory_space<vmem>>, %arg11: memref<3x1x384xf32, #tpu.memory_space<vmem>>, %arg12: memref<3x1x384xf32, #tpu.memory_space<vmem>>, %arg13: memref<3x1x384xf32, #tpu.memory_space<vmem>>, %arg14: memref<384x128xbf16, #tpu.memory_space<vmem>>, %arg15: memref<1x128xf32, #tpu.memory_space<vmem>>, %arg16: memref<1x128xf32, #tpu.memory_space<vmem>>, %arg17: memref<1x1xf32, #tpu.memory_space<vmem>>, %arg18: memref<8x1xf32, #tpu.memory_space<vmem>>) attributes {dimension_semantics = [#tpu.dimension_semantics<parallel>], iteration_bounds = array<i64: 1>, scalar_prefetch = 0 : i64, scratch_operands = 0 : i64, tpu.core_type = #tpu.core_type<tc>, window_params = [{transform_indices = @transform_0, window_bounds = array<i64: 8, 128>}, {pipeline_mode = #tpu.pipeline_mode<synchronous>, transform_indices = @transform_1, window_bounds = array<i64: 128, 384>}, {pipeline_mode = #tpu.pipeline_mode<synchronous>, transform_indices = @transform_2, window_bounds = array<i64: 1, 384>}, {pipeline_mode = #tpu.pipeline_mode<synchronous>, transform_indices = @transform_3, window_bounds = array<i64: 3, 384, 384>}, {pipeline_mode = #tpu.pipeline_mode<synchronous>, transform_indices = @transform_4, window_bounds = array<i64: 3, 1, 384>}, {pipeline_mode = #tpu.pipeline_mode<synchronous>, transform_indices = @transform_5, window_bounds = array<i64: 3, 384, 384>}, {pipeline_mode = #tpu.pipeline_mode<synchronous>, transform_indices = @transform_6, window_bounds = array<i64: 3, 1, 384>}, {pipeline_mode = #tpu.pipeline_mode<synchronous>, transform_indices = @transform_7, window_bounds = array<i64: 3, 384, 384>}, {pipeline_mode = #tpu.pipeline_mode<synchronous>, transform_indices = @transform_8, window_bounds = array<i64: 3, 1, 384>}, {pipeline_mode = #tpu.pipeline_mode<synchronous>, transform_indices = @transform_9, window_bounds = array<i64: 3, 1, 384>}, {pipeline_mode = #tpu.pipeline_mode<synchronous>, transform_indices = @transform_10, window_bounds = array<i64: 3, 1, 384>}, {pipeline_mode = #tpu.pipeline_mode<synchronous>, transform_indices = @transform_11, window_bounds = array<i64: 3, 1, 384>}, {pipeline_mode = #tpu.pipeline_mode<synchronous>, transform_indices = @transform_12, window_bounds = array<i64: 3, 1, 384>}, {pipeline_mode = #tpu.pipeline_mode<synchronous>, transform_indices = @transform_13, window_bounds = array<i64: 384, 128>}, {pipeline_mode = #tpu.pipeline_mode<synchronous>, transform_indices = @transform_14, window_bounds = array<i64: 1, 128>}, {pipeline_mode = #tpu.pipeline_mode<synchronous>, transform_indices = @transform_15, window_bounds = array<i64: 1, 128>}, {pipeline_mode = #tpu.pipeline_mode<synchronous>, transform_indices = @transform_16, window_bounds = array<i64: 1, 1>}, {transform_indices = @transform_17, window_bounds = array<i64: 8, 1>}]} {
    %c0 = arith.constant 0 : index
    %c0_0 = arith.constant 0 : index
    %0 = vector.load %arg1[%c0, %c0_0] : memref<8x128xf32, #tpu.memory_space<vmem>>, vector<8x128xf32>
    %1 = arith.truncf %0 : vector<8x128xf32> to vector<8x128xbf16>
    %c0_1 = arith.constant 0 : index
    %c0_2 = arith.constant 0 : index
    %2 = vector.load %arg2[%c0_1, %c0_2] : memref<128x384xbf16, #tpu.memory_space<vmem>>, vector<128x384xbf16>
    %cst = arith.constant dense<0.000000e+00> : vector<8x384xf32>
    %3 = tpu.matmul %1, %2, %cst {dimension_numbers = #tpu.dot_dimension_numbers<[1], [0], [0], [1], [0, 0, 1, 1], [], []>} : vector<8x128xbf16>, vector<128x384xbf16>, vector<8x384xf32> -> vector<8x384xf32>
    %c0_3 = arith.constant 0 : index
    %c0_4 = arith.constant 0 : index
    %4 = vector.load %arg3[%c0_3, %c0_4] : memref<1x384xf32, #tpu.memory_space<vmem>>, vector<1x384xf32>
    %5 = vector.broadcast %4 : vector<1x384xf32> to vector<8x384xf32>
    %6 = arith.addf %3, %5 : vector<8x384xf32>
    %7 = arith.truncf %6 : vector<8x384xf32> to vector<8x384xbf16>
    %c0_5 = arith.constant 0 : index
    %c0_6 = arith.constant 0 : index
    %c0_7 = arith.constant 0 : index
    %8 = vector.load %arg4[%c0_5, %c0_6, %c0_7] : memref<3x384x384xbf16, #tpu.memory_space<vmem>>, vector<1x384x384xbf16>
    %9 = vector.shape_cast %8 : vector<1x384x384xbf16> to vector<384x384xbf16>
    %cst_8 = arith.constant dense<0.000000e+00> : vector<8x384xf32>
    %10 = tpu.matmul %7, %9, %cst_8 {dimension_numbers = #tpu.dot_dimension_numbers<[1], [0], [0], [1], [0, 0, 1, 1], [], []>} : vector<8x384xbf16>, vector<384x384xbf16>, vector<8x384xf32> -> vector<8x384xf32>
    %c0_9 = arith.constant 0 : index
    %c0_10 = arith.constant 0 : index
    %c0_11 = arith.constant 0 : index
    %11 = vector.load %arg5[%c0_9, %c0_10, %c0_11] : memref<3x1x384xf32, #tpu.memory_space<vmem>>, vector<1x1x384xf32>
    %12 = vector.shape_cast %11 : vector<1x1x384xf32> to vector<1x384xf32>
    %13 = vector.broadcast %12 : vector<1x384xf32> to vector<8x384xf32>
    %14 = arith.addf %10, %13 : vector<8x384xf32>
    %15 = arith.addf %6, %14 : vector<8x384xf32>
    %c0_12 = arith.constant 0 : index
    %c0_13 = arith.constant 0 : index
    %c0_14 = arith.constant 0 : index
    %16 = vector.load %arg10[%c0_12, %c0_13, %c0_14] : memref<3x1x384xf32, #tpu.memory_space<vmem>>, vector<1x1x384xf32>
    %17 = vector.shape_cast %16 : vector<1x1x384xf32> to vector<1x384xf32>
    %c0_15 = arith.constant 0 : index
    %c0_16 = arith.constant 0 : index
    %c0_17 = arith.constant 0 : index
    %18 = vector.load %arg11[%c0_15, %c0_16, %c0_17] : memref<3x1x384xf32, #tpu.memory_space<vmem>>, vector<1x1x384xf32>
    %19 = vector.shape_cast %18 : vector<1x1x384xf32> to vector<1x384xf32>
    %cst_18 = arith.constant dense<0.000000e+00> : vector<8xf32>
    %20 = vector.multi_reduction <add>, %15, %cst_18 [1] : vector<8x384xf32> to vector<8xf32>
    %21 = vector.shape_cast %20 : vector<8xf32> to vector<8x1xf32>
    %cst_19 = arith.constant 0.00333333341 : f32
    %22 = vector.broadcast %cst_19 : f32 to vector<8x1xf32>
    %23 = arith.mulf %21, %22 : vector<8x1xf32>
    %24 = arith.mulf %15, %15 : vector<8x384xf32>
    %cst_20 = arith.constant dense<0.000000e+00> : vector<8xf32>
    %25 = vector.multi_reduction <add>, %24, %cst_20 [1] : vector<8x384xf32> to vector<8xf32>
    %26 = vector.shape_cast %25 : vector<8xf32> to vector<8x1xf32>
    %cst_21 = arith.constant 0.00333333341 : f32
    %27 = vector.broadcast %cst_21 : f32 to vector<8x1xf32>
    %28 = arith.mulf %26, %27 : vector<8x1xf32>
    %29 = arith.mulf %23, %23 : vector<8x1xf32>
    %30 = arith.subf %28, %29 : vector<8x1xf32>
    %31 = vector.broadcast %23 : vector<8x1xf32> to vector<8x384xf32>
    %32 = arith.subf %15, %31 : vector<8x384xf32>
    %cst_22 = arith.constant 9.99999974E-6 : f32
    %33 = vector.broadcast %cst_22 : f32 to vector<8x1xf32>
    %34 = arith.addf %30, %33 : vector<8x1xf32>
    %35 = math.rsqrt %34 : vector<8x1xf32>
    %36 = vector.broadcast %35 : vector<8x1xf32> to vector<8x384xf32>
    %37 = arith.mulf %32, %36 : vector<8x384xf32>
    %38 = vector.broadcast %17 : vector<1x384xf32> to vector<8x384xf32>
    %39 = arith.mulf %37, %38 : vector<8x384xf32>
    %40 = vector.broadcast %19 : vector<1x384xf32> to vector<8x384xf32>
    %41 = arith.addf %39, %40 : vector<8x384xf32>
    %42 = arith.truncf %41 : vector<8x384xf32> to vector<8x384xbf16>
    %c0_23 = arith.constant 0 : index
    %c0_24 = arith.constant 0 : index
    %c0_25 = arith.constant 0 : index
    %43 = vector.load %arg6[%c0_23, %c0_24, %c0_25] : memref<3x384x384xbf16, #tpu.memory_space<vmem>>, vector<1x384x384xbf16>
    %44 = vector.shape_cast %43 : vector<1x384x384xbf16> to vector<384x384xbf16>
    %cst_26 = arith.constant dense<0.000000e+00> : vector<8x384xf32>
    %45 = tpu.matmul %42, %44, %cst_26 {dimension_numbers = #tpu.dot_dimension_numbers<[1], [0], [0], [1], [0, 0, 1, 1], [], []>} : vector<8x384xbf16>, vector<384x384xbf16>, vector<8x384xf32> -> vector<8x384xf32>
    %c0_27 = arith.constant 0 : index
    %c0_28 = arith.constant 0 : index
    %c0_29 = arith.constant 0 : index
    %46 = vector.load %arg7[%c0_27, %c0_28, %c0_29] : memref<3x1x384xf32, #tpu.memory_space<vmem>>, vector<1x1x384xf32>
    %47 = vector.shape_cast %46 : vector<1x1x384xf32> to vector<1x384xf32>
    %48 = vector.broadcast %47 : vector<1x384xf32> to vector<8x384xf32>
    %49 = arith.addf %45, %48 : vector<8x384xf32>
    %cst_30 = arith.constant 0.000000e+00 : f32
    %50 = vector.broadcast %cst_30 : f32 to vector<8x384xf32>
    %51 = arith.maximumf %49, %50 : vector<8x384xf32>
    %52 = arith.truncf %51 : vector<8x384xf32> to vector<8x384xbf16>
    %c0_31 = arith.constant 0 : index
    %c0_32 = arith.constant 0 : index
    %c0_33 = arith.constant 0 : index
    %53 = vector.load %arg8[%c0_31, %c0_32, %c0_33] : memref<3x384x384xbf16, #tpu.memory_space<vmem>>, vector<1x384x384xbf16>
    %54 = vector.shape_cast %53 : vector<1x384x384xbf16> to vector<384x384xbf16>
    %cst_34 = arith.constant dense<0.000000e+00> : vector<8x384xf32>
    %55 = tpu.matmul %52, %54, %cst_34 {dimension_numbers = #tpu.dot_dimension_numbers<[1], [0], [0], [1], [0, 0, 1, 1], [], []>} : vector<8x384xbf16>, vector<384x384xbf16>, vector<8x384xf32> -> vector<8x384xf32>
    %c0_35 = arith.constant 0 : index
    %c0_36 = arith.constant 0 : index
    %c0_37 = arith.constant 0 : index
    %56 = vector.load %arg9[%c0_35, %c0_36, %c0_37] : memref<3x1x384xf32, #tpu.memory_space<vmem>>, vector<1x1x384xf32>
    %57 = vector.shape_cast %56 : vector<1x1x384xf32> to vector<1x384xf32>
    %58 = vector.broadcast %57 : vector<1x384xf32> to vector<8x384xf32>
    %59 = arith.addf %55, %58 : vector<8x384xf32>
    %60 = arith.addf %41, %59 : vector<8x384xf32>
    %c0_38 = arith.constant 0 : index
    %c0_39 = arith.constant 0 : index
    %c0_40 = arith.constant 0 : index
    %61 = vector.load %arg12[%c0_38, %c0_39, %c0_40] : memref<3x1x384xf32, #tpu.memory_space<vmem>>, vector<1x1x384xf32>
    %62 = vector.shape_cast %61 : vector<1x1x384xf32> to vector<1x384xf32>
    %c0_41 = arith.constant 0 : index
    %c0_42 = arith.constant 0 : index
    %c0_43 = arith.constant 0 : index
    %63 = vector.load %arg13[%c0_41, %c0_42, %c0_43] : memref<3x1x384xf32, #tpu.memory_space<vmem>>, vector<1x1x384xf32>
    %64 = vector.shape_cast %63 : vector<1x1x384xf32> to vector<1x384xf32>
    %cst_44 = arith.constant dense<0.000000e+00> : vector<8xf32>
    %65 = vector.multi_reduction <add>, %60, %cst_44 [1] : vector<8x384xf32> to vector<8xf32>
    %66 = vector.shape_cast %65 : vector<8xf32> to vector<8x1xf32>
    %cst_45 = arith.constant 0.00333333341 : f32
    %67 = vector.broadcast %cst_45 : f32 to vector<8x1xf32>
    %68 = arith.mulf %66, %67 : vector<8x1xf32>
    %69 = arith.mulf %60, %60 : vector<8x384xf32>
    %cst_46 = arith.constant dense<0.000000e+00> : vector<8xf32>
    %70 = vector.multi_reduction <add>, %69, %cst_46 [1] : vector<8x384xf32> to vector<8xf32>
    %71 = vector.shape_cast %70 : vector<8xf32> to vector<8x1xf32>
    %cst_47 = arith.constant 0.00333333341 : f32
    %72 = vector.broadcast %cst_47 : f32 to vector<8x1xf32>
    %73 = arith.mulf %71, %72 : vector<8x1xf32>
    %74 = arith.mulf %68, %68 : vector<8x1xf32>
    %75 = arith.subf %73, %74 : vector<8x1xf32>
    %76 = vector.broadcast %68 : vector<8x1xf32> to vector<8x384xf32>
    %77 = arith.subf %60, %76 : vector<8x384xf32>
    %cst_48 = arith.constant 9.99999974E-6 : f32
    %78 = vector.broadcast %cst_48 : f32 to vector<8x1xf32>
    %79 = arith.addf %75, %78 : vector<8x1xf32>
    %80 = math.rsqrt %79 : vector<8x1xf32>
    %81 = vector.broadcast %80 : vector<8x1xf32> to vector<8x384xf32>
    %82 = arith.mulf %77, %81 : vector<8x384xf32>
    %83 = vector.broadcast %62 : vector<1x384xf32> to vector<8x384xf32>
    %84 = arith.mulf %82, %83 : vector<8x384xf32>
    %85 = vector.broadcast %64 : vector<1x384xf32> to vector<8x384xf32>
    %86 = arith.addf %84, %85 : vector<8x384xf32>
    %87 = arith.truncf %86 : vector<8x384xf32> to vector<8x384xbf16>
    %c1 = arith.constant 1 : index
    %c0_49 = arith.constant 0 : index
    %c0_50 = arith.constant 0 : index
    %88 = vector.load %arg4[%c1, %c0_49, %c0_50] : memref<3x384x384xbf16, #tpu.memory_space<vmem>>, vector<1x384x384xbf16>
    %89 = vector.shape_cast %88 : vector<1x384x384xbf16> to vector<384x384xbf16>
    %cst_51 = arith.constant dense<0.000000e+00> : vector<8x384xf32>
    %90 = tpu.matmul %87, %89, %cst_51 {dimension_numbers = #tpu.dot_dimension_numbers<[1], [0], [0], [1], [0, 0, 1, 1], [], []>} : vector<8x384xbf16>, vector<384x384xbf16>, vector<8x384xf32> -> vector<8x384xf32>
    %c1_52 = arith.constant 1 : index
    %c0_53 = arith.constant 0 : index
    %c0_54 = arith.constant 0 : index
    %91 = vector.load %arg5[%c1_52, %c0_53, %c0_54] : memref<3x1x384xf32, #tpu.memory_space<vmem>>, vector<1x1x384xf32>
    %92 = vector.shape_cast %91 : vector<1x1x384xf32> to vector<1x384xf32>
    %93 = vector.broadcast %92 : vector<1x384xf32> to vector<8x384xf32>
    %94 = arith.addf %90, %93 : vector<8x384xf32>
    %95 = arith.addf %86, %94 : vector<8x384xf32>
    %c1_55 = arith.constant 1 : index
    %c0_56 = arith.constant 0 : index
    %c0_57 = arith.constant 0 : index
    %96 = vector.load %arg10[%c1_55, %c0_56, %c0_57] : memref<3x1x384xf32, #tpu.memory_space<vmem>>, vector<1x1x384xf32>
    %97 = vector.shape_cast %96 : vector<1x1x384xf32> to vector<1x384xf32>
    %c1_58 = arith.constant 1 : index
    %c0_59 = arith.constant 0 : index
    %c0_60 = arith.constant 0 : index
    %98 = vector.load %arg11[%c1_58, %c0_59, %c0_60] : memref<3x1x384xf32, #tpu.memory_space<vmem>>, vector<1x1x384xf32>
    %99 = vector.shape_cast %98 : vector<1x1x384xf32> to vector<1x384xf32>
    %cst_61 = arith.constant dense<0.000000e+00> : vector<8xf32>
    %100 = vector.multi_reduction <add>, %95, %cst_61 [1] : vector<8x384xf32> to vector<8xf32>
    %101 = vector.shape_cast %100 : vector<8xf32> to vector<8x1xf32>
    %cst_62 = arith.constant 0.00333333341 : f32
    %102 = vector.broadcast %cst_62 : f32 to vector<8x1xf32>
    %103 = arith.mulf %101, %102 : vector<8x1xf32>
    %104 = arith.mulf %95, %95 : vector<8x384xf32>
    %cst_63 = arith.constant dense<0.000000e+00> : vector<8xf32>
    %105 = vector.multi_reduction <add>, %104, %cst_63 [1] : vector<8x384xf32> to vector<8xf32>
    %106 = vector.shape_cast %105 : vector<8xf32> to vector<8x1xf32>
    %cst_64 = arith.constant 0.00333333341 : f32
    %107 = vector.broadcast %cst_64 : f32 to vector<8x1xf32>
    %108 = arith.mulf %106, %107 : vector<8x1xf32>
    %109 = arith.mulf %103, %103 : vector<8x1xf32>
    %110 = arith.subf %108, %109 : vector<8x1xf32>
    %111 = vector.broadcast %103 : vector<8x1xf32> to vector<8x384xf32>
    %112 = arith.subf %95, %111 : vector<8x384xf32>
    %cst_65 = arith.constant 9.99999974E-6 : f32
    %113 = vector.broadcast %cst_65 : f32 to vector<8x1xf32>
    %114 = arith.addf %110, %113 : vector<8x1xf32>
    %115 = math.rsqrt %114 : vector<8x1xf32>
    %116 = vector.broadcast %115 : vector<8x1xf32> to vector<8x384xf32>
    %117 = arith.mulf %112, %116 : vector<8x384xf32>
    %118 = vector.broadcast %97 : vector<1x384xf32> to vector<8x384xf32>
    %119 = arith.mulf %117, %118 : vector<8x384xf32>
    %120 = vector.broadcast %99 : vector<1x384xf32> to vector<8x384xf32>
    %121 = arith.addf %119, %120 : vector<8x384xf32>
    %122 = arith.truncf %121 : vector<8x384xf32> to vector<8x384xbf16>
    %c1_66 = arith.constant 1 : index
    %c0_67 = arith.constant 0 : index
    %c0_68 = arith.constant 0 : index
    %123 = vector.load %arg6[%c1_66, %c0_67, %c0_68] : memref<3x384x384xbf16, #tpu.memory_space<vmem>>, vector<1x384x384xbf16>
    %124 = vector.shape_cast %123 : vector<1x384x384xbf16> to vector<384x384xbf16>
    %cst_69 = arith.constant dense<0.000000e+00> : vector<8x384xf32>
    %125 = tpu.matmul %122, %124, %cst_69 {dimension_numbers = #tpu.dot_dimension_numbers<[1], [0], [0], [1], [0, 0, 1, 1], [], []>} : vector<8x384xbf16>, vector<384x384xbf16>, vector<8x384xf32> -> vector<8x384xf32>
    %c1_70 = arith.constant 1 : index
    %c0_71 = arith.constant 0 : index
    %c0_72 = arith.constant 0 : index
    %126 = vector.load %arg7[%c1_70, %c0_71, %c0_72] : memref<3x1x384xf32, #tpu.memory_space<vmem>>, vector<1x1x384xf32>
    %127 = vector.shape_cast %126 : vector<1x1x384xf32> to vector<1x384xf32>
    %128 = vector.broadcast %127 : vector<1x384xf32> to vector<8x384xf32>
    %129 = arith.addf %125, %128 : vector<8x384xf32>
    %cst_73 = arith.constant 0.000000e+00 : f32
    %130 = vector.broadcast %cst_73 : f32 to vector<8x384xf32>
    %131 = arith.maximumf %129, %130 : vector<8x384xf32>
    %132 = arith.truncf %131 : vector<8x384xf32> to vector<8x384xbf16>
    %c1_74 = arith.constant 1 : index
    %c0_75 = arith.constant 0 : index
    %c0_76 = arith.constant 0 : index
    %133 = vector.load %arg8[%c1_74, %c0_75, %c0_76] : memref<3x384x384xbf16, #tpu.memory_space<vmem>>, vector<1x384x384xbf16>
    %134 = vector.shape_cast %133 : vector<1x384x384xbf16> to vector<384x384xbf16>
    %cst_77 = arith.constant dense<0.000000e+00> : vector<8x384xf32>
    %135 = tpu.matmul %132, %134, %cst_77 {dimension_numbers = #tpu.dot_dimension_numbers<[1], [0], [0], [1], [0, 0, 1, 1], [], []>} : vector<8x384xbf16>, vector<384x384xbf16>, vector<8x384xf32> -> vector<8x384xf32>
    %c1_78 = arith.constant 1 : index
    %c0_79 = arith.constant 0 : index
    %c0_80 = arith.constant 0 : index
    %136 = vector.load %arg9[%c1_78, %c0_79, %c0_80] : memref<3x1x384xf32, #tpu.memory_space<vmem>>, vector<1x1x384xf32>
    %137 = vector.shape_cast %136 : vector<1x1x384xf32> to vector<1x384xf32>
    %138 = vector.broadcast %137 : vector<1x384xf32> to vector<8x384xf32>
    %139 = arith.addf %135, %138 : vector<8x384xf32>
    %140 = arith.addf %121, %139 : vector<8x384xf32>
    %c1_81 = arith.constant 1 : index
    %c0_82 = arith.constant 0 : index
    %c0_83 = arith.constant 0 : index
    %141 = vector.load %arg12[%c1_81, %c0_82, %c0_83] : memref<3x1x384xf32, #tpu.memory_space<vmem>>, vector<1x1x384xf32>
    %142 = vector.shape_cast %141 : vector<1x1x384xf32> to vector<1x384xf32>
    %c1_84 = arith.constant 1 : index
    %c0_85 = arith.constant 0 : index
    %c0_86 = arith.constant 0 : index
    %143 = vector.load %arg13[%c1_84, %c0_85, %c0_86] : memref<3x1x384xf32, #tpu.memory_space<vmem>>, vector<1x1x384xf32>
    %144 = vector.shape_cast %143 : vector<1x1x384xf32> to vector<1x384xf32>
    %cst_87 = arith.constant dense<0.000000e+00> : vector<8xf32>
    %145 = vector.multi_reduction <add>, %140, %cst_87 [1] : vector<8x384xf32> to vector<8xf32>
    %146 = vector.shape_cast %145 : vector<8xf32> to vector<8x1xf32>
    %cst_88 = arith.constant 0.00333333341 : f32
    %147 = vector.broadcast %cst_88 : f32 to vector<8x1xf32>
    %148 = arith.mulf %146, %147 : vector<8x1xf32>
    %149 = arith.mulf %140, %140 : vector<8x384xf32>
    %cst_89 = arith.constant dense<0.000000e+00> : vector<8xf32>
    %150 = vector.multi_reduction <add>, %149, %cst_89 [1] : vector<8x384xf32> to vector<8xf32>
    %151 = vector.shape_cast %150 : vector<8xf32> to vector<8x1xf32>
    %cst_90 = arith.constant 0.00333333341 : f32
    %152 = vector.broadcast %cst_90 : f32 to vector<8x1xf32>
    %153 = arith.mulf %151, %152 : vector<8x1xf32>
    %154 = arith.mulf %148, %148 : vector<8x1xf32>
    %155 = arith.subf %153, %154 : vector<8x1xf32>
    %156 = vector.broadcast %148 : vector<8x1xf32> to vector<8x384xf32>
    %157 = arith.subf %140, %156 : vector<8x384xf32>
    %cst_91 = arith.constant 9.99999974E-6 : f32
    %158 = vector.broadcast %cst_91 : f32 to vector<8x1xf32>
    %159 = arith.addf %155, %158 : vector<8x1xf32>
    %160 = math.rsqrt %159 : vector<8x1xf32>
    %161 = vector.broadcast %160 : vector<8x1xf32> to vector<8x384xf32>
    %162 = arith.mulf %157, %161 : vector<8x384xf32>
    %163 = vector.broadcast %142 : vector<1x384xf32> to vector<8x384xf32>
    %164 = arith.mulf %162, %163 : vector<8x384xf32>
    %165 = vector.broadcast %144 : vector<1x384xf32> to vector<8x384xf32>
    %166 = arith.addf %164, %165 : vector<8x384xf32>
    %167 = arith.truncf %166 : vector<8x384xf32> to vector<8x384xbf16>
    %c2 = arith.constant 2 : index
    %c0_92 = arith.constant 0 : index
    %c0_93 = arith.constant 0 : index
    %168 = vector.load %arg4[%c2, %c0_92, %c0_93] : memref<3x384x384xbf16, #tpu.memory_space<vmem>>, vector<1x384x384xbf16>
    %169 = vector.shape_cast %168 : vector<1x384x384xbf16> to vector<384x384xbf16>
    %cst_94 = arith.constant dense<0.000000e+00> : vector<8x384xf32>
    %170 = tpu.matmul %167, %169, %cst_94 {dimension_numbers = #tpu.dot_dimension_numbers<[1], [0], [0], [1], [0, 0, 1, 1], [], []>} : vector<8x384xbf16>, vector<384x384xbf16>, vector<8x384xf32> -> vector<8x384xf32>
    %c2_95 = arith.constant 2 : index
    %c0_96 = arith.constant 0 : index
    %c0_97 = arith.constant 0 : index
    %171 = vector.load %arg5[%c2_95, %c0_96, %c0_97] : memref<3x1x384xf32, #tpu.memory_space<vmem>>, vector<1x1x384xf32>
    %172 = vector.shape_cast %171 : vector<1x1x384xf32> to vector<1x384xf32>
    %173 = vector.broadcast %172 : vector<1x384xf32> to vector<8x384xf32>
    %174 = arith.addf %170, %173 : vector<8x384xf32>
    %175 = arith.addf %166, %174 : vector<8x384xf32>
    %c2_98 = arith.constant 2 : index
    %c0_99 = arith.constant 0 : index
    %c0_100 = arith.constant 0 : index
    %176 = vector.load %arg10[%c2_98, %c0_99, %c0_100] : memref<3x1x384xf32, #tpu.memory_space<vmem>>, vector<1x1x384xf32>
    %177 = vector.shape_cast %176 : vector<1x1x384xf32> to vector<1x384xf32>
    %c2_101 = arith.constant 2 : index
    %c0_102 = arith.constant 0 : index
    %c0_103 = arith.constant 0 : index
    %178 = vector.load %arg11[%c2_101, %c0_102, %c0_103] : memref<3x1x384xf32, #tpu.memory_space<vmem>>, vector<1x1x384xf32>
    %179 = vector.shape_cast %178 : vector<1x1x384xf32> to vector<1x384xf32>
    %cst_104 = arith.constant dense<0.000000e+00> : vector<8xf32>
    %180 = vector.multi_reduction <add>, %175, %cst_104 [1] : vector<8x384xf32> to vector<8xf32>
    %181 = vector.shape_cast %180 : vector<8xf32> to vector<8x1xf32>
    %cst_105 = arith.constant 0.00333333341 : f32
    %182 = vector.broadcast %cst_105 : f32 to vector<8x1xf32>
    %183 = arith.mulf %181, %182 : vector<8x1xf32>
    %184 = arith.mulf %175, %175 : vector<8x384xf32>
    %cst_106 = arith.constant dense<0.000000e+00> : vector<8xf32>
    %185 = vector.multi_reduction <add>, %184, %cst_106 [1] : vector<8x384xf32> to vector<8xf32>
    %186 = vector.shape_cast %185 : vector<8xf32> to vector<8x1xf32>
    %cst_107 = arith.constant 0.00333333341 : f32
    %187 = vector.broadcast %cst_107 : f32 to vector<8x1xf32>
    %188 = arith.mulf %186, %187 : vector<8x1xf32>
    %189 = arith.mulf %183, %183 : vector<8x1xf32>
    %190 = arith.subf %188, %189 : vector<8x1xf32>
    %191 = vector.broadcast %183 : vector<8x1xf32> to vector<8x384xf32>
    %192 = arith.subf %175, %191 : vector<8x384xf32>
    %cst_108 = arith.constant 9.99999974E-6 : f32
    %193 = vector.broadcast %cst_108 : f32 to vector<8x1xf32>
    %194 = arith.addf %190, %193 : vector<8x1xf32>
    %195 = math.rsqrt %194 : vector<8x1xf32>
    %196 = vector.broadcast %195 : vector<8x1xf32> to vector<8x384xf32>
    %197 = arith.mulf %192, %196 : vector<8x384xf32>
    %198 = vector.broadcast %177 : vector<1x384xf32> to vector<8x384xf32>
    %199 = arith.mulf %197, %198 : vector<8x384xf32>
    %200 = vector.broadcast %179 : vector<1x384xf32> to vector<8x384xf32>
    %201 = arith.addf %199, %200 : vector<8x384xf32>
    %202 = arith.truncf %201 : vector<8x384xf32> to vector<8x384xbf16>
    %c2_109 = arith.constant 2 : index
    %c0_110 = arith.constant 0 : index
    %c0_111 = arith.constant 0 : index
    %203 = vector.load %arg6[%c2_109, %c0_110, %c0_111] : memref<3x384x384xbf16, #tpu.memory_space<vmem>>, vector<1x384x384xbf16>
    %204 = vector.shape_cast %203 : vector<1x384x384xbf16> to vector<384x384xbf16>
    %cst_112 = arith.constant dense<0.000000e+00> : vector<8x384xf32>
    %205 = tpu.matmul %202, %204, %cst_112 {dimension_numbers = #tpu.dot_dimension_numbers<[1], [0], [0], [1], [0, 0, 1, 1], [], []>} : vector<8x384xbf16>, vector<384x384xbf16>, vector<8x384xf32> -> vector<8x384xf32>
    %c2_113 = arith.constant 2 : index
    %c0_114 = arith.constant 0 : index
    %c0_115 = arith.constant 0 : index
    %206 = vector.load %arg7[%c2_113, %c0_114, %c0_115] : memref<3x1x384xf32, #tpu.memory_space<vmem>>, vector<1x1x384xf32>
    %207 = vector.shape_cast %206 : vector<1x1x384xf32> to vector<1x384xf32>
    %208 = vector.broadcast %207 : vector<1x384xf32> to vector<8x384xf32>
    %209 = arith.addf %205, %208 : vector<8x384xf32>
    %cst_116 = arith.constant 0.000000e+00 : f32
    %210 = vector.broadcast %cst_116 : f32 to vector<8x384xf32>
    %211 = arith.maximumf %209, %210 : vector<8x384xf32>
    %212 = arith.truncf %211 : vector<8x384xf32> to vector<8x384xbf16>
    %c2_117 = arith.constant 2 : index
    %c0_118 = arith.constant 0 : index
    %c0_119 = arith.constant 0 : index
    %213 = vector.load %arg8[%c2_117, %c0_118, %c0_119] : memref<3x384x384xbf16, #tpu.memory_space<vmem>>, vector<1x384x384xbf16>
    %214 = vector.shape_cast %213 : vector<1x384x384xbf16> to vector<384x384xbf16>
    %cst_120 = arith.constant dense<0.000000e+00> : vector<8x384xf32>
    %215 = tpu.matmul %212, %214, %cst_120 {dimension_numbers = #tpu.dot_dimension_numbers<[1], [0], [0], [1], [0, 0, 1, 1], [], []>} : vector<8x384xbf16>, vector<384x384xbf16>, vector<8x384xf32> -> vector<8x384xf32>
    %c2_121 = arith.constant 2 : index
    %c0_122 = arith.constant 0 : index
    %c0_123 = arith.constant 0 : index
    %216 = vector.load %arg9[%c2_121, %c0_122, %c0_123] : memref<3x1x384xf32, #tpu.memory_space<vmem>>, vector<1x1x384xf32>
    %217 = vector.shape_cast %216 : vector<1x1x384xf32> to vector<1x384xf32>
    %218 = vector.broadcast %217 : vector<1x384xf32> to vector<8x384xf32>
    %219 = arith.addf %215, %218 : vector<8x384xf32>
    %220 = arith.addf %201, %219 : vector<8x384xf32>
    %c2_124 = arith.constant 2 : index
    %c0_125 = arith.constant 0 : index
    %c0_126 = arith.constant 0 : index
    %221 = vector.load %arg12[%c2_124, %c0_125, %c0_126] : memref<3x1x384xf32, #tpu.memory_space<vmem>>, vector<1x1x384xf32>
    %222 = vector.shape_cast %221 : vector<1x1x384xf32> to vector<1x384xf32>
    %c2_127 = arith.constant 2 : index
    %c0_128 = arith.constant 0 : index
    %c0_129 = arith.constant 0 : index
    %223 = vector.load %arg13[%c2_127, %c0_128, %c0_129] : memref<3x1x384xf32, #tpu.memory_space<vmem>>, vector<1x1x384xf32>
    %224 = vector.shape_cast %223 : vector<1x1x384xf32> to vector<1x384xf32>
    %cst_130 = arith.constant dense<0.000000e+00> : vector<8xf32>
    %225 = vector.multi_reduction <add>, %220, %cst_130 [1] : vector<8x384xf32> to vector<8xf32>
    %226 = vector.shape_cast %225 : vector<8xf32> to vector<8x1xf32>
    %cst_131 = arith.constant 0.00333333341 : f32
    %227 = vector.broadcast %cst_131 : f32 to vector<8x1xf32>
    %228 = arith.mulf %226, %227 : vector<8x1xf32>
    %229 = arith.mulf %220, %220 : vector<8x384xf32>
    %cst_132 = arith.constant dense<0.000000e+00> : vector<8xf32>
    %230 = vector.multi_reduction <add>, %229, %cst_132 [1] : vector<8x384xf32> to vector<8xf32>
    %231 = vector.shape_cast %230 : vector<8xf32> to vector<8x1xf32>
    %cst_133 = arith.constant 0.00333333341 : f32
    %232 = vector.broadcast %cst_133 : f32 to vector<8x1xf32>
    %233 = arith.mulf %231, %232 : vector<8x1xf32>
    %234 = arith.mulf %228, %228 : vector<8x1xf32>
    %235 = arith.subf %233, %234 : vector<8x1xf32>
    %236 = vector.broadcast %228 : vector<8x1xf32> to vector<8x384xf32>
    %237 = arith.subf %220, %236 : vector<8x384xf32>
    %cst_134 = arith.constant 9.99999974E-6 : f32
    %238 = vector.broadcast %cst_134 : f32 to vector<8x1xf32>
    %239 = arith.addf %235, %238 : vector<8x1xf32>
    %240 = math.rsqrt %239 : vector<8x1xf32>
    %241 = vector.broadcast %240 : vector<8x1xf32> to vector<8x384xf32>
    %242 = arith.mulf %237, %241 : vector<8x384xf32>
    %243 = vector.broadcast %222 : vector<1x384xf32> to vector<8x384xf32>
    %244 = arith.mulf %242, %243 : vector<8x384xf32>
    %245 = vector.broadcast %224 : vector<1x384xf32> to vector<8x384xf32>
    %246 = arith.addf %244, %245 : vector<8x384xf32>
    %247 = arith.truncf %246 : vector<8x384xf32> to vector<8x384xbf16>
    %c0_135 = arith.constant 0 : index
    %c0_136 = arith.constant 0 : index
    %248 = vector.load %arg14[%c0_135, %c0_136] : memref<384x128xbf16, #tpu.memory_space<vmem>>, vector<384x128xbf16>
    %cst_137 = arith.constant dense<0.000000e+00> : vector<8x128xf32>
    %249 = tpu.matmul %247, %248, %cst_137 {dimension_numbers = #tpu.dot_dimension_numbers<[1], [0], [0], [1], [0, 0, 1, 1], [], []>} : vector<8x384xbf16>, vector<384x128xbf16>, vector<8x128xf32> -> vector<8x128xf32>
    %c0_138 = arith.constant 0 : index
    %c0_139 = arith.constant 0 : index
    %250 = vector.load %arg15[%c0_138, %c0_139] : memref<1x128xf32, #tpu.memory_space<vmem>>, vector<1x128xf32>
    %251 = vector.broadcast %250 : vector<1x128xf32> to vector<8x128xf32>
    %252 = arith.addf %249, %251 : vector<8x128xf32>
    %cst_140 = arith.constant 0.000000e+00 : f32
    %253 = vector.broadcast %cst_140 : f32 to vector<8x128xf32>
    %254 = arith.maximumf %252, %253 : vector<8x128xf32>
    %c0_141 = arith.constant 0 : index
    %c0_142 = arith.constant 0 : index
    %255 = vector.load %arg16[%c0_141, %c0_142] : memref<1x128xf32, #tpu.memory_space<vmem>>, vector<1x128xf32>
    %256 = vector.broadcast %255 : vector<1x128xf32> to vector<8x128xf32>
    %257 = arith.mulf %254, %256 : vector<8x128xf32>
    %cst_143 = arith.constant dense<0.000000e+00> : vector<8xf32>
    %258 = vector.multi_reduction <add>, %257, %cst_143 [1] : vector<8x128xf32> to vector<8xf32>
    %259 = vector.shape_cast %258 : vector<8xf32> to vector<8x1xf32>
    %c0_144 = arith.constant 0 : index
    %c0_145 = arith.constant 0 : index
    %260 = vector.load %arg17[%c0_144, %c0_145] : memref<1x1xf32, #tpu.memory_space<vmem>>, vector<1x1xf32>
    %261 = vector.broadcast %260 : vector<1x1xf32> to vector<8x1xf32>
    %262 = arith.addf %259, %261 : vector<8x1xf32>
    %c0_146 = arith.constant 0 : index
    %c0_147 = arith.constant 0 : index
    %263 = vector.load %arg18[%c0_146, %c0_147] : memref<8x1xf32, #tpu.memory_space<vmem>>, vector<8x1xf32>
    tpu.vector_store %arg18[%c0_146, %c0_147], %262 {strides = array<i32>} : memref<8x1xf32, #tpu.memory_space<vmem>>, vector<8x1xf32>,
    return
  }
  func.func @transform_0(%arg0: i32) -> (i32, i32) {
    %c0_i32 = arith.constant 0 : i32
    %c0_i32_0 = arith.constant 0 : i32
    return %arg0, %c0_i32 : i32, i32
  }
  func.func @transform_1(%arg0: i32) -> (i32, i32) {
    %c0_i32 = arith.constant 0 : i32
    %c0_i32_0 = arith.constant 0 : i32
    %c0_i32_1 = arith.constant 0 : i32
    return %c0_i32, %c0_i32_0 : i32, i32
  }
  func.func @transform_2(%arg0: i32) -> (i32, i32) {
    %c0_i32 = arith.constant 0 : i32
    %c0_i32_0 = arith.constant 0 : i32
    %c0_i32_1 = arith.constant 0 : i32
    return %c0_i32, %c0_i32_0 : i32, i32
  }
  func.func @transform_3(%arg0: i32) -> (i32, i32, i32) {
    %c0_i32 = arith.constant 0 : i32
    %c0_i32_0 = arith.constant 0 : i32
    %c0_i32_1 = arith.constant 0 : i32
    %c0_i32_2 = arith.constant 0 : i32
    return %c0_i32, %c0_i32_0, %c0_i32_1 : i32, i32, i32
  }
  func.func @transform_4(%arg0: i32) -> (i32, i32, i32) {
    %c0_i32 = arith.constant 0 : i32
    %c0_i32_0 = arith.constant 0 : i32
    %c0_i32_1 = arith.constant 0 : i32
    %c0_i32_2 = arith.constant 0 : i32
    return %c0_i32, %c0_i32_0, %c0_i32_1 : i32, i32, i32
  }
  func.func @transform_5(%arg0: i32) -> (i32, i32, i32) {
    %c0_i32 = arith.constant 0 : i32
    %c0_i32_0 = arith.constant 0 : i32
    %c0_i32_1 = arith.constant 0 : i32
    %c0_i32_2 = arith.constant 0 : i32
    return %c0_i32, %c0_i32_0, %c0_i32_1 : i32, i32, i32
  }
  func.func @transform_6(%arg0: i32) -> (i32, i32, i32) {
    %c0_i32 = arith.constant 0 : i32
    %c0_i32_0 = arith.constant 0 : i32
    %c0_i32_1 = arith.constant 0 : i32
    %c0_i32_2 = arith.constant 0 : i32
    return %c0_i32, %c0_i32_0, %c0_i32_1 : i32, i32, i32
  }
  func.func @transform_7(%arg0: i32) -> (i32, i32, i32) {
    %c0_i32 = arith.constant 0 : i32
    %c0_i32_0 = arith.constant 0 : i32
    %c0_i32_1 = arith.constant 0 : i32
    %c0_i32_2 = arith.constant 0 : i32
    return %c0_i32, %c0_i32_0, %c0_i32_1 : i32, i32, i32
  }
  func.func @transform_8(%arg0: i32) -> (i32, i32, i32) {
    %c0_i32 = arith.constant 0 : i32
    %c0_i32_0 = arith.constant 0 : i32
    %c0_i32_1 = arith.constant 0 : i32
    %c0_i32_2 = arith.constant 0 : i32
    return %c0_i32, %c0_i32_0, %c0_i32_1 : i32, i32, i32
  }
  func.func @transform_9(%arg0: i32) -> (i32, i32, i32) {
    %c0_i32 = arith.constant 0 : i32
    %c0_i32_0 = arith.constant 0 : i32
    %c0_i32_1 = arith.constant 0 : i32
    %c0_i32_2 = arith.constant 0 : i32
    return %c0_i32, %c0_i32_0, %c0_i32_1 : i32, i32, i32
  }
  func.func @transform_10(%arg0: i32) -> (i32, i32, i32) {
    %c0_i32 = arith.constant 0 : i32
    %c0_i32_0 = arith.constant 0 : i32
    %c0_i32_1 = arith.constant 0 : i32
    %c0_i32_2 = arith.constant 0 : i32
    return %c0_i32, %c0_i32_0, %c0_i32_1 : i32, i32, i32
  }
  func.func @transform_11(%arg0: i32) -> (i32, i32, i32) {
    %c0_i32 = arith.constant 0 : i32
    %c0_i32_0 = arith.constant 0 : i32
    %c0_i32_1 = arith.constant 0 : i32
    %c0_i32_2 = arith.constant 0 : i32
    return %c0_i32, %c0_i32_0, %c0_i32_1 : i32, i32, i32
  }
  func.func @transform_12(%arg0: i32) -> (i32, i32, i32) {
    %c0_i32 = arith.constant 0 : i32
    %c0_i32_0 = arith.constant 0 : i32
    %c0_i32_1 = arith.constant 0 : i32
    %c0_i32_2 = arith.constant 0 : i32
    return %c0_i32, %c0_i32_0, %c0_i32_1 : i32, i32, i32
  }
  func.func @transform_13(%arg0: i32) -> (i32, i32) {
    %c0_i32 = arith.constant 0 : i32
    %c0_i32_0 = arith.constant 0 : i32
    %c0_i32_1 = arith.constant 0 : i32
    return %c0_i32, %c0_i32_0 : i32, i32
  }
  func.func @transform_14(%arg0: i32) -> (i32, i32) {
    %c0_i32 = arith.constant 0 : i32
    %c0_i32_0 = arith.constant 0 : i32
    %c0_i32_1 = arith.constant 0 : i32
    return %c0_i32, %c0_i32_0 : i32, i32
  }
  func.func @transform_15(%arg0: i32) -> (i32, i32) {
    %c0_i32 = arith.constant 0 : i32
    %c0_i32_0 = arith.constant 0 : i32
    %c0_i32_1 = arith.constant 0 : i32
    return %c0_i32, %c0_i32_0 : i32, i32
  }
  func.func @transform_16(%arg0: i32) -> (i32, i32) {
    %c0_i32 = arith.constant 0 : i32
    %c0_i32_0 = arith.constant 0 : i32
    %c0_i32_1 = arith.constant 0 : i32
    return %c0_i32, %c0_i32_0 : i32, i32
  }
  func.func @transform_17(%arg0: i32) -> (i32, i32) {
    %c0_i32 = arith.constant 0 : i32
    %c0_i32_0 = arith.constant 0 : i32
    return %arg0, %c0_i32 : i32, i32
  }
}

</mosaic_0001>

<bundles_post_ra>
// kernel: tpu_custom_call.1
= control target key start
LH: loop header
LB: loop body
LE: loop exit
PB: predicated region body
PF: predicated region fallthrough
CT: control target
= control target key end

     0   :  { %s10246_s0 = inlined_call_operand.hbm [shape: f32[8,128], index: 0, kind: input, shape index: {}]   ;;  %s10247_s1 = inlined_call_operand.hbm [shape: bf16[128,384], index: 1, kind: input, shape index: {}]   ;;  %s10248_s2 = inlined_call_operand.hbm [shape: f32[1,384], index: 2, kind: input, shape index: {}]   ;;  %s10249_s3 = inlined_call_operand.hbm [shape: bf16[3,384,384], index: 3, kind: input, shape index: {}]   ;;  %s10250_s4 = inlined_call_operand.vmem [shape: f32[3,1,384], index: 4, kind: input, shape index: {}]   ;;  %s10251_s5 = inlined_call_operand.hbm [shape: bf16[3,384,384], index: 5, kind: input, shape index: {}]   ;;  %s10252_s6 = inlined_call_operand.hbm [shape: f32[3,1,384], index: 6, kind: input, shape index: {}]   ;;  %s10253_s7 = inlined_call_operand.hbm [shape: bf16[3,384,384], index: 7, kind: input, shape index: {}]   ;;  %s10254_s8 = inlined_call_operand.hbm [shape: f32[3,1,384], index: 8, kind: input, shape index: {}]   ;;  %s10255_s9 = inlined_call_operand.vmem [shape: f32[3,1,384], index: 9, kind: input, shape index: {}]   ;;  %s10256_s10 = inlined_call_operand.hbm [shape: f32[3,1,384], index: 10, kind: input, shape index: {}]   ;;  %s10257_s11 = inlined_call_operand.hbm [shape: f32[3,1,384], index: 11, kind: input, shape index: {}]   ;;  %s10258_s12 = inlined_call_operand.hbm [shape: f32[3,1,384], index: 12, kind: input, shape index: {}]   ;;  %s10259_s13 = inlined_call_operand.hbm [shape: bf16[384,128], index: 13, kind: input, shape index: {}]   ;;  %s10260_s14 = inlined_call_operand.vmem [shape: f32[1,128], index: 14, kind: input, shape index: {}]   ;;  %s10261_s15 = inlined_call_operand.vmem [shape: f32[1,128], index: 15, kind: input, shape index: {}]   ;;  %s10262_s16 = inlined_call_operand.<no memory space> [shape: f32[1,1], index: 16, kind: input, shape index: {}]   ;;  %s10263_s17 = inlined_call_operand.vmem [shape: f32[8,1], index: 17, kind: output, shape index: {}]  }
   0x1   :  { %10264 = sst [smem:[#allocation29_spill]] %s10246_s0  ;;  %v22_v0 = vstv %s10262_s16 }
   0x2   :  { %10265 = sst [smem:[#allocation30_spill]] %s10247_s1  ;;  %23 = vst [vmem:[#allocation2] sm:$0x1] %v22_v0 }
   0x3   :  { %24 = vsyncpa [#allocation4], 0 }
   0x4   :  { %25 = vsyncpa [#allocation6], 0 }
   0x5   :  { %26 = vsyncpa [#allocation9], 0 }
   0x6   :  { %27 = vsyncpa [#allocation12], 0 }
   0x7   :  { %28 = vsyncpa [#allocation15], 0 }
   0x8   :  { %29 = vsyncpa [#allocation18], 0 }
   0x9   :  { %30 = vsyncpa [#allocation21], 0  ;;  %s9624_s26 = smov [#allocation5]  }
   0xa   :  { %s46_s27 = sshll.u32 %s9624_s26, 4  ;;  %s47_s27 = int_to_ptr.vmem [resolvable:$true] %s46_s27 }
   0xb   :  { %s9378_s28 = scalar_lea.vmem %s47_s27, 3072  ;;  %p9383_p1 = scmp.lt.s32.totalorder %s47_s27, %s47_s27 }
   0xc   :  { %p9379_p0 = scmp.ne.s32.totalorder %s47_s27, %s9378_s28  ;;  %p9384_p2 = scmp.lt.s32.totalorder %s9378_s28, %s9378_s28 }
   0xe   :  { %p9385_p3 = por %p9384_p2, %p9383_p1 }
  0x10   :  { %p9386_p4 = pnand %p9385_p3, %p9379_p0 }
  0x12   :  { %9389 = shalt.err (!%p9386_p4)
}
  0x13   :  { %s9625_s29 = smov 192   ;;  %s9626_s16 = smov 12  }
  0x14   :  { %s10266_s18 = sld [smem:[#allocation30_spill]]  ;;  %s9627_s19 = smov [#allocation8]  }
  0x15   :  { %s68_s1 = sshll.u32 %s9627_s19, 4  ;;  %s9628_s20 = smov [#allocation11]   ;;  %s69_s1 = int_to_ptr.vmem [resolvable:$true] %s68_s1 }
  0x16   :  { %s94_s21 = sshll.u32 %s9628_s20, 4  ;;  %s9398_s22 = scalar_lea.vmem %s69_s1, 27648  ;;  %s95_s21 = int_to_ptr.vmem [resolvable:$true] %s94_s21 }
  0x17   :  { %p9399_p5 = scmp.ne.s32.totalorder %s69_s1, %s9398_s22  ;;  %p9403_p6 = scmp.lt.s32.totalorder %s69_s1, %s69_s1 }
  0x18   :  { %p9404_p7 = scmp.lt.s32.totalorder %s9398_s22, %s9398_s22 }
  0x1a   :  { %52 = dma.hbm_to_vmem [thread:$0]  %s10266_s18, 3072, %s47_s27, [#allocation6], %s9625_s29, %s9625_s29, %s9626_s16  }
  0x1b   :  { %p9405_p8 = por %p9404_p7, %p9403_p6 }
  0x1d   :  { %p9406_p9 = pnand %p9405_p8, %p9399_p5 }
  0x1f   :  { %9409 = shalt.err (!%p9406_p9)
}
  0x20   :  { %74 = dma.hbm_to_vmem [thread:$0]  %s10249_s3, 27648, %s69_s1, [#allocation9], %s9625_s29, %s9625_s29, %s9626_s16  }
  0x21   :  { %s9418_s25 = scalar_lea.vmem %s95_s21, 144  ;;  %s9422_s26 = scalar_lea.vmem %s95_s21, 160 }
  0x22   :  { %p9419_p10 = scmp.ne.s32.totalorder %s95_s21, %s9418_s25  ;;  %p9423_p11 = scmp.lt.s32.totalorder %s95_s21, %s95_s21 }
  0x23   :  { %p9424_p12 = scmp.lt.s32.totalorder %s9422_s26, %s9418_s25 }
  0x25   :  { %p9425_p13 = por %p9424_p12, %p9423_p11 }
  0x27   :  { %p9426_p0 = pnand %p9425_p13, %p9419_p10 }
  0x29   :  { %9429 = shalt.err (!%p9426_p0)
}
  0x2a   :  { %s9629_s27 = smov 48   ;;  %s9630_s28 = smov 3  }
  0x2b   :  { %100 = dma.hbm_to_vmem [thread:$0]  %s10252_s6, 144, %s95_s21, [#allocation12], %s9629_s27, %s9629_s27, %s9630_s28  }
  0x2c   :  { %s9631_s18 = smov [#allocation14]   ;;  %s9632_s19 = smov [#allocation17]  }
  0x2d   :  { %s118_s3 = sshll.u32 %s9631_s18, 4  ;;  %s144_s1 = sshll.u32 %s9632_s19, 4  ;;  %s119_s3 = int_to_ptr.vmem [resolvable:$true] %s118_s3  ;;  %s145_s1 = int_to_ptr.vmem [resolvable:$true] %s144_s1 }
  0x2e   :  { %s9438_s20 = scalar_lea.vmem %s119_s3, 144  ;;  %s9442_s22 = scalar_lea.vmem %s119_s3, 160 }
  0x2f   :  { %p9439_p1 = scmp.ne.s32.totalorder %s119_s3, %s9438_s20  ;;  %p9443_p2 = scmp.lt.s32.totalorder %s119_s3, %s119_s3 }
  0x30   :  { %p9444_p3 = scmp.lt.s32.totalorder %s9442_s22, %s9438_s20 }
  0x32   :  { %p9445_p4 = por %p9444_p3, %p9443_p2 }
  0x34   :  { %p9446_p5 = pnand %p9445_p4, %p9439_p1 }
  0x36   :  { %9449 = shalt.err (!%p9446_p5)
}
  0x37   :  { %124 = dma.hbm_to_vmem [thread:$0]  %s10254_s8, 144, %s119_s3, [#allocation15], %s9629_s27, %s9629_s27, %s9630_s28  }
  0x38   :  { %s9458_s6 = scalar_lea.vmem %s145_s1, 144  ;;  %s9462_s21 = scalar_lea.vmem %s145_s1, 160 }
  0x39   :  { %p9459_p6 = scmp.ne.s32.totalorder %s145_s1, %s9458_s6  ;;  %p9463_p7 = scmp.lt.s32.totalorder %s145_s1, %s145_s1 }
  0x3a   :  { %p9464_p8 = scmp.lt.s32.totalorder %s9462_s21, %s9458_s6 }
  0x3c   :  { %p9465_p9 = por %p9464_p8, %p9463_p7 }
  0x3e   :  { %p9466_p10 = pnand %p9465_p9, %p9459_p6 }
  0x40   :  { %9469 = shalt.err (!%p9466_p10)
}
  0x41   :  { %150 = dma.hbm_to_vmem [thread:$0]  %s10257_s11, 144, %s145_s1, [#allocation18], %s9629_s27, %s9629_s27, %s9630_s28  }
  0x42   :  { %s9633_s0 = smov [#allocation3]   ;;  %s9634_s8 = smov [#allocation7]  }
  0x43   :  { %s37_s30 = sshll.u32 %s9633_s0, 4  ;;  %s59_s18 = sshll.u32 %s9634_s8, 4  ;;  %s38_s30 = int_to_ptr.vmem [resolvable:$true] %s37_s30  ;;  %s60_s18 = int_to_ptr.vmem [resolvable:$true] %s59_s18 }
  0x44   :  { %s9478_s3 = scalar_lea.vmem %s38_s30, 128  ;;  %p9483_p12 = scmp.lt.s32.totalorder %s38_s30, %s38_s30 }
  0x45   :  { %p9479_p11 = scmp.ne.s32.totalorder %s38_s30, %s9478_s3  ;;  %p9484_p13 = scmp.lt.s32.totalorder %s9478_s3, %s9478_s3 }
  0x47   :  { %p9485_p0 = por %p9484_p13, %p9483_p12 }
  0x49   :  { %p9486_p1 = pnand %p9485_p0, %p9479_p11 }
  0x4b   :  { %9489 = shalt.err (!%p9486_p1)
}
  0x4c   :  { %s10267_s22 = sld [smem:[#allocation29_spill]]  ;;  %s9498_s23 = scalar_lea.vmem %s60_s18, 48 }
  0x4d   :  { %p9499_p2 = scmp.ne.s32.totalorder %s60_s18, %s9498_s23  ;;  %s9502_s11 = scalar_lea.vmem %s60_s18, 64 }
  0x4e   :  { %p9503_p3 = scmp.lt.s32.totalorder %s60_s18, %s60_s18  ;;  %p9504_p4 = scmp.lt.s32.totalorder %s9502_s11, %s9498_s23 }
  0x50   :  { %p9505_p5 = por %p9504_p4, %p9503_p3 }
  0x52   :  { %40 = dma.hbm_to_vmem [thread:$0]  %s10267_s22, 128, %s38_s30, [#allocation4]  }
  0x53   :  { %p9506_p6 = pnand %p9505_p5, %p9499_p2 }
  0x55   :  { %9509 = shalt.err (!%p9506_p6)
}
  0x56   :  { %62 = dma.hbm_to_vmem [thread:$0]  %s10248_s2, 48, %s60_s18, [#allocation6]  }
  0x57   :  { %s9635_s6 = smov [#allocation10]   ;;  %s9636_s25 = smov [#allocation13]  }
  0x58   :  { %s82_s21 = sshll.u32 %s9635_s6, 4  ;;  %s106_s26 = sshll.u32 %s9636_s25, 4  ;;  %s83_s21 = int_to_ptr.vmem [resolvable:$true] %s82_s21  ;;  %s107_s26 = int_to_ptr.vmem [resolvable:$true] %s106_s26 }
  0x59   :  { %s9518_s0 = scalar_lea.vmem %s83_s21, 27648  ;;  %p9523_p8 = scmp.lt.s32.totalorder %s83_s21, %s83_s21 }
  0x5a   :  { %p9519_p7 = scmp.ne.s32.totalorder %s83_s21, %s9518_s0  ;;  %p9524_p9 = scmp.lt.s32.totalorder %s9518_s0, %s9518_s0 }
  0x5c   :  { %p9525_p10 = por %p9524_p9, %p9523_p8 }
  0x5e   :  { %p9526_p11 = pnand %p9525_p10, %p9519_p7 }
  0x60   :  { %9529 = shalt.err (!%p9526_p11)
}
  0x61   :  { %88 = dma.hbm_to_vmem [thread:$0]  %s10251_s5, 27648, %s83_s21, [#allocation9], %s9625_s29, %s9625_s29, %s9626_s16  }
  0x62   :  { %s9538_s2 = scalar_lea.vmem %s107_s26, 27648  ;;  %p9543_p13 = scmp.lt.s32.totalorder %s107_s26, %s107_s26 }
  0x63   :  { %p9539_p12 = scmp.ne.s32.totalorder %s107_s26, %s9538_s2  ;;  %p9544_p0 = scmp.lt.s32.totalorder %s9538_s2, %s9538_s2 }
  0x65   :  { %p9545_p1 = por %p9544_p0, %p9543_p13 }
  0x67   :  { %p9546_p2 = pnand %p9545_p1, %p9539_p12 }
  0x69   :  { %9549 = shalt.err (!%p9546_p2)
}
  0x6a   :  { %112 = dma.hbm_to_vmem [thread:$0]  %s10253_s7, 27648, %s107_s26, [#allocation12], %s9625_s29, %s9625_s29, %s9626_s16  }
  0x6b   :  { %s9637_s19 = smov [#allocation16]   ;;  %s9638_s22 = smov [#allocation19]  }
  0x6c   :  { %s132_s20 = sshll.u32 %s9637_s19, 4  ;;  %s156_s5 = sshll.u32 %s9638_s22, 4  ;;  %s133_s20 = int_to_ptr.vmem [resolvable:$true] %s132_s20  ;;  %s157_s5 = int_to_ptr.vmem [resolvable:$true] %s156_s5 }
  0x6d   :  { %s9558_s23 = scalar_lea.vmem %s133_s20, 144  ;;  %s9562_s11 = scalar_lea.vmem %s133_s20, 160 }
  0x6e   :  { %p9559_p3 = scmp.ne.s32.totalorder %s133_s20, %s9558_s23  ;;  %p9563_p4 = scmp.lt.s32.totalorder %s133_s20, %s133_s20 }
  0x6f   :  { %p9564_p5 = scmp.lt.s32.totalorder %s9562_s11, %s9558_s23 }
  0x71   :  { %p9565_p6 = por %p9564_p5, %p9563_p4 }
  0x73   :  { %p9566_p7 = pnand %p9565_p6, %p9559_p3 }
  0x75   :  { %9569 = shalt.err (!%p9566_p7)
}
  0x76   :  { %138 = dma.hbm_to_vmem [thread:$0]  %s10256_s10, 144, %s133_s20, [#allocation15], %s9629_s27, %s9629_s27, %s9630_s28  }
  0x77   :  { %s9578_s7 = scalar_lea.vmem %s157_s5, 144  ;;  %s9582_s29 = scalar_lea.vmem %s157_s5, 160 }
  0x78   :  { %p9579_p8 = scmp.ne.s32.totalorder %s157_s5, %s9578_s7  ;;  %p9583_p9 = scmp.lt.s32.totalorder %s157_s5, %s157_s5 }
  0x79   :  { %p9584_p10 = scmp.lt.s32.totalorder %s9582_s29, %s9578_s7 }
  0x7b   :  { %p9585_p11 = por %p9584_p10, %p9583_p9 }
  0x7d   :  { %p9586_p12 = pnand %p9585_p11, %p9579_p8 }
  0x7f   :  { %9589 = shalt.err (!%p9586_p12)
}
  0x80   :  { %162 = dma.hbm_to_vmem [thread:$0]  %s10258_s12, 144, %s157_s5, [#allocation18], %s9629_s27, %s9629_s27, %s9630_s28  }
  0x81   :  { %s9639_s21 = smov [#allocation20]  }
  0x82   :  { %s168_s25 = sshll.u32 %s9639_s21, 4  ;;  %s169_s25 = int_to_ptr.vmem [resolvable:$true] %s168_s25 }
  0x83   :  { %s9598_s10 = scalar_lea.vmem %s169_s25, 3072  ;;  %p9603_p0 = scmp.lt.s32.totalorder %s169_s25, %s169_s25 }
  0x84   :  { %p9599_p13 = scmp.ne.s32.totalorder %s169_s25, %s9598_s10  ;;  %p9604_p1 = scmp.lt.s32.totalorder %s9598_s10, %s9598_s10 }
  0x86   :  { %p9605_p2 = por %p9604_p1, %p9603_p0 }
  0x88   :  { %p9606_p3 = pnand %p9605_p2, %p9599_p13 }
  0x8a   :  { %9609 = shalt.err (!%p9606_p3)
}
  0x8b   :  { %s9640_s26 = smov 64   ;;  %s9641_s0 = smov 4  }
  0x8c   :  { %174 = dma.hbm_to_vmem [thread:$0]  %s10259_s13, 3072, %s169_s25, [#allocation21], %s9640_s26, %s9640_s26, %s9641_s0  }
  0x8d   :  { %9610 = dma.done.wait [#allocation4], 128  }
  0x8e   :  { %9611 = vsyncadd [#allocation4], 4294967168 }
  0x8f   :  { %9612 = dma.done.wait [#allocation6], 3120  }
  0x90   :  { %9613 = vsyncadd [#allocation6], 4294964176 }
  0x91   :  { %9614 = dma.done.wait [#allocation9], 55296  }
  0x92   :  { %9615 = vsyncadd [#allocation9], 4294912000 }
  0x93   :  { %9616 = dma.done.wait [#allocation12], 27792  }
  0x94   :  { %9617 = vsyncadd [#allocation12], 4294939504 }
  0x95   :  { %9618 = dma.done.wait [#allocation15], 288  }
  0x96   :  { %9619 = vsyncadd [#allocation15], 4294967008 }
  0x97   :  { %9620 = dma.done.wait [#allocation18], 288  }
  0x98   :  { %9621 = vsyncadd [#allocation18], 4294967008 }
  0x99   :  { %9622 = dma.done.wait [#allocation21], 3072  }
  0x9a   :  { %9623 = vsyncadd [#allocation21], 4294964224  ;;  %v9642_v1 = vmov 0.0   ;;  %vm9643_vm0 = vmmov 0   ;;  %v9644_v2 = vmov 0   ;;  %v218_v26 = vld [vmem:[#allocation3] sm:$0xff] }
  0x9b   :  { %8197 = vmatprep.subr.bf16.mxu1 %v9642_v1  ;;  %8213 = vmatprep.mubr.msk.bf16.mxu1 %vm9643_vm0, %v9642_v1  ;;  %v8438_v3 = vld [vmem:[#allocation5 + $0xac] ss:$12 sps:$4 sm:$0xff]   ;;  %v8440_v4 = vld [vmem:[#allocation5 + $0xb0] ss:$12 sps:$4 sm:$0xff]   ;;  %v8441_v5 = vld [vmem:[#allocation5 + $0xa8] ss:$12 sps:$4 sm:$0xff]   ;;  %v219_v29 = vpack.c.bf16 %v218_v26, %v218_v26 }
  0x9c   :  { %429 = vmatprep.mubr.bf16.mxu0 %v9644_v2  ;;  %397 = vmatprep.subr.bf16.mxu0 %v8438_v3  ;;  %v8442_v6 = vld [vmem:[#allocation5 + $0x94] ss:$12 sps:$4 sm:$0xff]   ;;  %v8444_v7 = vld [vmem:[#allocation5 + $0x98] ss:$12 sps:$4 sm:$0xff]   ;;  %v8445_v8 = vld [vmem:[#allocation5 + $0x90] ss:$12 sps:$4 sm:$0xff]  }
  0x9d   :  { %8198 = vmatpush3.bf16.msra.mxu1 %v8440_v4  ;;  %398 = vmatpush1.bf16.msra.mxu0 %v8441_v5  ;;  %v8446_v9 = vld [vmem:[#allocation5 + $0x7c] ss:$12 sps:$4 sm:$0xff]   ;;  %v8448_v10 = vld [vmem:[#allocation5 + $0x80] ss:$12 sps:$4 sm:$0xff]   ;;  %v8449_v11 = vld [vmem:[#allocation5 + $0x78] ss:$12 sps:$4 sm:$0xff]  }
  0x9e   :  { %8199 = vmatprep.subr.bf16.mxu1 %v9642_v1  ;;  %399 = vmatprep.subr.bf16.mxu0 %v8442_v6  ;;  %v8450_v12 = vld [vmem:[#allocation5 + $0x64] ss:$12 sps:$4 sm:$0xff]   ;;  %v8452_v13 = vld [vmem:[#allocation5 + $0x68] ss:$12 sps:$4 sm:$0xff]   ;;  %v8453_v14 = vld [vmem:[#allocation5 + $0x60] ss:$12 sps:$4 sm:$0xff]  }
  0x9f   :  { %v8454_v15 = vld [vmem:[#allocation5 + $0x4c] ss:$12 sps:$4 sm:$0xff]   ;;  %v8456_v16 = vld [vmem:[#allocation5 + $0x50] ss:$12 sps:$4 sm:$0xff]   ;;  %v8457_v17 = vld [vmem:[#allocation5 + $0x48] ss:$12 sps:$4 sm:$0xff]  }
  0xa0   :  { %v8458_v18 = vld [vmem:[#allocation5 + $0x34] ss:$12 sps:$4 sm:$0xff]   ;;  %v8460_v19 = vld [vmem:[#allocation5 + $0x38] ss:$12 sps:$4 sm:$0xff]   ;;  %v8461_v20 = vld [vmem:[#allocation5 + $0x30] ss:$12 sps:$4 sm:$0xff]  }
  0xa1   :  { %8200 = vmatpush3.bf16.msra.mxu1 %v8444_v7  ;;  %400 = vmatpush1.bf16.msra.mxu0 %v8445_v8  ;;  %v8462_v21 = vld [vmem:[#allocation5 + $0x1c] ss:$12 sps:$4 sm:$0xff]   ;;  %v8464_v22 = vld [vmem:[#allocation5 + $0x20] ss:$12 sps:$4 sm:$0xff]   ;;  %v8465_v23 = vld [vmem:[#allocation5 + $0x18] ss:$12 sps:$4 sm:$0xff]  }
  0xa2   :  { %8201 = vmatprep.subr.bf16.mxu1 %v9642_v1  ;;  %401 = vmatprep.subr.bf16.mxu0 %v8446_v9  ;;  %v8466_v24 = vld [vmem:[#allocation5 + $0x4] ss:$12 sps:$4 sm:$0xff]   ;;  %v8468_v25 = vld [vmem:[#allocation5 + $0x8] ss:$12 sps:$4 sm:$0xff]   ;;  %v8469_v27 = vld [vmem:[#allocation5] ss:$12 sps:$4 sm:$0xff]  }
  0xa3   :  { %v8472_v28 = vld [vmem:[#allocation8 + $0xac] ss:$12 sps:$4 sm:$0xff]   ;;  %v8494_v31 = vld [vmem:[#allocation8 + $0x228] ss:$12 sps:$4 sm:$0xff]   ;;  %v8473_v35 = vld [vmem:[#allocation8 + $0x90] ss:$12 sps:$4 sm:$0xff]  }
  0xa4   :  { %v8496_v30 = vld [vmem:[#allocation8 + $0x22c] ss:$12 sps:$4 sm:$0xff]   ;;  %v8470_v32 = vld [vmem:[#allocation8 + $0xa8] ss:$12 sps:$4 sm:$0xff]   ;;  %v8500_v36 = vld [vmem:[#allocation8 + $0x210] ss:$12 sps:$4 sm:$0xff]  }
  0xa5   :  { %8202 = vmatpush3.bf16.msra.mxu1 %v8448_v10  ;;  %402 = vmatpush1.bf16.msra.mxu0 %v8449_v11  ;;  %v8475_v33 = vld [vmem:[#allocation8 + $0x94] ss:$12 sps:$4 sm:$0xff]   ;;  %v8508_v37 = vld [vmem:[#allocation8 + $0x1fc] ss:$12 sps:$4 sm:$0xff]   ;;  %v8476_v39 = vld [vmem:[#allocation8 + $0x78] ss:$12 sps:$4 sm:$0xff]  }
  0xa6   :  { %8203 = vmatprep.subr.bf16.mxu1 %v9642_v1  ;;  %403 = vmatprep.subr.bf16.mxu0 %v8450_v12  ;;  %v8502_v34 = vld [vmem:[#allocation8 + $0x214] ss:$12 sps:$4 sm:$0xff]   ;;  %v8478_v38 = vld [vmem:[#allocation8 + $0x7c] ss:$12 sps:$4 sm:$0xff]   ;;  %v8506_v40 = vld [vmem:[#allocation8 + $0x1f8] ss:$12 sps:$4 sm:$0xff]  }
  0xa7   :  { %v8514_v41 = vld [vmem:[#allocation8 + $0x1e4] ss:$12 sps:$4 sm:$0xff]   ;;  %v8479_v43 = vld [vmem:[#allocation8 + $0x60] ss:$12 sps:$4 sm:$0xff]   ;;  %v8482_v47 = vld [vmem:[#allocation8 + $0x48] ss:$12 sps:$4 sm:$0xff]  }
  0xa8   :  { %v8481_v42 = vld [vmem:[#allocation8 + $0x64] ss:$12 sps:$4 sm:$0xff]   ;;  %v8512_v44 = vld [vmem:[#allocation8 + $0x1e0] ss:$12 sps:$4 sm:$0xff]   ;;  %v8518_v48 = vld [vmem:[#allocation8 + $0x1c8] ss:$12 sps:$4 sm:$0xff]  }
  0xa9   :  { %8204 = vmatpush3.bf16.msra.mxu1 %v8452_v13  ;;  %404 = vmatpush1.bf16.msra.mxu0 %v8453_v14  ;;  %v8520_v45 = vld [vmem:[#allocation8 + $0x1cc] ss:$12 sps:$4 sm:$0xff]   ;;  %v8487_v49 = vld [vmem:[#allocation8 + $0x34] ss:$12 sps:$4 sm:$0xff]   ;;  %v8524_v51 = vld [vmem:[#allocation8 + $0x1b0] ss:$12 sps:$4 sm:$0xff]  }
  0xaa   :  { %8205 = vmatprep.subr.bf16.mxu1 %v9642_v1  ;;  %405 = vmatprep.subr.bf16.mxu0 %v8454_v15  ;;  %v8484_v46 = vld [vmem:[#allocation8 + $0x4c] ss:$12 sps:$4 sm:$0xff]   ;;  %v8526_v50 = vld [vmem:[#allocation8 + $0x1b4] ss:$12 sps:$4 sm:$0xff]   ;;  %v8485_v52 = vld [vmem:[#allocation8 + $0x30] ss:$12 sps:$4 sm:$0xff]  }
  0xab   :  { %v8532_v53 = vld [vmem:[#allocation8 + $0x19c] ss:$12 sps:$4 sm:$0xff]   ;;  %v8530_v55 = vld [vmem:[#allocation8 + $0x198] ss:$12 sps:$4 sm:$0xff]   ;;  %v8491_v58 = vld [vmem:[#allocation8] ss:$12 sps:$4 sm:$0xff]  }
  0xac   :  { %v8490_v54 = vld [vmem:[#allocation8 + $0x1c] ss:$12 sps:$4 sm:$0xff]   ;;  %v8488_v56 = vld [vmem:[#allocation8 + $0x18] ss:$12 sps:$4 sm:$0xff]   ;;  %v8505_v61 = vld [vmem:[#allocation8 + $0x154] ss:$12 sps:$4 sm:$0xff]  }
  0xad   :  { %8206 = vmatpush3.bf16.msra.mxu1 %v8456_v16  ;;  %406 = vmatpush1.bf16.msra.mxu0 %v8457_v17  ;;  %v8493_v57 = vld [vmem:[#allocation8 + $0x4] ss:$12 sps:$4 sm:$0xff]   ;;  %v8499_v59 = vld [vmem:[#allocation8 + $0x16c] ss:$12 sps:$4 sm:$0xff]   ;;  %v8497_v60 = vld [vmem:[#allocation8 + $0x168] ss:$12 sps:$4 sm:$0xff]   ;;  %v254_v16 = vlaneseq }
  0xae   :  { %8207 = vmatprep.subr.bf16.mxu1 %v9642_v1  ;;  %407 = vmatprep.subr.bf16.mxu0 %v8458_v18  ;;  %v8503_v62 = vld [vmem:[#allocation8 + $0x150] ss:$12 sps:$4 sm:$0xff]   ;;  %v8509_v0 = vld [vmem:[#allocation8 + $0x138] ss:$12 sps:$4 sm:$0xff]   ;;  %v8515_v4 = vld [vmem:[#allocation8 + $0x120] ss:$12 sps:$4 sm:$0xff]  }
  0xaf   :  { %v8511_v63 = vld [vmem:[#allocation8 + $0x13c] ss:$12 sps:$4 sm:$0xff]   ;;  %v8517_v3 = vld [vmem:[#allocation8 + $0x124] ss:$12 sps:$4 sm:$0xff]   ;;  %v8523_v5 = vld [vmem:[#allocation8 + $0x10c] ss:$12 sps:$4 sm:$0xff]  }
  0xb0   :  { %v8521_v6 = vld [vmem:[#allocation8 + $0x108] ss:$12 sps:$4 sm:$0xff]   ;;  %v8527_v8 = vld [vmem:[#allocation8 + $0xf0] ss:$12 sps:$4 sm:$0xff]   ;;  %v8533_v11 = vld [vmem:[#allocation8 + $0xd8] ss:$12 sps:$4 sm:$0xff]  }
  0xb1   :  { %8208 = vmatpush3.bf16.msra.mxu1 %v8460_v19  ;;  %408 = vmatpush1.bf16.msra.mxu0 %v8461_v20  ;;  %v8529_v7 = vld [vmem:[#allocation8 + $0xf4] ss:$12 sps:$4 sm:$0xff]   ;;  %v8535_v9 = vld [vmem:[#allocation8 + $0xdc] ss:$12 sps:$4 sm:$0xff]   ;;  %v8538_v10 = vld [vmem:[#allocation8 + $0x184] ss:$12 sps:$4 sm:$0xff]  }
  0xb2   :  { %8209 = vmatprep.subr.bf16.mxu1 %v9642_v1  ;;  %409 = vmatprep.subr.bf16.mxu0 %v8462_v21  ;;  %v8536_v12 = vld [vmem:[#allocation8 + $0x180] ss:$12 sps:$4 sm:$0xff]   ;;  %v8541_v13 = vld [vmem:[#allocation8 + $0xc4] ss:$12 sps:$4 sm:$0xff]   ;;  %v255_v17 = vshrl.u32 %v254_v16, 7  ;;  %vm7162_vm1 = vcmask 7168  }
  0xb3   :  { %v8542_v14 = vld [vmem:[#allocation8 + $0x170] ss:$12 sps:$4 sm:$0xff]   ;;  %v8539_v15 = vld [vmem:[#allocation8 + $0xc0] ss:$12 sps:$4 sm:$0xff]  }
  0xb4   :  { %v252_v18 = vld [vmem:[#allocation7] sm:$0x7]  ;;  %v9814_v19 = vsub.s32 2, %v255_v17  ;;  %v9816_v20 = vsub.s32 0, %v255_v17  ;;  %v9818_v21 = vsub.s32 1, %v255_v17 }
  0xb5   :  { %8210 = vmatpush3.bf16.msra.mxu1 %v8464_v22  ;;  %410 = vmatpush1.bf16.msra.mxu0 %v8465_v23  ;;  %v8543_v26 = vld [vmem:[#allocation8 + $0xb0] ss:$12 sps:$4 sm:$0xff]   ;;  %v8587_v17 = vld [vmem:[#allocation10] ss:$12 sps:$4 sm:$0xff]  }
  0xb6   :  { %8211 = vmatprep.subr.bf16.mxu1 %v9642_v1  ;;  %411 = vmatprep.subr.bf16.mxu0 %v8466_v24  ;;  %v265_v22 = vrot.slane %v252_v18, %v9814_v19  ;;  %v257_v23 = vrot.slane %v252_v18, %v9816_v20  ;;  %v8589_v16 = vld [vmem:[#allocation10 + $0x4] ss:$12 sps:$4 sm:$0xff]  }
  0xb9   :  { %8212 = vmatpush3.bf16.msra.mxu1 %v8468_v25  ;;  %412 = vmatpush1.bf16.msra.mxu0 %v8469_v27  ;;  %v261_v25 = vrot.slane %v252_v18, %v9818_v21 }
  0xba   :  { %1019 = vmatprep.subr.bf16.mxu1 %v8496_v30  ;;  %978 = vmatprep.subr.bf16.mxu0 %v8472_v28 }
  0xbc   :  { %8214 = vmatmul.mubr.bf16.vlgmr.msra.gmra.mxu1 %v219_v29  ;;  %430 = vmatmul.mubr.bf16.vlgmr.msra.gmra.mxu0 %v219_v29  ;;  %v8544_v29 = vld [vmem:[#allocation8 + $0x158] ss:$12 sps:$4 sm:$0xff]  }
  0xbd   :  { %1020 = vmatpush1.bf16.msra.mxu1 %v8494_v31  ;;  %979 = vmatpush1.bf16.msra.mxu0 %v8470_v32 }
  0xbe   :  { %1021 = vmatprep.subr.bf16.mxu1 %v8502_v34  ;;  %980 = vmatprep.subr.bf16.mxu0 %v8475_v33 }
  0xbf   :  { %1051 = vmatprep.mubr.bf16.mxu1 %v9644_v2 }
  0xc1   :  { %1022 = vmatpush1.bf16.msra.mxu1 %v8500_v36  ;;  %981 = vmatpush1.bf16.msra.mxu0 %v8473_v35  ;;  %v8545_v36 = vld [vmem:[#allocation8 + $0x98] ss:$12 sps:$4 sm:$0xff]  }
  0xc2   :  { %1023 = vmatprep.subr.bf16.mxu1 %v8508_v37  ;;  %982 = vmatprep.subr.bf16.mxu0 %v8478_v38  ;;  %v8546_v37 = vld [vmem:[#allocation8 + $0x230] ss:$12 sps:$4 sm:$0xff]  }
  0xc5   :  { %1024 = vmatpush1.bf16.msra.mxu1 %v8506_v40  ;;  %983 = vmatpush1.bf16.msra.mxu0 %v8476_v39  ;;  %v8547_v40 = vld [vmem:[#allocation8 + $0x140] ss:$12 sps:$4 sm:$0xff]  }
  0xc6   :  { %1025 = vmatprep.subr.bf16.mxu1 %v8514_v41  ;;  %984 = vmatprep.subr.bf16.mxu0 %v8481_v42 }
  0xc9   :  { %1026 = vmatpush1.bf16.msra.mxu1 %v8512_v44  ;;  %985 = vmatpush1.bf16.msra.mxu0 %v8479_v43  ;;  %v8548_v44 = vld [vmem:[#allocation8 + $0x80] ss:$12 sps:$4 sm:$0xff]  }
  0xca   :  { %1027 = vmatprep.subr.bf16.mxu1 %v8520_v45  ;;  %986 = vmatprep.subr.bf16.mxu0 %v8484_v46  ;;  %v8549_v45 = vld [vmem:[#allocation8 + $0x218] ss:$12 sps:$4 sm:$0xff]   ;;  %v8550_v46 = vld [vmem:[#allocation8 + $0x128] ss:$12 sps:$4 sm:$0xff]  }
  0xcd   :  { %1028 = vmatpush1.bf16.msra.mxu1 %v8518_v48  ;;  %987 = vmatpush1.bf16.msra.mxu0 %v8482_v47  ;;  %v8551_v47 = vld [vmem:[#allocation8 + $0x68] ss:$12 sps:$4 sm:$0xff]   ;;  %v8552_v48 = vld [vmem:[#allocation8 + $0x200] ss:$12 sps:$4 sm:$0xff]  }
  0xce   :  { %1029 = vmatprep.subr.bf16.mxu1 %v8526_v50  ;;  %988 = vmatprep.subr.bf16.mxu0 %v8487_v49  ;;  %v8553_v49 = vld [vmem:[#allocation8 + $0x110] ss:$12 sps:$4 sm:$0xff]  }
  0xcf   :  { %v8554_v50 = vld [vmem:[#allocation8 + $0x50] ss:$12 sps:$4 sm:$0xff]  }
  0xd1   :  { %1030 = vmatpush1.bf16.msra.mxu1 %v8524_v51  ;;  %989 = vmatpush1.bf16.msra.mxu0 %v8485_v52  ;;  %v8555_v51 = vld [vmem:[#allocation8 + $0x1e8] ss:$12 sps:$4 sm:$0xff]   ;;  %v8556_v52 = vld [vmem:[#allocation8 + $0xf8] ss:$12 sps:$4 sm:$0xff]  }
  0xd2   :  { %1031 = vmatprep.subr.bf16.mxu1 %v8532_v53  ;;  %990 = vmatprep.subr.bf16.mxu0 %v8490_v54  ;;  %v8557_v53 = vld [vmem:[#allocation8 + $0x38] ss:$12 sps:$4 sm:$0xff]   ;;  %v8558_v54 = vld [vmem:[#allocation8 + $0x1d0] ss:$12 sps:$4 sm:$0xff]  }
  0xd5   :  { %1032 = vmatpush1.bf16.msra.mxu1 %v8530_v55  ;;  %991 = vmatpush1.bf16.msra.mxu0 %v8488_v56  ;;  %v8559_v55 = vld [vmem:[#allocation8 + $0xe0] ss:$12 sps:$4 sm:$0xff]  }
  0xd6   :  { %992 = vmatprep.subr.bf16.mxu0 %v8493_v57  ;;  %1033 = vmatprep.subr.bf16.mxu1 %v8538_v10  ;;  %v8560_v56 = vld [vmem:[#allocation8 + $0x20] ss:$12 sps:$4 sm:$0xff]   ;;  %v8561_v57 = vld [vmem:[#allocation8 + $0x1b8] ss:$12 sps:$4 sm:$0xff]  }
  0xd7   :  { %v8580_v10 = vld [vmem:[#allocation10 + $0x4c] ss:$12 sps:$4 sm:$0xff]  }
  0xd9   :  { %993 = vmatpush1.bf16.msra.mxu0 %v8491_v58  ;;  %1034 = vmatpush1.bf16.msra.mxu1 %v8536_v12  ;;  %v8562_v58 = vld [vmem:[#allocation8 + $0xc8] ss:$12 sps:$4 sm:$0xff]  }
  0xda   :  { %994 = vmatprep.subr.bf16.mxu0 %v8499_v59  ;;  %7887 = vmatprep.subr.bf16.mxu1 %v8542_v14  ;;  %v8563_v59 = vld [vmem:[#allocation8 + $0x8] ss:$12 sps:$4 sm:$0xff]  }
  0xdb   :  { %v8583_v12 = vld [vmem:[#allocation10 + $0x34] ss:$12 sps:$4 sm:$0xff]   ;;  %v8586_v14 = vld [vmem:[#allocation10 + $0x1c] ss:$12 sps:$4 sm:$0xff]  }
  0xdd   :  { %995 = vmatpush2.bf16.msra.mxu0 %v8497_v60  ;;  %v8564_v60 = vld [vmem:[#allocation8 + $0x1a0] ss:$12 sps:$4 sm:$0xff]  }
  0xde   :  { %996 = vmatprep.subr.bf16.mxu0 %v8505_v61  ;;  %v8565_v61 = vld [vmem:[#allocation8 + $0x188] ss:$12 sps:$4 sm:$0xff]  }
  0xe1   :  { %997 = vmatpush2.bf16.msra.mxu0 %v8503_v62  ;;  %v8566_v62 = vld [vmem:[#allocation10 + $0xa8] ss:$12 sps:$4 sm:$0xff]  }
  0xe2   :  { %998 = vmatprep.subr.bf16.mxu0 %v8511_v63  ;;  %v8568_v63 = vld [vmem:[#allocation10 + $0xac] ss:$12 sps:$4 sm:$0xff]  }
  0xe5   :  { %999 = vmatpush2.bf16.msra.mxu0 %v8509_v0  ;;  %v8571_v0 = vld [vmem:[#allocation10 + $0x94] ss:$12 sps:$4 sm:$0xff]  }
  0xe6   :  { %1000 = vmatprep.subr.bf16.mxu0 %v8517_v3  ;;  %v8569_v3 = vld [vmem:[#allocation10 + $0x90] ss:$12 sps:$4 sm:$0xff]  }
  0xe9   :  { %1001 = vmatpush2.bf16.msra.mxu0 %v8515_v4  ;;  %v8574_v4 = vld [vmem:[#allocation10 + $0x7c] ss:$12 sps:$4 sm:$0xff]  }
  0xea   :  { %1002 = vmatprep.subr.bf16.mxu0 %v8523_v5  ;;  %v8572_v5 = vld [vmem:[#allocation10 + $0x78] ss:$12 sps:$4 sm:$0xff]  }
  0xed   :  { %1003 = vmatpush2.bf16.msra.mxu0 %v8521_v6  ;;  %v8590_v6 = vld [vmem:[#allocation10 + $0x228] ss:$12 sps:$4 sm:$0xff]  }
  0xee   :  { %1004 = vmatprep.subr.bf16.mxu0 %v8529_v7  ;;  %v8592_v7 = vld [vmem:[#allocation10 + $0x22c] ss:$12 sps:$4 sm:$0xff]  }
  0xf1   :  { %1005 = vmatpush2.bf16.msra.mxu0 %v8527_v8  ;;  %v8577_v8 = vld [vmem:[#allocation10 + $0x64] ss:$12 sps:$4 sm:$0xff]  }
  0xf2   :  { %1006 = vmatprep.subr.bf16.mxu0 %v8535_v9  ;;  %v8575_v9 = vld [vmem:[#allocation10 + $0x60] ss:$12 sps:$4 sm:$0xff]  }
  0xf5   :  { %1007 = vmatpush2.bf16.msra.mxu0 %v8533_v11  ;;  %v8578_v11 = vld [vmem:[#allocation10 + $0x48] ss:$12 sps:$4 sm:$0xff]  }
  0xf6   :  { %1008 = vmatprep.subr.bf16.mxu0 %v8541_v13  ;;  %v8581_v13 = vld [vmem:[#allocation10 + $0x30] ss:$12 sps:$4 sm:$0xff]  }
  0xf9   :  { %1009 = vmatpush2.bf16.msra.mxu0 %v8539_v15  ;;  %v8584_v15 = vld [vmem:[#allocation10 + $0x18] ss:$12 sps:$4 sm:$0xff]  }
  0xfa   :  { %8217 = vmatprep.subr.bf16.mxu0 %v9642_v1 }
 0x17c   :  { %v472_v24 = vpop.f32.mrf.mxu1  ;;  %v431_v28 = vpop.f32.mrf.mxu0 }
 0x17d   :  { %v9823_v27 = vadd.f32 %v472_v24, %v265_v22  ;;  %v9825_v30 = vadd.f32 %v431_v28, %v257_v23 }
 0x17e   :  { %v8215_v31 = vpop.f32.mrf.mxu1  ;;  %v433_v33 = vpop.f32.mrf.mxu0 }
 0x17f   :  { %v9829_v32 = vpack.c.bf16 %v9823_v27, %v9823_v27  ;;  %v9831_v34 = vadd.f32 %v433_v33, %v261_v25  ;;  %v478_v38 = vpack.c.bf16 %v9825_v30, %v9825_v30  ;;  %v577_v31 = vld [vmem:[%s10250_s4] sm:$0x7] }
 0x180   :  { %v475_v35 = vpop.f32.mrf.mxu1  ;;  %v435_v39 = vpop.f32.mrf.mxu0  ;;  %v582_v33 = vrot.slane %v577_v31, %v9816_v20 }
 0x181   :  { %1052 = vmatmul.mubr.bf16.vlgmr.msra.gmra.mxu1 %v9829_v32  ;;  %v479_v41 = vpack.c.bf16 %v9831_v34, %v9831_v34  ;;  %v590_v39 = vrot.slane %v577_v31, %v9814_v19 }
 0x182   :  { %7888 = vmatpush3.bf16.msra.mxu1 %v8543_v26  ;;  %v8216_v42 = vpop.f32.mrf.mxu1  ;;  %v436_v43 = vpop.f32.mrf.mxu0 }
 0x183   :  { %7889 = vmatprep.subr.bf16.mxu1 %v8544_v29  ;;  %1010 = vmatprep.mubr.bf16.mxu0 %v479_v41 }
 0x184   :  { %1092 = vmatprep.mubr.bf16.mxu1 %v479_v41  ;;  %1011 = vmatmul.mubr.bf16.vlgmr.msra.gmra.mxu0 %v478_v38 }
 0x185   :  { %8218 = vmatpush3.bf16.msra.mxu0 %v8546_v37  ;;  %8233 = vmatprep.mubr.msk.bf16.mxu0 %vm9643_vm0, %v9642_v1 }
 0x186   :  { %7890 = vmatpush3.bf16.msra.mxu1 %v8545_v36  ;;  %8219 = vmatprep.subr.bf16.mxu0 %v9642_v1 }
 0x187   :  { %7891 = vmatprep.subr.bf16.mxu1 %v8547_v40 }
 0x189   :  { %8220 = vmatpush3.bf16.msra.mxu0 %v8549_v45 }
 0x18a   :  { %7892 = vmatpush3.bf16.msra.mxu1 %v8548_v44  ;;  %8221 = vmatprep.subr.bf16.mxu0 %v9642_v1 }
 0x18b   :  { %7893 = vmatprep.subr.bf16.mxu1 %v8550_v46 }
 0x18d   :  { %8222 = vmatpush3.bf16.msra.mxu0 %v8552_v48 }
 0x18e   :  { %7894 = vmatpush3.bf16.msra.mxu1 %v8551_v47  ;;  %8223 = vmatprep.subr.bf16.mxu0 %v9642_v1 }
 0x18f   :  { %7895 = vmatprep.subr.bf16.mxu1 %v8553_v49 }
 0x191   :  { %8224 = vmatpush3.bf16.msra.mxu0 %v8555_v51 }
 0x192   :  { %7896 = vmatpush3.bf16.msra.mxu1 %v8554_v50  ;;  %8225 = vmatprep.subr.bf16.mxu0 %v9642_v1 }
 0x193   :  { %7897 = vmatprep.subr.bf16.mxu1 %v8556_v52 }
 0x195   :  { %8226 = vmatpush3.bf16.msra.mxu0 %v8558_v54 }
 0x196   :  { %7898 = vmatpush3.bf16.msra.mxu1 %v8557_v53  ;;  %8227 = vmatprep.subr.bf16.mxu0 %v9642_v1 }
 0x197   :  { %7899 = vmatprep.subr.bf16.mxu1 %v8559_v55 }
 0x199   :  { %8228 = vmatpush3.bf16.msra.mxu0 %v8561_v57 }
 0x19a   :  { %7900 = vmatpush3.bf16.msra.mxu1 %v8560_v56  ;;  %8229 = vmatprep.subr.bf16.mxu0 %v9642_v1 }
 0x19b   :  { %7901 = vmatprep.subr.bf16.mxu1 %v8562_v58 }
 0x19d   :  { %8230 = vmatpush3.bf16.msra.mxu0 %v8564_v60  ;;  %v8598_v60 = vld [vmem:[#allocation10 + $0x214] ss:$12 sps:$4 sm:$0xff]  }
 0x19e   :  { %7902 = vmatpush3.bf16.msra.mxu1 %v8563_v59  ;;  %8231 = vmatprep.subr.bf16.mxu0 %v9642_v1  ;;  %v8593_v59 = vld [vmem:[#allocation10 + $0x168] ss:$12 sps:$4 sm:$0xff]  }
 0x19f   :  { %1706 = vmatprep.subr.bf16.mxu1 %v8568_v63  ;;  %v8599_v63 = vld [vmem:[#allocation10 + $0x150] ss:$12 sps:$4 sm:$0xff]  }
 0x1a1   :  { %1093 = vmatmul.mubr.bf16.vlgmr.msra.gmra.mxu1 %v478_v38  ;;  %8232 = vmatpush3.bf16.msra.mxu0 %v8565_v61  ;;  %v8596_v61 = vld [vmem:[#allocation10 + $0x210] ss:$12 sps:$4 sm:$0xff]  }
 0x1a2   :  { %1707 = vmatpush1.bf16.msra.mxu1 %v8566_v62  ;;  %1747 = vmatprep.subr.bf16.mxu0 %v8592_v7  ;;  %v8601_v62 = vld [vmem:[#allocation10 + $0x154] ss:$12 sps:$4 sm:$0xff]  }
 0x1a3   :  { %1708 = vmatprep.subr.bf16.mxu1 %v8571_v0  ;;  %v8604_v0 = vld [vmem:[#allocation10 + $0x1fc] ss:$12 sps:$4 sm:$0xff]   ;;  %v8608_v7 = vld [vmem:[#allocation10 + $0x1e0] ss:$12 sps:$4 sm:$0xff]  }
 0x1a4   :  { %8234 = vmatmul.mubr.bf16.vlgmr.msra.gmra.mxu0 %v9829_v32  ;;  %v586_v32 = vrot.slane %v577_v31, %v9818_v21  ;;  %v8638_v31 = vld [vmem:[#allocation10 + $0x170] ss:$12 sps:$4 sm:$0xff]  }
 0x1a5   :  { %1779 = vmatprep.mubr.bf16.mxu0 %v9644_v2  ;;  %1748 = vmatpush1.bf16.msra.mxu0 %v8590_v6  ;;  %v8610_v6 = vld [vmem:[#allocation10 + $0x1e4] ss:$12 sps:$4 sm:$0xff]  }
 0x1a6   :  { %1709 = vmatpush1.bf16.msra.mxu1 %v8569_v3  ;;  %1749 = vmatprep.subr.bf16.mxu0 %v8598_v60  ;;  %v8602_v3 = vld [vmem:[#allocation10 + $0x1f8] ss:$12 sps:$4 sm:$0xff]  }
 0x1a7   :  { %1710 = vmatprep.subr.bf16.mxu1 %v8574_v4  ;;  %v8607_v4 = vld [vmem:[#allocation10 + $0x13c] ss:$12 sps:$4 sm:$0xff]  }
 0x1a9   :  { %1750 = vmatpush1.bf16.msra.mxu0 %v8596_v61 }
 0x1aa   :  { %1711 = vmatpush1.bf16.msra.mxu1 %v8572_v5  ;;  %1751 = vmatprep.subr.bf16.mxu0 %v8604_v0  ;;  %v8605_v5 = vld [vmem:[#allocation10 + $0x138] ss:$12 sps:$4 sm:$0xff]  }
 0x1ab   :  { %1712 = vmatprep.subr.bf16.mxu1 %v8577_v8  ;;  %v8611_v8 = vld [vmem:[#allocation10 + $0x120] ss:$12 sps:$4 sm:$0xff]   ;;  %v8642_v0 = vld [vmem:[#allocation10 + $0x98] ss:$12 sps:$4 sm:$0xff]  }
 0x1ad   :  { %1752 = vmatpush1.bf16.msra.mxu0 %v8602_v3  ;;  %v8643_v3 = vld [vmem:[#allocation10 + $0x218] ss:$12 sps:$4 sm:$0xff]  }
 0x1ae   :  { %1713 = vmatpush1.bf16.msra.mxu1 %v8575_v9  ;;  %v8613_v9 = vld [vmem:[#allocation10 + $0x124] ss:$12 sps:$4 sm:$0xff]   ;;  %1753 = vmatprep.subr.bf16.mxu0 %v8610_v6  ;;  %v8646_v6 = vld [vmem:[#allocation10 + $0x200] ss:$12 sps:$4 sm:$0xff]  }
 0x1af   :  { %1714 = vmatprep.subr.bf16.mxu1 %v8580_v10  ;;  %v8616_v10 = vld [vmem:[#allocation10 + $0x1cc] ss:$12 sps:$4 sm:$0xff]  }
 0x1b1   :  { %1754 = vmatpush1.bf16.msra.mxu0 %v8608_v7  ;;  %v8647_v7 = vld [vmem:[#allocation10 + $0x128] ss:$12 sps:$4 sm:$0xff]  }
 0x1b2   :  { %1715 = vmatpush1.bf16.msra.mxu1 %v8578_v11  ;;  %v8614_v11 = vld [vmem:[#allocation10 + $0x1c8] ss:$12 sps:$4 sm:$0xff]   ;;  %1755 = vmatprep.subr.bf16.mxu0 %v8616_v10  ;;  %v8650_v10 = vld [vmem:[#allocation10 + $0x110] ss:$12 sps:$4 sm:$0xff]  }
 0x1b3   :  { %1716 = vmatprep.subr.bf16.mxu1 %v8583_v12  ;;  %v8619_v12 = vld [vmem:[#allocation10 + $0x10c] ss:$12 sps:$4 sm:$0xff]  }
 0x1b5   :  { %1756 = vmatpush1.bf16.msra.mxu0 %v8614_v11  ;;  %v8651_v11 = vld [vmem:[#allocation10 + $0x50] ss:$12 sps:$4 sm:$0xff]  }
 0x1b6   :  { %1717 = vmatpush1.bf16.msra.mxu1 %v8581_v13  ;;  %v8617_v13 = vld [vmem:[#allocation10 + $0x108] ss:$12 sps:$4 sm:$0xff]  }
 0x1b7   :  { %1718 = vmatprep.subr.bf16.mxu1 %v8586_v14  ;;  %v8622_v14 = vld [vmem:[#allocation10 + $0x1b4] ss:$12 sps:$4 sm:$0xff]  }
 0x1b8   :  { %1757 = vmatprep.subr.bf16.mxu0 %v8622_v14  ;;  %v8654_v14 = vld [vmem:[#allocation10 + $0x38] ss:$12 sps:$4 sm:$0xff]  }
 0x1ba   :  { %1719 = vmatpush1.bf16.msra.mxu1 %v8584_v15  ;;  %v8625_v15 = vld [vmem:[#allocation10 + $0xf4] ss:$12 sps:$4 sm:$0xff]  }
 0x1bb   :  { %1720 = vmatprep.subr.bf16.mxu1 %v8589_v16  ;;  %v8620_v16 = vld [vmem:[#allocation10 + $0x1b0] ss:$12 sps:$4 sm:$0xff]  }
 0x1bc   :  { %1758 = vmatpush1.bf16.msra.mxu0 %v8620_v16  ;;  %v8656_v16 = vld [vmem:[#allocation10 + $0xe0] ss:$12 sps:$4 sm:$0xff]  }
 0x1be   :  { %1721 = vmatpush1.bf16.msra.mxu1 %v8587_v17  ;;  %v8623_v17 = vld [vmem:[#allocation10 + $0xf0] ss:$12 sps:$4 sm:$0xff]  }
 0x241   :  { %v1053_v18 = vpop.f32.mrf.mxu1 }
 0x243   :  { %v1055_v22 = vpop.f32.mrf.mxu1 }
 0x244   :  { %v1012_v23 = vpop.f32.mrf.mxu0 }
 0x245   :  { %v1057_v24 = vpop.f32.mrf.mxu1  ;;  %v1013_v36 = vadd.f32 %v1012_v23, %v582_v33  ;;  %v8626_v23 = vld [vmem:[#allocation10 + $0x198] ss:$12 sps:$4 sm:$0xff]  }
 0x246   :  { %v1014_v25 = vpop.f32.mrf.mxu0  ;;  %v8629_v24 = vld [vmem:[#allocation10 + $0xd8] ss:$12 sps:$4 sm:$0xff]  }
 0x247   :  { %v1058_v26 = vpop.f32.mrf.mxu1  ;;  %v1015_v35 = vadd.f32 %v1014_v25, %v586_v32  ;;  %v1054_v41 = vadd.f32 %v1053_v18, %v1013_v36  ;;  %v8628_v18 = vld [vmem:[#allocation10 + $0x19c] ss:$12 sps:$4 sm:$0xff]   ;;  %v8634_v25 = vld [vmem:[#allocation10 + $0x184] ss:$12 sps:$4 sm:$0xff]  }
 0x248   :  { %v1016_v28 = vpop.f32.mrf.mxu0  ;;  %1759 = vmatprep.subr.bf16.mxu0 %v8628_v18  ;;  %v8637_v26 = vld [vmem:[#allocation10 + $0xc4] ss:$12 sps:$4 sm:$0xff]   ;;  %v8658_v18 = vld [vmem:[#allocation10 + $0x1a0] ss:$12 sps:$4 sm:$0xff]  }
 0x249   :  { %v1056_v38 = vadd.f32 %v1055_v22, %v1015_v35  ;;  %v9859_v49 = vadd.f32 %v1054_v41, %v9825_v30  ;;  %v8631_v22 = vld [vmem:[#allocation10 + $0xdc] ss:$12 sps:$4 sm:$0xff]   ;;  %1760 = vmatpush1.bf16.msra.mxu0 %v8626_v23  ;;  %v8632_v28 = vld [vmem:[#allocation10 + $0x180] ss:$12 sps:$4 sm:$0xff]   ;;  %v1144_v41 = vld [vmem:[#allocation16] sm:$0x7] }
 0x24a   :  { %v1017_v29 = vpop.f32.mrf.mxu0  ;;  %1761 = vmatprep.subr.bf16.mxu0 %v8634_v25  ;;  %v8660_v23 = vld [vmem:[#allocation10 + $0x8] ss:$12 sps:$4 sm:$0xff]  }
 0x24b   :  { %v9856_v45 = vadd.f32 %v1056_v38, %v9831_v34  ;;  %v1150_v56 = vmul.f32 %v9859_v49, %v9859_v49  ;;  %v8635_v29 = vld [vmem:[#allocation10 + $0xc0] ss:$12 sps:$4 sm:$0xff]  }
 0x24c   :  { %v8664_v25 = vld [vmem:[#allocation13 + $0xac] ss:$12 sps:$4 sm:$0xff]  }
 0x24d   :  { %v1145_v53 = vadd.f32 %v9856_v45, %v9859_v49  ;;  %v1151_v54 = vmul.f32 %v9856_v45, %v9856_v45  ;;  %1762 = vmatpush1.bf16.msra.mxu0 %v8632_v28  ;;  %v8667_v28 = vld [vmem:[#allocation13 + $0x94] ss:$12 sps:$4 sm:$0xff]  }
 0x24e   :  { %7918 = vmatprep.subr.bf16.mxu0 %v8638_v31  ;;  %v8670_v31 = vld [vmem:[#allocation13 + $0x7c] ss:$12 sps:$4 sm:$0xff]  }
 0x24f   :  { %v1153_v57 = vadd.f32 %v1151_v54, %v1150_v56  ;;  %v1191_v56 = vrot.slane %v1144_v41, %v9816_v20 }
 0x261   :  { %v7903_v37 = vpop.f32.mrf.mxu1 }
 0x263   :  { %v7904_v40 = vpop.f32.mrf.mxu1 }
 0x264   :  { %v7905_v42 = vadd.f32 %v7904_v40, %v7903_v37  ;;  %v1134_v44 = vpop.f32.mrf.mxu0  ;;  %v1143_v40 = vld [vmem:[%s10255_s9] sm:$0x7] }
 0x265   :  { %v7906_v43 = vpop.f32.mrf.mxu1 }
 0x266   :  { %v1095_v46 = vadd.f32 %v7905_v42, %v590_v39  ;;  %v8235_v48 = vpop.f32.mrf.mxu0  ;;  %v1176_v42 = vrot.slane %v1143_v40, %v9818_v21  ;;  %v1180_v43 = vrot.slane %v1143_v40, %v9814_v19 }
 0x267   :  { %v7907_v47 = vpop.f32.mrf.mxu1  ;;  %v1172_v48 = vrot.slane %v1143_v40, %v9816_v20  ;;  %v8682_v40 = vld [vmem:[#allocation13 + $0x1c] ss:$12 sps:$4 sm:$0xff]  }
 0x268   :  { %v1135_v50 = vadd.f32 %v1134_v44, %v1095_v46  ;;  %v1137_v51 = vpop.f32.mrf.mxu0 }
 0x269   :  { %v1195_v51 = vrot.slane %v1144_v41, %v9818_v21 }
 0x26a   :  { %v9862_v52 = vadd.f32 %v1135_v50, %v9823_v27  ;;  %v8236_v55 = vpop.f32.mrf.mxu0  ;;  %v8595_v27 = vld [vmem:[#allocation10 + $0x16c] ss:$12 sps:$4 sm:$0xff]  }
 0x26b   :  { %1722 = vmatprep.subr.bf16.mxu1 %v8595_v27  ;;  %v8639_v27 = vld [vmem:[#allocation10 + $0xb0] ss:$12 sps:$4 sm:$0xff]  }
 0x26c   :  { %v1146_v34 = vadd.f32 %v1145_v53, %v9862_v52  ;;  %v1152_v30 = vmul.f32 %v9862_v52, %v9862_v52  ;;  %1723 = vmatpush2.bf16.msra.mxu1 %v8593_v59  ;;  %v1199_v53 = vrot.slane %v1144_v41, %v9814_v19  ;;  %v8680_v41 = vld [vmem:[#allocation13 + $0x18] ss:$12 sps:$4 sm:$0xff]  }
 0x26d   :  { %1724 = vmatprep.subr.bf16.mxu1 %v8601_v62  ;;  %v8640_v62 = vld [vmem:[#allocation10 + $0x230] ss:$12 sps:$4 sm:$0xff]  }
 0x26e   :  { %1147 = vadd.xlane.f32.xlu0 %v1146_v34  ;;  %v1154_v58 = vadd.f32 %v1153_v57, %v1152_v30 }
 0x270   :  { %1725 = vmatpush2.bf16.msra.mxu1 %v8599_v63  ;;  %v8641_v63 = vld [vmem:[#allocation10 + $0x158] ss:$12 sps:$4 sm:$0xff]  }
 0x271   :  { %1726 = vmatprep.subr.bf16.mxu1 %v8607_v4  ;;  %v8644_v4 = vld [vmem:[#allocation10 + $0x140] ss:$12 sps:$4 sm:$0xff]  }
 0x272   :  { %1155 = vadd.xlane.f32.xlu0 %v1154_v58 }
 0x274   :  { %1727 = vmatpush2.bf16.msra.mxu1 %v8605_v5  ;;  %v8645_v5 = vld [vmem:[#allocation10 + $0x80] ss:$12 sps:$4 sm:$0xff]  }
 0x275   :  { %1728 = vmatprep.subr.bf16.mxu1 %v8613_v9  ;;  %v8649_v9 = vld [vmem:[#allocation10 + $0x1e8] ss:$12 sps:$4 sm:$0xff]  }
 0x278   :  { %1729 = vmatpush2.bf16.msra.mxu1 %v8611_v8  ;;  %v8648_v8 = vld [vmem:[#allocation10 + $0x68] ss:$12 sps:$4 sm:$0xff]  }
 0x279   :  { %1730 = vmatprep.subr.bf16.mxu1 %v8619_v12  ;;  %v8652_v12 = vld [vmem:[#allocation10 + $0x1d0] ss:$12 sps:$4 sm:$0xff]  }
 0x27c   :  { %1731 = vmatpush2.bf16.msra.mxu1 %v8617_v13  ;;  %v8653_v13 = vld [vmem:[#allocation10 + $0xf8] ss:$12 sps:$4 sm:$0xff]  }
 0x27d   :  { %1732 = vmatprep.subr.bf16.mxu1 %v8625_v15  ;;  %v8655_v15 = vld [vmem:[#allocation10 + $0x1b8] ss:$12 sps:$4 sm:$0xff]  }
 0x280   :  { %1733 = vmatpush2.bf16.msra.mxu1 %v8623_v17  ;;  %v8657_v17 = vld [vmem:[#allocation10 + $0x20] ss:$12 sps:$4 sm:$0xff]  }
 0x281   :  { %1734 = vmatprep.subr.bf16.mxu1 %v8631_v22  ;;  %v8659_v22 = vld [vmem:[#allocation10 + $0xc8] ss:$12 sps:$4 sm:$0xff]  }
 0x284   :  { %1735 = vmatpush2.bf16.msra.mxu1 %v8629_v24  ;;  %v8661_v24 = vld [vmem:[#allocation10 + $0x188] ss:$12 sps:$4 sm:$0xff]  }
 0x285   :  { %1736 = vmatprep.subr.bf16.mxu1 %v8637_v26  ;;  %v8662_v26 = vld [vmem:[#allocation13 + $0xa8] ss:$12 sps:$4 sm:$0xff]  }
 0x288   :  { %1737 = vmatpush2.bf16.msra.mxu1 %v8635_v29  ;;  %v8665_v29 = vld [vmem:[#allocation13 + $0x90] ss:$12 sps:$4 sm:$0xff]  }
 0x289   :  { %8237 = vmatprep.subr.bf16.mxu1 %v9642_v1 }
 0x2f7   :  { %v1148_v32 = vpop.xlane.xlu0 %1147 }
 0x2f8   :  { %v1149_v33 = vmul.f32 0.0033333334, %v1148_v32  ;;  %v8668_v32 = vld [vmem:[#allocation13 + $0x78] ss:$12 sps:$4 sm:$0xff]  }
 0x2fa   :  { %v1158_v36 = vmul.f32 %v1149_v33, %v1149_v33  ;;  %v1160_v44 = vsub.f32 %v9859_v49, %v1149_v33  ;;  %v1161_v46 = vsub.f32 %v9856_v45, %v1149_v33  ;;  %v1162_v47 = vsub.f32 %v9862_v52, %v1149_v33  ;;  %v8673_v33 = vld [vmem:[#allocation13 + $0x64] ss:$12 sps:$4 sm:$0xff]  }
 0x2fb   :  { %v1156_v35 = vpop.xlane.xlu0 %1155 }
 0x2fc   :  { %v1157_v37 = vmul.f32 0.0033333334, %v1156_v35  ;;  %v8671_v35 = vld [vmem:[#allocation13 + $0x60] ss:$12 sps:$4 sm:$0xff]  }
 0x2fe   :  { %v1159_v38 = vsub.f32 %v1157_v37, %v1158_v36  ;;  %v8676_v36 = vld [vmem:[#allocation13 + $0x4c] ss:$12 sps:$4 sm:$0xff]   ;;  %v8674_v37 = vld [vmem:[#allocation13 + $0x48] ss:$12 sps:$4 sm:$0xff]  }
 0x300   :  { %v1163_v39 = vadd.f32 1e-05, %v1159_v38  ;;  %v8679_v38 = vld [vmem:[#allocation13 + $0x34] ss:$12 sps:$4 sm:$0xff]  }
 0x302   :  { %9358 = vrsqrt.f32 %v1163_v39  ;;  %v8677_v39 = vld [vmem:[#allocation13 + $0x30] ss:$12 sps:$4 sm:$0xff]  }
 0x30f   :  { %v9359_v50 = vpop.eup %9358 }
 0x310   :  { %v1166_v54 = vmul.f32 %v9359_v50, %v1161_v46  ;;  %v1167_v55 = vmul.f32 %v9359_v50, %v1162_v47  ;;  %v1165_v34 = vmul.f32 %v9359_v50, %v1160_v44  ;;  %v8688_v44 = vld [vmem:[#allocation13 + $0x16c] ss:$12 sps:$4 sm:$0xff]   ;;  %v8686_v46 = vld [vmem:[#allocation13 + $0x168] ss:$12 sps:$4 sm:$0xff]  }
 0x311   :  { %v8691_v47 = vld [vmem:[#allocation13 + $0x154] ss:$12 sps:$4 sm:$0xff]   ;;  %v8694_v50 = vld [vmem:[#allocation13 + $0x13c] ss:$12 sps:$4 sm:$0xff]  }
 0x312   :  { %v1185_v30 = vmul.f32 %v1176_v42, %v1166_v54  ;;  %v1186_v57 = vmul.f32 %v1180_v43, %v1167_v55  ;;  %v1184_v58 = vmul.f32 %v1172_v48, %v1165_v34  ;;  %v8685_v42 = vld [vmem:[#allocation13 + $0x4] ss:$12 sps:$4 sm:$0xff]   ;;  %v8683_v43 = vld [vmem:[#allocation13] ss:$12 sps:$4 sm:$0xff]   ;;  %v8710_v34 = vld [vmem:[#allocation13 + $0x228] ss:$12 sps:$4 sm:$0xff]  }
 0x313   :  { %v8689_v48 = vld [vmem:[#allocation13 + $0x150] ss:$12 sps:$4 sm:$0xff]   ;;  %v8695_v54 = vld [vmem:[#allocation13 + $0x120] ss:$12 sps:$4 sm:$0xff]  }
 0x314   :  { %v9886_v49 = vadd.f32 %v1195_v51, %v1185_v30  ;;  %v9888_v45 = vadd.f32 %v1199_v53, %v1186_v57  ;;  %v9890_v52 = vadd.f32 %v1191_v56, %v1184_v58  ;;  %v8692_v51 = vld [vmem:[#allocation13 + $0x138] ss:$12 sps:$4 sm:$0xff]   ;;  %v8698_v30 = vld [vmem:[#allocation13 + $0x108] ss:$12 sps:$4 sm:$0xff]   ;;  %v8714_v58 = vld [vmem:[#allocation13 + $0x210] ss:$12 sps:$4 sm:$0xff]  }
 0x315   :  { %v8697_v53 = vld [vmem:[#allocation13 + $0x124] ss:$12 sps:$4 sm:$0xff]   ;;  %v8700_v55 = vld [vmem:[#allocation13 + $0x10c] ss:$12 sps:$4 sm:$0xff]   ;;  %v8703_v57 = vld [vmem:[#allocation13 + $0xf4] ss:$12 sps:$4 sm:$0xff]  }
 0x316   :  { %v1207_v59 = vpack.c.bf16 %v9886_v49, %v9886_v49  ;;  %v9896_v60 = vpack.c.bf16 %v9888_v45, %v9888_v45  ;;  %v1206_v61 = vpack.c.bf16 %v9890_v52, %v9890_v52  ;;  %v8712_v56 = vld [vmem:[#allocation13 + $0x22c] ss:$12 sps:$4 sm:$0xff]  }
 0x318   :  { %1738 = vmatprep.mubr.bf16.mxu1 %v1207_v59  ;;  %1780 = vmatmul.mubr.bf16.vlgmr.msra.gmra.mxu0 %v9896_v60 }
 0x319   :  { %7919 = vmatpush3.bf16.msra.mxu0 %v8639_v27  ;;  %1739 = vmatmul.mubr.bf16.vlgmr.msra.gmra.mxu1 %v1206_v61  ;;  %v8716_v27 = vld [vmem:[#allocation13 + $0x214] ss:$12 sps:$4 sm:$0xff]  }
 0x31a   :  { %1820 = vmatprep.mubr.bf16.mxu0 %v1207_v59  ;;  %8238 = vmatpush3.bf16.msra.mxu1 %v8640_v62  ;;  %v8701_v59 = vld [vmem:[#allocation13 + $0xf0] ss:$12 sps:$4 sm:$0xff]  }
 0x31b   :  { %7920 = vmatprep.subr.bf16.mxu0 %v8641_v63  ;;  %8239 = vmatprep.subr.bf16.mxu1 %v9642_v1  ;;  %v8720_v62 = vld [vmem:[#allocation13 + $0x1fc] ss:$12 sps:$4 sm:$0xff]   ;;  %v8704_v63 = vld [vmem:[#allocation13 + $0xd8] ss:$12 sps:$4 sm:$0xff]  }
 0x31c   :  { %8253 = vmatprep.mubr.msk.bf16.mxu1 %vm9643_vm0, %v9642_v1 }
 0x31d   :  { %7921 = vmatpush3.bf16.msra.mxu0 %v8642_v0  ;;  %v8709_v0 = vld [vmem:[#allocation13 + $0xc4] ss:$12 sps:$4 sm:$0xff]  }
 0x31e   :  { %8240 = vmatpush3.bf16.msra.mxu1 %v8643_v3  ;;  %7922 = vmatprep.subr.bf16.mxu0 %v8644_v4  ;;  %v8722_v3 = vld [vmem:[#allocation13 + $0x1e0] ss:$12 sps:$4 sm:$0xff]   ;;  %v8724_v4 = vld [vmem:[#allocation13 + $0x1e4] ss:$12 sps:$4 sm:$0xff]  }
 0x31f   :  { %8241 = vmatprep.subr.bf16.mxu1 %v9642_v1 }
 0x321   :  { %7923 = vmatpush3.bf16.msra.mxu0 %v8645_v5  ;;  %v8707_v5 = vld [vmem:[#allocation13 + $0xc0] ss:$12 sps:$4 sm:$0xff]  }
 0x322   :  { %8242 = vmatpush3.bf16.msra.mxu1 %v8646_v6  ;;  %7924 = vmatprep.subr.bf16.mxu0 %v8647_v7  ;;  %v8726_v6 = vld [vmem:[#allocation13 + $0x1c8] ss:$12 sps:$4 sm:$0xff]   ;;  %v8728_v7 = vld [vmem:[#allocation13 + $0x1cc] ss:$12 sps:$4 sm:$0xff]  }
 0x323   :  { %8243 = vmatprep.subr.bf16.mxu1 %v9642_v1 }
 0x325   :  { %7925 = vmatpush3.bf16.msra.mxu0 %v8648_v8  ;;  %v8732_v8 = vld [vmem:[#allocation13 + $0x1b4] ss:$12 sps:$4 sm:$0xff]  }
 0x326   :  { %8244 = vmatpush3.bf16.msra.mxu1 %v8649_v9  ;;  %7926 = vmatprep.subr.bf16.mxu0 %v8650_v10  ;;  %v8730_v9 = vld [vmem:[#allocation13 + $0x1b0] ss:$12 sps:$4 sm:$0xff]  }
 0x327   :  { %8245 = vmatprep.subr.bf16.mxu1 %v9642_v1  ;;  %v8736_v10 = vld [vmem:[#allocation13 + $0x19c] ss:$12 sps:$4 sm:$0xff]  }
 0x329   :  { %7927 = vmatpush3.bf16.msra.mxu0 %v8651_v11  ;;  %v8734_v11 = vld [vmem:[#allocation13 + $0x198] ss:$12 sps:$4 sm:$0xff]  }
 0x32a   :  { %8246 = vmatpush3.bf16.msra.mxu1 %v8652_v12  ;;  %7928 = vmatprep.subr.bf16.mxu0 %v8653_v13  ;;  %v8740_v12 = vld [vmem:[#allocation13 + $0x184] ss:$12 sps:$4 sm:$0xff]   ;;  %v8738_v13 = vld [vmem:[#allocation13 + $0x180] ss:$12 sps:$4 sm:$0xff]  }
 0x32b   :  { %8247 = vmatprep.subr.bf16.mxu1 %v9642_v1 }
 0x32d   :  { %7929 = vmatpush3.bf16.msra.mxu0 %v8654_v14  ;;  %v8742_v14 = vld [vmem:[#allocation13 + $0x170] ss:$12 sps:$4 sm:$0xff]  }
 0x32e   :  { %8248 = vmatpush3.bf16.msra.mxu1 %v8655_v15  ;;  %7930 = vmatprep.subr.bf16.mxu0 %v8656_v16  ;;  %v1305_v15 = vld [vmem:[#allocation11] sm:$0x7] }
 0x32f   :  { %8249 = vmatprep.subr.bf16.mxu1 %v9642_v1  ;;  %v1310_v16 = vrot.slane %v1305_v15, %v9816_v20 }
 0x331   :  { %7931 = vmatpush3.bf16.msra.mxu0 %v8657_v17 }
 0x332   :  { %8250 = vmatpush3.bf16.msra.mxu1 %v8658_v18  ;;  %7932 = vmatprep.subr.bf16.mxu0 %v8659_v22  ;;  %v1314_v18 = vrot.slane %v1305_v15, %v9818_v21 }
 0x333   :  { %8251 = vmatprep.subr.bf16.mxu1 %v9642_v1 }
 0x335   :  { %7933 = vmatpush3.bf16.msra.mxu0 %v8660_v23 }
 0x336   :  { %8252 = vmatpush3.bf16.msra.mxu1 %v8661_v24  ;;  %2371 = vmatprep.subr.bf16.mxu0 %v8664_v25 }
 0x337   :  { %2412 = vmatprep.subr.bf16.mxu1 %v8712_v56 }
 0x338   :  { %1821 = vmatmul.mubr.bf16.vlgmr.msra.gmra.mxu0 %v1206_v61  ;;  %v8718_v61 = vld [vmem:[#allocation13 + $0x1f8] ss:$12 sps:$4 sm:$0xff]  }
 0x339   :  { %8254 = vmatmul.mubr.bf16.vlgmr.msra.gmra.mxu1 %v9896_v60  ;;  %2372 = vmatpush1.bf16.msra.mxu0 %v8662_v26  ;;  %v8706_v60 = vld [vmem:[#allocation13 + $0xdc] ss:$12 sps:$4 sm:$0xff]  }
 0x33a   :  { %2373 = vmatprep.subr.bf16.mxu0 %v8667_v28  ;;  %2444 = vmatprep.mubr.bf16.mxu1 %v9644_v2 }
 0x33b   :  { %2413 = vmatpush1.bf16.msra.mxu1 %v8710_v34 }
 0x33c   :  { %2414 = vmatprep.subr.bf16.mxu1 %v8716_v27 }
 0x33d   :  { %2374 = vmatpush1.bf16.msra.mxu0 %v8665_v29 }
 0x33e   :  { %2375 = vmatprep.subr.bf16.mxu0 %v8670_v31 }
 0x33f   :  { %2415 = vmatpush1.bf16.msra.mxu1 %v8714_v58  ;;  %v8741_v58 = vld [vmem:[#allocation13 + $0x188] ss:$12 sps:$4 sm:$0xff]  }
 0x340   :  { %2416 = vmatprep.subr.bf16.mxu1 %v8720_v62 }
 0x341   :  { %2376 = vmatpush1.bf16.msra.mxu0 %v8668_v32 }
 0x342   :  { %2377 = vmatprep.subr.bf16.mxu0 %v8673_v33 }
 0x343   :  { %2417 = vmatpush1.bf16.msra.mxu1 %v8718_v61  ;;  %v8743_v61 = vld [vmem:[#allocation13 + $0xb0] ss:$12 sps:$4 sm:$0xff]  }
 0x344   :  { %2418 = vmatprep.subr.bf16.mxu1 %v8724_v4  ;;  %v8747_v4 = vld [vmem:[#allocation13 + $0x80] ss:$12 sps:$4 sm:$0xff]  }
 0x345   :  { %2378 = vmatpush1.bf16.msra.mxu0 %v8671_v35 }
 0x346   :  { %2379 = vmatprep.subr.bf16.mxu0 %v8676_v36 }
 0x347   :  { %2419 = vmatpush1.bf16.msra.mxu1 %v8722_v3  ;;  %v8746_v3 = vld [vmem:[#allocation13 + $0x140] ss:$12 sps:$4 sm:$0xff]  }
 0x348   :  { %2420 = vmatprep.subr.bf16.mxu1 %v8728_v7  ;;  %v8750_v7 = vld [vmem:[#allocation13 + $0x110] ss:$12 sps:$4 sm:$0xff]  }
 0x349   :  { %2380 = vmatpush1.bf16.msra.mxu0 %v8674_v37 }
 0x34a   :  { %2381 = vmatprep.subr.bf16.mxu0 %v8679_v38 }
 0x34b   :  { %2421 = vmatpush1.bf16.msra.mxu1 %v8726_v6  ;;  %v8749_v6 = vld [vmem:[#allocation13 + $0x68] ss:$12 sps:$4 sm:$0xff]  }
 0x34c   :  { %2422 = vmatprep.subr.bf16.mxu1 %v8732_v8  ;;  %v8751_v8 = vld [vmem:[#allocation13 + $0x50] ss:$12 sps:$4 sm:$0xff]  }
 0x34d   :  { %2382 = vmatpush1.bf16.msra.mxu0 %v8677_v39  ;;  %v8713_v39 = vld [vmem:[#allocation13 + $0x230] ss:$12 sps:$4 sm:$0xff]  }
 0x34e   :  { %2383 = vmatprep.subr.bf16.mxu0 %v8682_v40 }
 0x34f   :  { %2423 = vmatpush1.bf16.msra.mxu1 %v8730_v9  ;;  %v8752_v9 = vld [vmem:[#allocation13 + $0xf8] ss:$12 sps:$4 sm:$0xff]  }
 0x350   :  { %2424 = vmatprep.subr.bf16.mxu1 %v8736_v10  ;;  %v8753_v10 = vld [vmem:[#allocation13 + $0x38] ss:$12 sps:$4 sm:$0xff]  }
 0x351   :  { %2384 = vmatpush1.bf16.msra.mxu0 %v8680_v41  ;;  %v8717_v41 = vld [vmem:[#allocation13 + $0x218] ss:$12 sps:$4 sm:$0xff]  }
 0x352   :  { %2385 = vmatprep.subr.bf16.mxu0 %v8685_v42  ;;  %v8721_v42 = vld [vmem:[#allocation13 + $0x200] ss:$12 sps:$4 sm:$0xff]  }
 0x353   :  { %2425 = vmatpush1.bf16.msra.mxu1 %v8734_v11  ;;  %v8754_v11 = vld [vmem:[#allocation13 + $0xe0] ss:$12 sps:$4 sm:$0xff]  }
 0x354   :  { %2426 = vmatprep.subr.bf16.mxu1 %v8740_v12  ;;  %v8755_v12 = vld [vmem:[#allocation13 + $0x20] ss:$12 sps:$4 sm:$0xff]  }
 0x355   :  { %2386 = vmatpush1.bf16.msra.mxu0 %v8683_v43  ;;  %v8725_v43 = vld [vmem:[#allocation13 + $0x1e8] ss:$12 sps:$4 sm:$0xff]  }
 0x356   :  { %2387 = vmatprep.subr.bf16.mxu0 %v8688_v44  ;;  %v8729_v44 = vld [vmem:[#allocation13 + $0x1d0] ss:$12 sps:$4 sm:$0xff]  }
 0x357   :  { %2427 = vmatpush1.bf16.msra.mxu1 %v8738_v13  ;;  %v8756_v13 = vld [vmem:[#allocation13 + $0xc8] ss:$12 sps:$4 sm:$0xff]  }
 0x358   :  { %7949 = vmatprep.subr.bf16.mxu1 %v8742_v14  ;;  %v8757_v14 = vld [vmem:[#allocation13 + $0x8] ss:$12 sps:$4 sm:$0xff]  }
 0x359   :  { %2388 = vmatpush2.bf16.msra.mxu0 %v8686_v46  ;;  %v8733_v46 = vld [vmem:[#allocation13 + $0x1b8] ss:$12 sps:$4 sm:$0xff]  }
 0x35a   :  { %2389 = vmatprep.subr.bf16.mxu0 %v8691_v47 }
 0x35d   :  { %2390 = vmatpush2.bf16.msra.mxu0 %v8689_v48 }
 0x35e   :  { %2391 = vmatprep.subr.bf16.mxu0 %v8694_v50  ;;  %v1318_v50 = vrot.slane %v1305_v15, %v9814_v19  ;;  %v8758_v15 = vld [vmem:[#allocation8 + $0x2e8] ss:$12 sps:$4 sm:$0xff]  }
 0x361   :  { %2392 = vmatpush2.bf16.msra.mxu0 %v8692_v51 }
 0x362   :  { %2393 = vmatprep.subr.bf16.mxu0 %v8697_v53  ;;  %v8737_v53 = vld [vmem:[#allocation13 + $0x1a0] ss:$12 sps:$4 sm:$0xff]  }
 0x365   :  { %2394 = vmatpush2.bf16.msra.mxu0 %v8695_v54 }
 0x366   :  { %2395 = vmatprep.subr.bf16.mxu0 %v8700_v55 }
 0x369   :  { %2396 = vmatpush2.bf16.msra.mxu0 %v8698_v30 }
 0x36a   :  { %2397 = vmatprep.subr.bf16.mxu0 %v8703_v57 }
 0x36d   :  { %2398 = vmatpush2.bf16.msra.mxu0 %v8701_v59 }
 0x36e   :  { %2399 = vmatprep.subr.bf16.mxu0 %v8706_v60 }
 0x371   :  { %2400 = vmatpush2.bf16.msra.mxu0 %v8704_v63  ;;  %v8744_v63 = vld [vmem:[#allocation13 + $0x158] ss:$12 sps:$4 sm:$0xff]  }
 0x372   :  { %2401 = vmatprep.subr.bf16.mxu0 %v8709_v0  ;;  %v8745_v0 = vld [vmem:[#allocation13 + $0x98] ss:$12 sps:$4 sm:$0xff]  }
 0x375   :  { %2402 = vmatpush2.bf16.msra.mxu0 %v8707_v5  ;;  %v8748_v5 = vld [vmem:[#allocation13 + $0x128] ss:$12 sps:$4 sm:$0xff]  }
 0x376   :  { %8257 = vmatprep.subr.bf16.mxu0 %v9642_v1 }
 0x3d8   :  { %v1781_v17 = vpop.f32.mrf.mxu0 }
 0x3d9   :  { %v1740_v22 = vpop.f32.mrf.mxu1 }
 0x3da   :  { %v1741_v23 = vadd.f32 %v1740_v22, %v1310_v16  ;;  %v1783_v24 = vpop.f32.mrf.mxu0  ;;  %v8760_v16 = vld [vmem:[#allocation8 + $0x2ec] ss:$12 sps:$4 sm:$0xff]   ;;  %v8766_v22 = vld [vmem:[#allocation8 + $0x2bc] ss:$12 sps:$4 sm:$0xff]  }
 0x3db   :  { %v1742_v25 = vpop.f32.mrf.mxu1 }
 0x3dc   :  { %v1782_v26 = vadd.f32 %v1781_v17, %v1741_v23  ;;  %v1743_v28 = vadd.f32 %v1742_v25, %v1314_v18  ;;  %v1785_v29 = vpop.f32.mrf.mxu0  ;;  %v8763_v17 = vld [vmem:[#allocation8 + $0x2d4] ss:$12 sps:$4 sm:$0xff]   ;;  %v8761_v18 = vld [vmem:[#allocation8 + $0x2d0] ss:$12 sps:$4 sm:$0xff]   ;;  %v8764_v25 = vld [vmem:[#allocation8 + $0x2b8] ss:$12 sps:$4 sm:$0xff]  }
 0x3dd   :  { %v1744_v31 = vpop.f32.mrf.mxu1  ;;  %v8782_v23 = vld [vmem:[#allocation8 + $0x468] ss:$12 sps:$4 sm:$0xff]   ;;  %v8772_v29 = vld [vmem:[#allocation8 + $0x28c] ss:$12 sps:$4 sm:$0xff]  }
 0x3de   :  { %v1784_v32 = vadd.f32 %v1783_v24, %v1743_v28  ;;  %v1786_v33 = vpop.f32.mrf.mxu0  ;;  %v1868_v35 = vmax.f32 %v1782_v26, 0.0  ;;  %v8784_v24 = vld [vmem:[#allocation8 + $0x46c] ss:$12 sps:$4 sm:$0xff]   ;;  %v8769_v26 = vld [vmem:[#allocation8 + $0x2a4] ss:$12 sps:$4 sm:$0xff]  }
 0x3df   :  { %v1745_v36 = vpop.f32.mrf.mxu1  ;;  %v8767_v28 = vld [vmem:[#allocation8 + $0x2a0] ss:$12 sps:$4 sm:$0xff]   ;;  %v8770_v31 = vld [vmem:[#allocation8 + $0x288] ss:$12 sps:$4 sm:$0xff]   ;;  %v8773_v33 = vld [vmem:[#allocation8 + $0x270] ss:$12 sps:$4 sm:$0xff]  }
 0x3e0   :  { %v1869_v37 = vmax.f32 %v1784_v32, 0.0  ;;  %v9915_v40 = vpack.c.bf16 %v1868_v35, %v1868_v35  ;;  %v8775_v32 = vld [vmem:[#allocation8 + $0x274] ss:$12 sps:$4 sm:$0xff]   ;;  %v8778_v35 = vld [vmem:[#allocation8 + $0x25c] ss:$12 sps:$4 sm:$0xff]  }
 0x3e1   :  { %v8776_v36 = vld [vmem:[#allocation8 + $0x258] ss:$12 sps:$4 sm:$0xff]  }
 0x3e2   :  { %v1872_v38 = vpack.c.bf16 %v1869_v37, %v1869_v37  ;;  %v8781_v37 = vld [vmem:[#allocation8 + $0x244] ss:$12 sps:$4 sm:$0xff]  }
 0x3e4   :  { %2403 = vmatprep.mubr.bf16.mxu0 %v1872_v38 }
 0x3e5   :  { %2404 = vmatmul.mubr.bf16.vlgmr.msra.gmra.mxu0 %v9915_v40 }
 0x3e6   :  { %8258 = vmatpush3.bf16.msra.mxu0 %v8713_v39  ;;  %8273 = vmatprep.mubr.msk.bf16.mxu0 %vm9643_vm0, %v9642_v1 }
 0x3e7   :  { %8259 = vmatprep.subr.bf16.mxu0 %v9642_v1 }
 0x3ea   :  { %8260 = vmatpush3.bf16.msra.mxu0 %v8717_v41 }
 0x3eb   :  { %8261 = vmatprep.subr.bf16.mxu0 %v9642_v1 }
 0x3ee   :  { %8262 = vmatpush3.bf16.msra.mxu0 %v8721_v42 }
 0x3ef   :  { %8263 = vmatprep.subr.bf16.mxu0 %v9642_v1 }
 0x3f2   :  { %8264 = vmatpush3.bf16.msra.mxu0 %v8725_v43 }
 0x3f3   :  { %8265 = vmatprep.subr.bf16.mxu0 %v9642_v1 }
 0x3f6   :  { %8266 = vmatpush3.bf16.msra.mxu0 %v8729_v44 }
 0x3f7   :  { %8267 = vmatprep.subr.bf16.mxu0 %v9642_v1 }
 0x3f8   :  { %v7934_v47 = vpop.f32.mrf.mxu0 }
 0x3f9   :  { %v1862_v48 = vpop.f32.mrf.mxu1 }
 0x3fa   :  { %v7935_v51 = vpop.f32.mrf.mxu0  ;;  %8268 = vmatpush3.bf16.msra.mxu0 %v8733_v46 }
 0x3fb   :  { %v7936_v54 = vadd.f32 %v7935_v51, %v7934_v47  ;;  %v8255_v55 = vpop.f32.mrf.mxu1  ;;  %8269 = vmatprep.subr.bf16.mxu0 %v9642_v1 }
 0x3fc   :  { %v7937_v34 = vpop.f32.mrf.mxu0 }
 0x3fd   :  { %v1823_v56 = vadd.f32 %v7936_v54, %v1318_v50  ;;  %v1865_v30 = vpop.f32.mrf.mxu1  ;;  %v1970_v54 = vld [vmem:[#allocation14] sm:$0x7] }
 0x3fe   :  { %v7938_v57 = vpop.f32.mrf.mxu0  ;;  %8270 = vmatpush3.bf16.msra.mxu0 %v8737_v53  ;;  %v1979_v55 = vrot.slane %v1970_v54, %v9818_v21  ;;  %v1975_v34 = vrot.slane %v1970_v54, %v9816_v20 }
 0x3ff   :  { %v1863_v27 = vadd.f32 %v1862_v48, %v1823_v56  ;;  %v8256_v59 = vpop.f32.mrf.mxu1  ;;  %8271 = vmatprep.subr.bf16.mxu0 %v9642_v1 }
 0x401   :  { %v1870_v60 = vmax.f32 %v1863_v27, 0.0  ;;  %v1983_v27 = vrot.slane %v1970_v54, %v9814_v19 }
 0x402   :  { %8272 = vmatpush3.bf16.msra.mxu0 %v8741_v58 }
 0x403   :  { %v1873_v62 = vpack.c.bf16 %v1870_v60, %v1870_v60  ;;  %3142 = vmatprep.subr.bf16.mxu0 %v8784_v24  ;;  %v8802_v24 = vld [vmem:[#allocation8 + $0x424] ss:$12 sps:$4 sm:$0xff]  }
 0x405   :  { %2445 = vmatmul.mubr.bf16.vlgmr.msra.gmra.mxu1 %v1873_v62  ;;  %8274 = vmatmul.mubr.bf16.vlgmr.msra.gmra.mxu0 %v1873_v62 }
 0x406   :  { %7950 = vmatpush3.bf16.msra.mxu1 %v8743_v61  ;;  %2485 = vmatprep.mubr.bf16.mxu1 %v1872_v38  ;;  %v8779_v38 = vld [vmem:[#allocation8 + $0x240] ss:$12 sps:$4 sm:$0xff]  }
 0x407   :  { %7951 = vmatprep.subr.bf16.mxu1 %v8744_v63  ;;  %3174 = vmatprep.mubr.bf16.mxu0 %v9644_v2 }
 0x408   :  { %3143 = vmatpush1.bf16.msra.mxu0 %v8782_v23  ;;  %v8797_v23 = vld [vmem:[#allocation8 + $0x378] ss:$12 sps:$4 sm:$0xff]  }
 0x40a   :  { %7952 = vmatpush3.bf16.msra.mxu1 %v8745_v0 }
 0x40b   :  { %7953 = vmatprep.subr.bf16.mxu1 %v8746_v3 }
 0x40e   :  { %7954 = vmatpush3.bf16.msra.mxu1 %v8747_v4 }
 0x40f   :  { %7955 = vmatprep.subr.bf16.mxu1 %v8748_v5 }
 0x412   :  { %7956 = vmatpush3.bf16.msra.mxu1 %v8749_v6 }
 0x413   :  { %7957 = vmatprep.subr.bf16.mxu1 %v8750_v7 }
 0x416   :  { %7958 = vmatpush3.bf16.msra.mxu1 %v8751_v8 }
 0x417   :  { %7959 = vmatprep.subr.bf16.mxu1 %v8752_v9 }
 0x41a   :  { %7960 = vmatpush3.bf16.msra.mxu1 %v8753_v10 }
 0x41b   :  { %7961 = vmatprep.subr.bf16.mxu1 %v8754_v11 }
 0x41e   :  { %7962 = vmatpush3.bf16.msra.mxu1 %v8755_v12  ;;  %v8785_v12 = vld [vmem:[#allocation8 + $0x3a8] ss:$12 sps:$4 sm:$0xff]  }
 0x41f   :  { %7963 = vmatprep.subr.bf16.mxu1 %v8756_v13  ;;  %v8790_v13 = vld [vmem:[#allocation8 + $0x454] ss:$12 sps:$4 sm:$0xff]  }
 0x420   :  { %3144 = vmatprep.subr.bf16.mxu0 %v8790_v13 }
 0x422   :  { %7964 = vmatpush3.bf16.msra.mxu1 %v8757_v14  ;;  %v8788_v14 = vld [vmem:[#allocation8 + $0x450] ss:$12 sps:$4 sm:$0xff]  }
 0x423   :  { %3101 = vmatprep.subr.bf16.mxu1 %v8760_v16  ;;  %v8791_v16 = vld [vmem:[#allocation8 + $0x390] ss:$12 sps:$4 sm:$0xff]   ;;  %3145 = vmatpush1.bf16.msra.mxu0 %v8788_v14 }
 0x425   :  { %2486 = vmatmul.mubr.bf16.vlgmr.msra.gmra.mxu1 %v9915_v40 }
 0x426   :  { %3102 = vmatpush1.bf16.msra.mxu1 %v8758_v15  ;;  %v8793_v15 = vld [vmem:[#allocation8 + $0x394] ss:$12 sps:$4 sm:$0xff]  }
 0x427   :  { %3103 = vmatprep.subr.bf16.mxu1 %v8763_v17  ;;  %v8796_v17 = vld [vmem:[#allocation8 + $0x43c] ss:$12 sps:$4 sm:$0xff]  }
 0x428   :  { %3146 = vmatprep.subr.bf16.mxu0 %v8796_v17  ;;  %v8834_v17 = vld [vmem:[#allocation8 + $0x2d8] ss:$12 sps:$4 sm:$0xff]  }
 0x42a   :  { %3104 = vmatpush1.bf16.msra.mxu1 %v8761_v18  ;;  %v8794_v18 = vld [vmem:[#allocation8 + $0x438] ss:$12 sps:$4 sm:$0xff]  }
 0x42b   :  { %3105 = vmatprep.subr.bf16.mxu1 %v8766_v22  ;;  %v8799_v22 = vld [vmem:[#allocation8 + $0x37c] ss:$12 sps:$4 sm:$0xff]   ;;  %3147 = vmatpush1.bf16.msra.mxu0 %v8794_v18  ;;  %v8835_v18 = vld [vmem:[#allocation8 + $0x458] ss:$12 sps:$4 sm:$0xff]  }
 0x42c   :  { %3148 = vmatprep.subr.bf16.mxu0 %v8802_v24  ;;  %v8838_v24 = vld [vmem:[#allocation8 + $0x440] ss:$12 sps:$4 sm:$0xff]  }
 0x42e   :  { %3106 = vmatpush1.bf16.msra.mxu1 %v8764_v25  ;;  %v8800_v25 = vld [vmem:[#allocation8 + $0x420] ss:$12 sps:$4 sm:$0xff]  }
 0x42f   :  { %3107 = vmatprep.subr.bf16.mxu1 %v8769_v26  ;;  %v8803_v26 = vld [vmem:[#allocation8 + $0x360] ss:$12 sps:$4 sm:$0xff]   ;;  %3149 = vmatpush1.bf16.msra.mxu0 %v8800_v25  ;;  %v8839_v25 = vld [vmem:[#allocation8 + $0x368] ss:$12 sps:$4 sm:$0xff]  }
 0x432   :  { %3108 = vmatpush1.bf16.msra.mxu1 %v8767_v28  ;;  %v8805_v28 = vld [vmem:[#allocation8 + $0x364] ss:$12 sps:$4 sm:$0xff]  }
 0x433   :  { %3109 = vmatprep.subr.bf16.mxu1 %v8772_v29  ;;  %v8808_v29 = vld [vmem:[#allocation8 + $0x40c] ss:$12 sps:$4 sm:$0xff]  }
 0x434   :  { %3150 = vmatprep.subr.bf16.mxu0 %v8808_v29  ;;  %v8842_v29 = vld [vmem:[#allocation8 + $0x350] ss:$12 sps:$4 sm:$0xff]  }
 0x436   :  { %3110 = vmatpush1.bf16.msra.mxu1 %v8770_v31  ;;  %v8806_v31 = vld [vmem:[#allocation8 + $0x408] ss:$12 sps:$4 sm:$0xff]  }
 0x437   :  { %3111 = vmatprep.subr.bf16.mxu1 %v8775_v32  ;;  %v8811_v32 = vld [vmem:[#allocation8 + $0x34c] ss:$12 sps:$4 sm:$0xff]   ;;  %3151 = vmatpush1.bf16.msra.mxu0 %v8806_v31  ;;  %v8843_v31 = vld [vmem:[#allocation8 + $0x290] ss:$12 sps:$4 sm:$0xff]  }
 0x43a   :  { %3112 = vmatpush1.bf16.msra.mxu1 %v8773_v33  ;;  %v8809_v33 = vld [vmem:[#allocation8 + $0x348] ss:$12 sps:$4 sm:$0xff]  }
 0x43b   :  { %3113 = vmatprep.subr.bf16.mxu1 %v8778_v35  ;;  %v8814_v35 = vld [vmem:[#allocation8 + $0x3f4] ss:$12 sps:$4 sm:$0xff]  }
 0x43c   :  { %3152 = vmatprep.subr.bf16.mxu0 %v8814_v35  ;;  %v8846_v35 = vld [vmem:[#allocation8 + $0x278] ss:$12 sps:$4 sm:$0xff]  }
 0x43e   :  { %3114 = vmatpush1.bf16.msra.mxu1 %v8776_v36  ;;  %v8817_v36 = vld [vmem:[#allocation8 + $0x334] ss:$12 sps:$4 sm:$0xff]  }
 0x43f   :  { %3115 = vmatprep.subr.bf16.mxu1 %v8781_v37  ;;  %v8812_v37 = vld [vmem:[#allocation8 + $0x3f0] ss:$12 sps:$4 sm:$0xff]  }
 0x440   :  { %3153 = vmatpush1.bf16.msra.mxu0 %v8812_v37  ;;  %v8848_v37 = vld [vmem:[#allocation8 + $0x320] ss:$12 sps:$4 sm:$0xff]  }
 0x442   :  { %3116 = vmatpush1.bf16.msra.mxu1 %v8779_v38  ;;  %v8815_v38 = vld [vmem:[#allocation8 + $0x330] ss:$12 sps:$4 sm:$0xff]  }
 0x4a5   :  { %v2405_v39 = vpop.f32.mrf.mxu0 }
 0x4a6   :  { %v2406_v57 = vadd.f32 %v2405_v39, %v1975_v34  ;;  %v8820_v39 = vld [vmem:[#allocation8 + $0x3dc] ss:$12 sps:$4 sm:$0xff]  }
 0x4a7   :  { %v2407_v40 = vpop.f32.mrf.mxu0  ;;  %3154 = vmatprep.subr.bf16.mxu0 %v8820_v39  ;;  %v8850_v39 = vld [vmem:[#allocation8 + $0x3e0] ss:$12 sps:$4 sm:$0xff]  }
 0x4a8   :  { %v2408_v56 = vadd.f32 %v2407_v40, %v1979_v55  ;;  %v8823_v40 = vld [vmem:[#allocation8 + $0x31c] ss:$12 sps:$4 sm:$0xff]  }
 0x4a9   :  { %v2409_v41 = vpop.f32.mrf.mxu0 }
 0x4aa   :  { %v8818_v41 = vld [vmem:[#allocation8 + $0x3d8] ss:$12 sps:$4 sm:$0xff]  }
 0x4ab   :  { %v2410_v42 = vpop.f32.mrf.mxu0  ;;  %3155 = vmatpush1.bf16.msra.mxu0 %v8818_v41  ;;  %v8852_v41 = vld [vmem:[#allocation8 + $0x248] ss:$12 sps:$4 sm:$0xff]  }
 0x4ac   :  { %v8821_v42 = vld [vmem:[#allocation8 + $0x318] ss:$12 sps:$4 sm:$0xff]  }
 0x4c5   :  { %v2446_v43 = vpop.f32.mrf.mxu1  ;;  %v2527_v44 = vpop.f32.mrf.mxu0 }
 0x4c6   :  { %v2447_v60 = vadd.f32 %v2446_v43, %v2406_v57  ;;  %v8826_v43 = vld [vmem:[#allocation8 + $0x3c4] ss:$12 sps:$4 sm:$0xff]   ;;  %v2537_v57 = vld [vmem:[#allocation19] sm:$0x7] }
 0x4c7   :  { %v2448_v46 = vpop.f32.mrf.mxu1  ;;  %v8275_v47 = vpop.f32.mrf.mxu0  ;;  %3156 = vmatprep.subr.bf16.mxu0 %v8826_v43  ;;  %v8854_v43 = vld [vmem:[#allocation10 + $0x2e8] ss:$12 sps:$4 sm:$0xff]  }
 0x4c8   :  { %v2449_v58 = vadd.f32 %v2448_v46, %v2408_v56  ;;  %v9937_v4 = vadd.f32 %v2447_v60, %v9890_v52  ;;  %v8824_v46 = vld [vmem:[#allocation8 + $0x3c0] ss:$12 sps:$4 sm:$0xff]  }
 0x4c9   :  { %v2450_v48 = vpop.f32.mrf.mxu1  ;;  %v2530_v50 = vpop.f32.mrf.mxu0  ;;  %v8827_v47 = vld [vmem:[#allocation8 + $0x300] ss:$12 sps:$4 sm:$0xff]   ;;  %3157 = vmatpush1.bf16.msra.mxu0 %v8824_v46 }
 0x4ca   :  { %v9934_v63 = vadd.f32 %v2449_v58, %v9886_v49  ;;  %v2543_v49 = vmul.f32 %v9937_v4, %v9937_v4  ;;  %v8830_v48 = vld [vmem:[#allocation8 + $0x3b0] ss:$12 sps:$4 sm:$0xff]   ;;  %v8859_v46 = vld [vmem:[#allocation10 + $0x2d4] ss:$12 sps:$4 sm:$0xff]  }
 0x4cb   :  { %v2451_v51 = vpop.f32.mrf.mxu1  ;;  %v8276_v53 = vpop.f32.mrf.mxu0  ;;  %7980 = vmatprep.subr.bf16.mxu0 %v8830_v48  ;;  %v8862_v48 = vld [vmem:[#allocation10 + $0x2bc] ss:$12 sps:$4 sm:$0xff]  }
 0x4cc   :  { %v2538_v7 = vadd.f32 %v9934_v63, %v9937_v4  ;;  %v2544_v8 = vmul.f32 %v9934_v63, %v9934_v63 }
 0x4ce   :  { %v2546_v52 = vadd.f32 %v2544_v8, %v2543_v49  ;;  %v2584_v49 = vrot.slane %v2537_v57, %v9816_v20 }
 0x4e5   :  { %v7965_v30 = vpop.f32.mrf.mxu1 }
 0x4e7   :  { %v7966_v59 = vpop.f32.mrf.mxu1 }
 0x4e8   :  { %v7967_v61 = vadd.f32 %v7966_v59, %v7965_v30  ;;  %v2536_v30 = vld [vmem:[#allocation17] sm:$0x7] }
 0x4e9   :  { %v7968_v62 = vpop.f32.mrf.mxu1  ;;  %v2569_v58 = vrot.slane %v2536_v30, %v9818_v21 }
 0x4ea   :  { %v2488_v0 = vadd.f32 %v7967_v61, %v1983_v27  ;;  %v2573_v27 = vrot.slane %v2536_v30, %v9814_v19  ;;  %v2565_v62 = vrot.slane %v2536_v30, %v9816_v20  ;;  %v8871_v30 = vld [vmem:[#allocation10 + $0x274] ss:$12 sps:$4 sm:$0xff]  }
 0x4eb   :  { %v7969_v3 = vpop.f32.mrf.mxu1 }
 0x4ec   :  { %v2528_v5 = vadd.f32 %v2527_v44, %v2488_v0  ;;  %v8829_v44 = vld [vmem:[#allocation8 + $0x304] ss:$12 sps:$4 sm:$0xff]   ;;  %v2588_v3 = vrot.slane %v2537_v57, %v9818_v21 }
 0x4ee   :  { %v9940_v6 = vadd.f32 %v2528_v5, %v9888_v45  ;;  %v8787_v45 = vld [vmem:[#allocation8 + $0x3ac] ss:$12 sps:$4 sm:$0xff]   ;;  %v2592_v5 = vrot.slane %v2537_v57, %v9814_v19  ;;  %v8869_v57 = vld [vmem:[#allocation10 + $0x270] ss:$12 sps:$4 sm:$0xff]  }
 0x4ef   :  { %3117 = vmatprep.subr.bf16.mxu1 %v8787_v45  ;;  %v8831_v45 = vld [vmem:[#allocation8 + $0x2f0] ss:$12 sps:$4 sm:$0xff]  }
 0x4f0   :  { %v2539_v9 = vadd.f32 %v2538_v7, %v9940_v6  ;;  %v2545_v10 = vmul.f32 %v9940_v6, %v9940_v6  ;;  %3118 = vmatpush2.bf16.msra.mxu1 %v8785_v12 }
 0x4f1   :  { %3119 = vmatprep.subr.bf16.mxu1 %v8793_v15  ;;  %v8832_v15 = vld [vmem:[#allocation8 + $0x470] ss:$12 sps:$4 sm:$0xff]  }
 0x4f2   :  { %2540 = vadd.xlane.f32.xlu1 %v2539_v9  ;;  %v2547_v11 = vadd.f32 %v2546_v52, %v2545_v10 }
 0x4f4   :  { %3120 = vmatpush2.bf16.msra.mxu1 %v8791_v16  ;;  %v8833_v16 = vld [vmem:[#allocation8 + $0x398] ss:$12 sps:$4 sm:$0xff]  }
 0x4f5   :  { %3121 = vmatprep.subr.bf16.mxu1 %v8799_v22  ;;  %v8836_v22 = vld [vmem:[#allocation8 + $0x380] ss:$12 sps:$4 sm:$0xff]  }
 0x4f6   :  { %2548 = vadd.xlane.f32.xlu1 %v2547_v11 }
 0x4f8   :  { %3122 = vmatpush2.bf16.msra.mxu1 %v8797_v23  ;;  %v8837_v23 = vld [vmem:[#allocation8 + $0x2c0] ss:$12 sps:$4 sm:$0xff]  }
 0x4f9   :  { %3123 = vmatprep.subr.bf16.mxu1 %v8805_v28  ;;  %v8841_v28 = vld [vmem:[#allocation8 + $0x428] ss:$12 sps:$4 sm:$0xff]  }
 0x4fc   :  { %3124 = vmatpush2.bf16.msra.mxu1 %v8803_v26  ;;  %v8840_v26 = vld [vmem:[#allocation8 + $0x2a8] ss:$12 sps:$4 sm:$0xff]  }
 0x4fd   :  { %3125 = vmatprep.subr.bf16.mxu1 %v8811_v32  ;;  %v8844_v32 = vld [vmem:[#allocation8 + $0x410] ss:$12 sps:$4 sm:$0xff]  }
 0x500   :  { %3126 = vmatpush2.bf16.msra.mxu1 %v8809_v33  ;;  %v8845_v33 = vld [vmem:[#allocation8 + $0x338] ss:$12 sps:$4 sm:$0xff]  }
 0x501   :  { %3127 = vmatprep.subr.bf16.mxu1 %v8817_v36  ;;  %v8847_v36 = vld [vmem:[#allocation8 + $0x3f8] ss:$12 sps:$4 sm:$0xff]  }
 0x504   :  { %3128 = vmatpush2.bf16.msra.mxu1 %v8815_v38  ;;  %v8849_v38 = vld [vmem:[#allocation8 + $0x260] ss:$12 sps:$4 sm:$0xff]  }
 0x505   :  { %3129 = vmatprep.subr.bf16.mxu1 %v8823_v40  ;;  %v8851_v40 = vld [vmem:[#allocation8 + $0x308] ss:$12 sps:$4 sm:$0xff]  }
 0x508   :  { %3130 = vmatpush2.bf16.msra.mxu1 %v8821_v42  ;;  %v8853_v42 = vld [vmem:[#allocation8 + $0x3c8] ss:$12 sps:$4 sm:$0xff]  }
 0x509   :  { %3131 = vmatprep.subr.bf16.mxu1 %v8829_v44  ;;  %v8856_v44 = vld [vmem:[#allocation10 + $0x2ec] ss:$12 sps:$4 sm:$0xff]  }
 0x50c   :  { %3132 = vmatpush2.bf16.msra.mxu1 %v8827_v47  ;;  %v8857_v47 = vld [vmem:[#allocation10 + $0x2d0] ss:$12 sps:$4 sm:$0xff]  }
 0x50d   :  { %8277 = vmatprep.subr.bf16.mxu1 %v9642_v1 }
 0x57b   :  { %v2541_v50 = vpop.xlane.xlu1 %2540 }
 0x57c   :  { %v2542_v51 = vmul.f32 0.0033333334, %v2541_v50  ;;  %v8878_v50 = vld [vmem:[#allocation10 + $0x468] ss:$12 sps:$4 sm:$0xff]  }
 0x57e   :  { %v2551_v54 = vmul.f32 %v2542_v51, %v2542_v51  ;;  %v2553_v59 = vsub.f32 %v9937_v4, %v2542_v51  ;;  %v2554_v60 = vsub.f32 %v9934_v63, %v2542_v51  ;;  %v2555_v61 = vsub.f32 %v9940_v6, %v2542_v51  ;;  %v8880_v51 = vld [vmem:[#allocation10 + $0x46c] ss:$12 sps:$4 sm:$0xff]  }
 0x57f   :  { %v2549_v53 = vpop.xlane.xlu1 %2548 }
 0x580   :  { %v2550_v55 = vmul.f32 0.0033333334, %v2549_v53  ;;  %v8860_v53 = vld [vmem:[#allocation10 + $0x2b8] ss:$12 sps:$4 sm:$0xff]  }
 0x582   :  { %v2552_v34 = vsub.f32 %v2550_v55, %v2551_v54  ;;  %v8865_v54 = vld [vmem:[#allocation10 + $0x2a4] ss:$12 sps:$4 sm:$0xff]   ;;  %v8863_v55 = vld [vmem:[#allocation10 + $0x2a0] ss:$12 sps:$4 sm:$0xff]  }
 0x584   :  { %v2556_v56 = vadd.f32 1e-05, %v2552_v34  ;;  %v8868_v34 = vld [vmem:[#allocation10 + $0x28c] ss:$12 sps:$4 sm:$0xff]  }
 0x586   :  { %9360 = vrsqrt.f32 %v2556_v56  ;;  %v8866_v56 = vld [vmem:[#allocation10 + $0x288] ss:$12 sps:$4 sm:$0xff]  }
 0x593   :  { %v9361_v0 = vpop.eup %9360 }
 0x594   :  { %v2559_v7 = vmul.f32 %v9361_v0, %v2554_v60  ;;  %v2560_v8 = vmul.f32 %v9361_v0, %v2555_v61  ;;  %v2558_v9 = vmul.f32 %v9361_v0, %v2553_v59  ;;  %v8877_v59 = vld [vmem:[#allocation10 + $0x244] ss:$12 sps:$4 sm:$0xff]   ;;  %v8875_v60 = vld [vmem:[#allocation10 + $0x240] ss:$12 sps:$4 sm:$0xff]  }
 0x595   :  { %v8883_v61 = vld [vmem:[#allocation10 + $0x3ac] ss:$12 sps:$4 sm:$0xff]  }
 0x596   :  { %v2578_v10 = vmul.f32 %v2569_v58, %v2559_v7  ;;  %v2579_v52 = vmul.f32 %v2573_v27, %v2560_v8  ;;  %v2577_v11 = vmul.f32 %v2565_v62, %v2558_v9  ;;  %v8874_v58 = vld [vmem:[#allocation10 + $0x25c] ss:$12 sps:$4 sm:$0xff]   ;;  %v8872_v27 = vld [vmem:[#allocation10 + $0x258] ss:$12 sps:$4 sm:$0xff]  }
 0x597   :  { %v8881_v62 = vld [vmem:[#allocation10 + $0x3a8] ss:$12 sps:$4 sm:$0xff]  }
 0x598   :  { %v9961_v4 = vadd.f32 %v2588_v3, %v2578_v10  ;;  %v9963_v63 = vadd.f32 %v2592_v5, %v2579_v52  ;;  %v9965_v6 = vadd.f32 %v2584_v49, %v2577_v11  ;;  %v7415_v52 = vld [vmem:[%s10250_s4 + $0x3] sm:$0x7] }
 0x599   :  { %v2709_v11 = vrot.slane %v7415_v52, %v9818_v21 }
 0x59a   :  { %v2600_v12 = vpack.c.bf16 %v9961_v4, %v9961_v4  ;;  %v2601_v13 = vpack.c.bf16 %v9963_v63, %v9963_v63  ;;  %v2599_v14 = vpack.c.bf16 %v9965_v6, %v9965_v6 }
 0x59c   :  { %3133 = vmatprep.mubr.bf16.mxu1 %v2600_v12  ;;  %3175 = vmatmul.mubr.bf16.vlgmr.msra.gmra.mxu0 %v2601_v13 }
 0x59d   :  { %7981 = vmatpush3.bf16.msra.mxu0 %v8831_v45  ;;  %3134 = vmatmul.mubr.bf16.vlgmr.msra.gmra.mxu1 %v2599_v14  ;;  %v2705_v45 = vrot.slane %v7415_v52, %v9816_v20 }
 0x59e   :  { %3215 = vmatprep.mubr.bf16.mxu0 %v2600_v12  ;;  %8278 = vmatpush3.bf16.msra.mxu1 %v8832_v15 }
 0x59f   :  { %7982 = vmatprep.subr.bf16.mxu0 %v8833_v16  ;;  %8279 = vmatprep.subr.bf16.mxu1 %v9642_v1 }
 0x5a0   :  { %8293 = vmatprep.mubr.msk.bf16.mxu1 %vm9643_vm0, %v9642_v1 }
 0x5a1   :  { %7983 = vmatpush3.bf16.msra.mxu0 %v8834_v17 }
 0x5a2   :  { %8280 = vmatpush3.bf16.msra.mxu1 %v8835_v18  ;;  %7984 = vmatprep.subr.bf16.mxu0 %v8836_v22  ;;  %v2713_v18 = vrot.slane %v7415_v52, %v9814_v19 }
 0x5a3   :  { %8281 = vmatprep.subr.bf16.mxu1 %v9642_v1 }
 0x5a5   :  { %7985 = vmatpush3.bf16.msra.mxu0 %v8837_v23 }
 0x5a6   :  { %8282 = vmatpush3.bf16.msra.mxu1 %v8838_v24  ;;  %7986 = vmatprep.subr.bf16.mxu0 %v8839_v25 }
 0x5a7   :  { %8283 = vmatprep.subr.bf16.mxu1 %v9642_v1 }
 0x5a9   :  { %7987 = vmatpush3.bf16.msra.mxu0 %v8840_v26 }
 0x5aa   :  { %8284 = vmatpush3.bf16.msra.mxu1 %v8841_v28  ;;  %7988 = vmatprep.subr.bf16.mxu0 %v8842_v29 }
 0x5ab   :  { %8285 = vmatprep.subr.bf16.mxu1 %v9642_v1 }
 0x5ad   :  { %7989 = vmatpush3.bf16.msra.mxu0 %v8843_v31 }
 0x5ae   :  { %8286 = vmatpush3.bf16.msra.mxu1 %v8844_v32  ;;  %7990 = vmatprep.subr.bf16.mxu0 %v8845_v33 }
 0x5af   :  { %8287 = vmatprep.subr.bf16.mxu1 %v9642_v1 }
 0x5b1   :  { %7991 = vmatpush3.bf16.msra.mxu0 %v8846_v35 }
 0x5b2   :  { %8288 = vmatpush3.bf16.msra.mxu1 %v8847_v36  ;;  %7992 = vmatprep.subr.bf16.mxu0 %v8848_v37 }
 0x5b3   :  { %8289 = vmatprep.subr.bf16.mxu1 %v9642_v1 }
 0x5b5   :  { %7993 = vmatpush3.bf16.msra.mxu0 %v8849_v38 }
 0x5b6   :  { %8290 = vmatpush3.bf16.msra.mxu1 %v8850_v39  ;;  %7994 = vmatprep.subr.bf16.mxu0 %v8851_v40 }
 0x5b7   :  { %8291 = vmatprep.subr.bf16.mxu1 %v9642_v1 }
 0x5b9   :  { %7995 = vmatpush3.bf16.msra.mxu0 %v8852_v41 }
 0x5ba   :  { %8292 = vmatpush3.bf16.msra.mxu1 %v8853_v42  ;;  %3833 = vmatprep.subr.bf16.mxu0 %v8856_v44  ;;  %v8886_v42 = vld [vmem:[#allocation10 + $0x454] ss:$12 sps:$4 sm:$0xff]   ;;  %v8887_v44 = vld [vmem:[#allocation10 + $0x390] ss:$12 sps:$4 sm:$0xff]  }
 0x5bb   :  { %3874 = vmatprep.subr.bf16.mxu1 %v8880_v51  ;;  %v8898_v51 = vld [vmem:[#allocation10 + $0x424] ss:$12 sps:$4 sm:$0xff]  }
 0x5bc   :  { %3216 = vmatmul.mubr.bf16.vlgmr.msra.gmra.mxu0 %v2599_v14 }
 0x5bd   :  { %8294 = vmatmul.mubr.bf16.vlgmr.msra.gmra.mxu1 %v2601_v13  ;;  %3834 = vmatpush1.bf16.msra.mxu0 %v8854_v43  ;;  %v8884_v43 = vld [vmem:[#allocation10 + $0x450] ss:$12 sps:$4 sm:$0xff]  }
 0x5be   :  { %3906 = vmatprep.mubr.bf16.mxu1 %v9644_v2  ;;  %3835 = vmatprep.subr.bf16.mxu0 %v8859_v46  ;;  %v8892_v46 = vld [vmem:[#allocation10 + $0x43c] ss:$12 sps:$4 sm:$0xff]  }
 0x5bf   :  { %3875 = vmatpush1.bf16.msra.mxu1 %v8878_v50  ;;  %v8893_v50 = vld [vmem:[#allocation10 + $0x378] ss:$12 sps:$4 sm:$0xff]  }
 0x5c0   :  { %3876 = vmatprep.subr.bf16.mxu1 %v8886_v42 }
 0x5c1   :  { %3836 = vmatpush1.bf16.msra.mxu0 %v8857_v47  ;;  %v8890_v47 = vld [vmem:[#allocation10 + $0x438] ss:$12 sps:$4 sm:$0xff]  }
 0x5c2   :  { %3837 = vmatprep.subr.bf16.mxu0 %v8862_v48  ;;  %v8895_v48 = vld [vmem:[#allocation10 + $0x37c] ss:$12 sps:$4 sm:$0xff]  }
 0x5c3   :  { %3877 = vmatpush1.bf16.msra.mxu1 %v8884_v43 }
 0x5c4   :  { %3878 = vmatprep.subr.bf16.mxu1 %v8892_v46  ;;  %v8930_v46 = vld [vmem:[#allocation10 + $0x2d8] ss:$12 sps:$4 sm:$0xff]  }
 0x5c5   :  { %3838 = vmatpush1.bf16.msra.mxu0 %v8860_v53  ;;  %v8896_v53 = vld [vmem:[#allocation10 + $0x420] ss:$12 sps:$4 sm:$0xff]  }
 0x5c6   :  { %3839 = vmatprep.subr.bf16.mxu0 %v8865_v54  ;;  %v8899_v54 = vld [vmem:[#allocation10 + $0x360] ss:$12 sps:$4 sm:$0xff]  }
 0x5c7   :  { %3879 = vmatpush1.bf16.msra.mxu1 %v8890_v47  ;;  %v8931_v47 = vld [vmem:[#allocation10 + $0x458] ss:$12 sps:$4 sm:$0xff]  }
 0x5c8   :  { %3880 = vmatprep.subr.bf16.mxu1 %v8898_v51  ;;  %v8934_v51 = vld [vmem:[#allocation10 + $0x440] ss:$12 sps:$4 sm:$0xff]  }
 0x5c9   :  { %3840 = vmatpush1.bf16.msra.mxu0 %v8863_v55  ;;  %v8901_v55 = vld [vmem:[#allocation10 + $0x364] ss:$12 sps:$4 sm:$0xff]  }
 0x5ca   :  { %3841 = vmatprep.subr.bf16.mxu0 %v8868_v34  ;;  %v8904_v34 = vld [vmem:[#allocation10 + $0x40c] ss:$12 sps:$4 sm:$0xff]  }
 0x5cb   :  { %3881 = vmatpush1.bf16.msra.mxu1 %v8896_v53  ;;  %v8935_v53 = vld [vmem:[#allocation10 + $0x368] ss:$12 sps:$4 sm:$0xff]  }
 0x5cc   :  { %3882 = vmatprep.subr.bf16.mxu1 %v8904_v34  ;;  %v8938_v34 = vld [vmem:[#allocation10 + $0x350] ss:$12 sps:$4 sm:$0xff]  }
 0x5cd   :  { %3842 = vmatpush1.bf16.msra.mxu0 %v8866_v56  ;;  %v8902_v56 = vld [vmem:[#allocation10 + $0x408] ss:$12 sps:$4 sm:$0xff]  }
 0x5ce   :  { %3843 = vmatprep.subr.bf16.mxu0 %v8871_v30  ;;  %v8907_v30 = vld [vmem:[#allocation10 + $0x34c] ss:$12 sps:$4 sm:$0xff]  }
 0x5cf   :  { %3883 = vmatpush1.bf16.msra.mxu1 %v8902_v56  ;;  %v8939_v56 = vld [vmem:[#allocation10 + $0x290] ss:$12 sps:$4 sm:$0xff]  }
 0x5d1   :  { %3844 = vmatpush1.bf16.msra.mxu0 %v8869_v57  ;;  %v8905_v57 = vld [vmem:[#allocation10 + $0x348] ss:$12 sps:$4 sm:$0xff]  }
 0x5d2   :  { %3845 = vmatprep.subr.bf16.mxu0 %v8874_v58  ;;  %v8910_v58 = vld [vmem:[#allocation10 + $0x3f4] ss:$12 sps:$4 sm:$0xff]  }
 0x5d3   :  { %3884 = vmatprep.subr.bf16.mxu1 %v8910_v58  ;;  %v8942_v58 = vld [vmem:[#allocation10 + $0x278] ss:$12 sps:$4 sm:$0xff]  }
 0x5d5   :  { %3846 = vmatpush1.bf16.msra.mxu0 %v8872_v27  ;;  %v8913_v27 = vld [vmem:[#allocation10 + $0x334] ss:$12 sps:$4 sm:$0xff]  }
 0x5d6   :  { %3847 = vmatprep.subr.bf16.mxu0 %v8877_v59  ;;  %v8908_v59 = vld [vmem:[#allocation10 + $0x3f0] ss:$12 sps:$4 sm:$0xff]  }
 0x5d7   :  { %3885 = vmatpush1.bf16.msra.mxu1 %v8908_v59  ;;  %v8944_v59 = vld [vmem:[#allocation10 + $0x320] ss:$12 sps:$4 sm:$0xff]  }
 0x5d9   :  { %3848 = vmatpush1.bf16.msra.mxu0 %v8875_v60  ;;  %v8911_v60 = vld [vmem:[#allocation10 + $0x330] ss:$12 sps:$4 sm:$0xff]  }
 0x5da   :  { %3849 = vmatprep.subr.bf16.mxu0 %v8883_v61  ;;  %v8916_v61 = vld [vmem:[#allocation10 + $0x3dc] ss:$12 sps:$4 sm:$0xff]  }
 0x5db   :  { %3886 = vmatprep.subr.bf16.mxu1 %v8916_v61  ;;  %v8946_v61 = vld [vmem:[#allocation10 + $0x3e0] ss:$12 sps:$4 sm:$0xff]  }
 0x5dd   :  { %3850 = vmatpush2.bf16.msra.mxu0 %v8881_v62  ;;  %v8919_v62 = vld [vmem:[#allocation10 + $0x31c] ss:$12 sps:$4 sm:$0xff]  }
 0x65c   :  { %v3176_v0 = vpop.f32.mrf.mxu0 }
 0x65d   :  { %v3135_v3 = vpop.f32.mrf.mxu1 }
 0x65e   :  { %v3178_v5 = vpop.f32.mrf.mxu0  ;;  %v3136_v13 = vadd.f32 %v3135_v3, %v2705_v45  ;;  %v8917_v3 = vld [vmem:[#allocation10 + $0x318] ss:$12 sps:$4 sm:$0xff]  }
 0x65f   :  { %v3137_v7 = vpop.f32.mrf.mxu1 }
 0x660   :  { %v3180_v8 = vpop.f32.mrf.mxu0  ;;  %v3138_v12 = vadd.f32 %v3137_v7, %v2709_v11  ;;  %v3177_v16 = vadd.f32 %v3176_v0, %v3136_v13  ;;  %v8914_v0 = vld [vmem:[#allocation10 + $0x3d8] ss:$12 sps:$4 sm:$0xff]  }
 0x661   :  { %v3139_v9 = vpop.f32.mrf.mxu1  ;;  %v8925_v7 = vld [vmem:[#allocation10 + $0x304] ss:$12 sps:$4 sm:$0xff]   ;;  %3887 = vmatpush1.bf16.msra.mxu1 %v8914_v0  ;;  %v8920_v8 = vld [vmem:[#allocation10 + $0x3c0] ss:$12 sps:$4 sm:$0xff]   ;;  %v8948_v0 = vld [vmem:[#allocation10 + $0x248] ss:$12 sps:$4 sm:$0xff]  }
 0x662   :  { %v3181_v49 = vpop.f32.mrf.mxu0  ;;  %v3179_v14 = vadd.f32 %v3178_v5, %v3138_v12  ;;  %v9993_v28 = vadd.f32 %v3177_v16, %v9965_v6  ;;  %v8922_v5 = vld [vmem:[#allocation10 + $0x3c4] ss:$12 sps:$4 sm:$0xff]   ;;  %v8923_v9 = vld [vmem:[#allocation10 + $0x300] ss:$12 sps:$4 sm:$0xff]   ;;  %v3269_v16 = vld [vmem:[#allocation16 + $0x3] sm:$0x7] }
 0x663   :  { %v3140_v10 = vpop.f32.mrf.mxu1  ;;  %3888 = vmatprep.subr.bf16.mxu1 %v8922_v5  ;;  %v8926_v49 = vld [vmem:[#allocation10 + $0x3b0] ss:$12 sps:$4 sm:$0xff]   ;;  %v8952_v5 = vld [vmem:[#allocation13 + $0x2ec] ss:$12 sps:$4 sm:$0xff]  }
 0x664   :  { %v9990_v23 = vadd.f32 %v3179_v14, %v9961_v4  ;;  %v3275_v38 = vmul.f32 %v9993_v28, %v9993_v28 }
 0x665   :  { %3889 = vmatpush1.bf16.msra.mxu1 %v8920_v8  ;;  %v8955_v8 = vld [vmem:[#allocation13 + $0x2d4] ss:$12 sps:$4 sm:$0xff]  }
 0x666   :  { %v3276_v36 = vmul.f32 %v9990_v23, %v9990_v23  ;;  %v3270_v4 = vadd.f32 %v9990_v23, %v9993_v28  ;;  %8011 = vmatprep.subr.bf16.mxu1 %v8926_v49  ;;  %v8958_v49 = vld [vmem:[#allocation13 + $0x2bc] ss:$12 sps:$4 sm:$0xff]  }
 0x668   :  { %v3278_v40 = vadd.f32 %v3276_v36, %v3275_v38 }
 0x67c   :  { %v7996_v15 = vpop.f32.mrf.mxu0 }
 0x67d   :  { %v3257_v17 = vpop.f32.mrf.mxu1 }
 0x67e   :  { %v7997_v22 = vpop.f32.mrf.mxu0 }
 0x67f   :  { %v7998_v24 = vadd.f32 %v7997_v22, %v7996_v15  ;;  %v8295_v25 = vpop.f32.mrf.mxu1  ;;  %v7488_v15 = vld [vmem:[%s10255_s9 + $0x3] sm:$0x7] }
 0x680   :  { %v7999_v26 = vpop.f32.mrf.mxu0 }
 0x681   :  { %v3218_v29 = vadd.f32 %v7998_v24, %v2713_v18  ;;  %v3260_v31 = vpop.f32.mrf.mxu1  ;;  %v3305_v18 = vrot.slane %v7488_v15, %v9814_v19  ;;  %v3297_v26 = vrot.slane %v7488_v15, %v9816_v20 }
 0x682   :  { %v8000_v32 = vpop.f32.mrf.mxu0  ;;  %v3320_v31 = vrot.slane %v3269_v16, %v9818_v21 }
 0x683   :  { %v3258_v33 = vadd.f32 %v3257_v17, %v3218_v29  ;;  %v8296_v35 = vpop.f32.mrf.mxu1  ;;  %v3301_v17 = vrot.slane %v7488_v15, %v9818_v21  ;;  %v3324_v32 = vrot.slane %v3269_v16, %v9814_v19  ;;  %v8970_v15 = vld [vmem:[#allocation13 + $0x25c] ss:$12 sps:$4 sm:$0xff]  }
 0x685   :  { %v9998_v37 = vadd.f32 %v3258_v33, %v9963_v63  ;;  %v8889_v63 = vld [vmem:[#allocation10 + $0x394] ss:$12 sps:$4 sm:$0xff]  }
 0x686   :  { %3851 = vmatprep.subr.bf16.mxu0 %v8889_v63  ;;  %v8928_v63 = vld [vmem:[#allocation10 + $0x470] ss:$12 sps:$4 sm:$0xff]  }
 0x687   :  { %v3271_v6 = vadd.f32 %v3270_v4, %v9998_v37  ;;  %v3277_v39 = vmul.f32 %v9998_v37, %v9998_v37  ;;  %3852 = vmatpush2.bf16.msra.mxu0 %v8887_v44  ;;  %v3316_v4 = vrot.slane %v3269_v16, %v9816_v20  ;;  %v8929_v44 = vld [vmem:[#allocation10 + $0x398] ss:$12 sps:$4 sm:$0xff]  }
 0x688   :  { %3853 = vmatprep.subr.bf16.mxu0 %v8895_v48  ;;  %v8932_v48 = vld [vmem:[#allocation10 + $0x380] ss:$12 sps:$4 sm:$0xff]  }
 0x689   :  { %3272 = vadd.xlane.f32.xlu0 %v3271_v6  ;;  %v3279_v41 = vadd.f32 %v3278_v40, %v3277_v39  ;;  %v8927_v40 = vld [vmem:[#allocation10 + $0x2f0] ss:$12 sps:$4 sm:$0xff]  }
 0x68a   :  { %v8968_v16 = vld [vmem:[#allocation13 + $0x258] ss:$12 sps:$4 sm:$0xff]  }
 0x68b   :  { %3280 = vadd.xlane.f32.xlu1 %v3279_v41  ;;  %3854 = vmatpush2.bf16.msra.mxu0 %v8893_v50  ;;  %v8933_v50 = vld [vmem:[#allocation10 + $0x2c0] ss:$12 sps:$4 sm:$0xff]  }
 0x68c   :  { %3855 = vmatprep.subr.bf16.mxu0 %v8901_v55  ;;  %v8937_v55 = vld [vmem:[#allocation10 + $0x428] ss:$12 sps:$4 sm:$0xff]  }
 0x68f   :  { %3856 = vmatpush2.bf16.msra.mxu0 %v8899_v54  ;;  %v8936_v54 = vld [vmem:[#allocation10 + $0x2a8] ss:$12 sps:$4 sm:$0xff]  }
 0x690   :  { %3857 = vmatprep.subr.bf16.mxu0 %v8907_v30  ;;  %v8940_v30 = vld [vmem:[#allocation10 + $0x410] ss:$12 sps:$4 sm:$0xff]  }
 0x693   :  { %3858 = vmatpush2.bf16.msra.mxu0 %v8905_v57  ;;  %v8941_v57 = vld [vmem:[#allocation10 + $0x338] ss:$12 sps:$4 sm:$0xff]  }
 0x694   :  { %3859 = vmatprep.subr.bf16.mxu0 %v8913_v27  ;;  %v8943_v27 = vld [vmem:[#allocation10 + $0x3f8] ss:$12 sps:$4 sm:$0xff]  }
 0x697   :  { %3860 = vmatpush2.bf16.msra.mxu0 %v8911_v60  ;;  %v8945_v60 = vld [vmem:[#allocation10 + $0x260] ss:$12 sps:$4 sm:$0xff]  }
 0x698   :  { %3861 = vmatprep.subr.bf16.mxu0 %v8919_v62  ;;  %v8947_v62 = vld [vmem:[#allocation10 + $0x308] ss:$12 sps:$4 sm:$0xff]  }
 0x69b   :  { %3862 = vmatpush2.bf16.msra.mxu0 %v8917_v3  ;;  %v8949_v3 = vld [vmem:[#allocation10 + $0x3c8] ss:$12 sps:$4 sm:$0xff]  }
 0x69c   :  { %3863 = vmatprep.subr.bf16.mxu0 %v8925_v7  ;;  %v8950_v7 = vld [vmem:[#allocation13 + $0x2e8] ss:$12 sps:$4 sm:$0xff]  }
 0x69f   :  { %3864 = vmatpush2.bf16.msra.mxu0 %v8923_v9  ;;  %v8953_v9 = vld [vmem:[#allocation13 + $0x2d0] ss:$12 sps:$4 sm:$0xff]  }
 0x6a0   :  { %8297 = vmatprep.subr.bf16.mxu0 %v9642_v1 }
 0x712   :  { %v3273_v10 = vpop.xlane.xlu0 %3272 }
 0x713   :  { %v3274_v52 = vmul.f32 0.0033333334, %v3273_v10  ;;  %v8956_v10 = vld [vmem:[#allocation13 + $0x2b8] ss:$12 sps:$4 sm:$0xff]  }
 0x714   :  { %v3281_v11 = vpop.xlane.xlu1 %3280 }
 0x715   :  { %v3282_v45 = vmul.f32 0.0033333334, %v3281_v11  ;;  %v3283_v12 = vmul.f32 %v3274_v52, %v3274_v52  ;;  %v3285_v22 = vsub.f32 %v9993_v28, %v3274_v52  ;;  %v3286_v24 = vsub.f32 %v9990_v23, %v3274_v52  ;;  %v8959_v11 = vld [vmem:[#allocation13 + $0x2a0] ss:$12 sps:$4 sm:$0xff]  }
 0x716   :  { %v3287_v25 = vsub.f32 %v9998_v37, %v3274_v52  ;;  %v8961_v52 = vld [vmem:[#allocation13 + $0x2a4] ss:$12 sps:$4 sm:$0xff]  }
 0x717   :  { %v3284_v13 = vsub.f32 %v3282_v45, %v3283_v12  ;;  %v8964_v45 = vld [vmem:[#allocation13 + $0x28c] ss:$12 sps:$4 sm:$0xff]   ;;  %v8962_v12 = vld [vmem:[#allocation13 + $0x288] ss:$12 sps:$4 sm:$0xff]  }
 0x719   :  { %v3288_v14 = vadd.f32 1e-05, %v3284_v13  ;;  %v8967_v13 = vld [vmem:[#allocation13 + $0x274] ss:$12 sps:$4 sm:$0xff]  }
 0x71b   :  { %9362 = vrsqrt.f32 %v3288_v14  ;;  %v8965_v14 = vld [vmem:[#allocation13 + $0x270] ss:$12 sps:$4 sm:$0xff]  }
 0x728   :  { %v9363_v29 = vpop.eup %9362 }
 0x729   :  { %v3291_v33 = vmul.f32 %v9363_v29, %v3286_v24  ;;  %v3292_v35 = vmul.f32 %v9363_v29, %v3287_v25  ;;  %v3290_v36 = vmul.f32 %v9363_v29, %v3285_v22  ;;  %v8976_v22 = vld [vmem:[#allocation13 + $0x3ac] ss:$12 sps:$4 sm:$0xff]   ;;  %v8974_v24 = vld [vmem:[#allocation13 + $0x3a8] ss:$12 sps:$4 sm:$0xff]  }
 0x72a   :  { %v8979_v25 = vld [vmem:[#allocation13 + $0x394] ss:$12 sps:$4 sm:$0xff]   ;;  %v8982_v29 = vld [vmem:[#allocation13 + $0x37c] ss:$12 sps:$4 sm:$0xff]  }
 0x72b   :  { %v3310_v38 = vmul.f32 %v3301_v17, %v3291_v33  ;;  %v3311_v6 = vmul.f32 %v3305_v18, %v3292_v35  ;;  %v3309_v39 = vmul.f32 %v3297_v26, %v3290_v36  ;;  %v8973_v17 = vld [vmem:[#allocation13 + $0x244] ss:$12 sps:$4 sm:$0xff]   ;;  %v8971_v18 = vld [vmem:[#allocation13 + $0x240] ss:$12 sps:$4 sm:$0xff]   ;;  %v8998_v36 = vld [vmem:[#allocation13 + $0x468] ss:$12 sps:$4 sm:$0xff]  }
 0x72c   :  { %v8977_v26 = vld [vmem:[#allocation13 + $0x390] ss:$12 sps:$4 sm:$0xff]   ;;  %v8983_v33 = vld [vmem:[#allocation13 + $0x360] ss:$12 sps:$4 sm:$0xff]  }
 0x72d   :  { %v10020_v28 = vadd.f32 %v3320_v31, %v3310_v38  ;;  %v10022_v23 = vadd.f32 %v3324_v32, %v3311_v6  ;;  %v10024_v37 = vadd.f32 %v3316_v4, %v3309_v39  ;;  %v8980_v31 = vld [vmem:[#allocation13 + $0x378] ss:$12 sps:$4 sm:$0xff]   ;;  %v8986_v38 = vld [vmem:[#allocation13 + $0x348] ss:$12 sps:$4 sm:$0xff]   ;;  %v9002_v39 = vld [vmem:[#allocation13 + $0x450] ss:$12 sps:$4 sm:$0xff]  }
 0x72e   :  { %v8985_v32 = vld [vmem:[#allocation13 + $0x364] ss:$12 sps:$4 sm:$0xff]   ;;  %v8988_v35 = vld [vmem:[#allocation13 + $0x34c] ss:$12 sps:$4 sm:$0xff]   ;;  %v8991_v6 = vld [vmem:[#allocation13 + $0x334] ss:$12 sps:$4 sm:$0xff]  }
 0x72f   :  { %v3332_v41 = vpack.c.bf16 %v10020_v28, %v10020_v28  ;;  %v10030_v42 = vpack.c.bf16 %v10022_v23, %v10022_v23  ;;  %v3331_v43 = vpack.c.bf16 %v10024_v37, %v10024_v37  ;;  %v9000_v4 = vld [vmem:[#allocation13 + $0x46c] ss:$12 sps:$4 sm:$0xff]  }
 0x731   :  { %3865 = vmatprep.mubr.bf16.mxu0 %v3332_v41  ;;  %3907 = vmatmul.mubr.bf16.vlgmr.msra.gmra.mxu1 %v10030_v42 }
 0x732   :  { %8012 = vmatpush3.bf16.msra.mxu1 %v8927_v40  ;;  %3866 = vmatmul.mubr.bf16.vlgmr.msra.gmra.mxu0 %v3331_v43  ;;  %v9004_v40 = vld [vmem:[#allocation13 + $0x454] ss:$12 sps:$4 sm:$0xff]  }
 0x733   :  { %3947 = vmatprep.mubr.bf16.mxu1 %v3332_v41  ;;  %8298 = vmatpush3.bf16.msra.mxu0 %v8928_v63  ;;  %v8989_v41 = vld [vmem:[#allocation13 + $0x330] ss:$12 sps:$4 sm:$0xff]  }
 0x734   :  { %8013 = vmatprep.subr.bf16.mxu1 %v8929_v44  ;;  %8299 = vmatprep.subr.bf16.mxu0 %v9642_v1  ;;  %v9008_v63 = vld [vmem:[#allocation13 + $0x43c] ss:$12 sps:$4 sm:$0xff]   ;;  %v8992_v44 = vld [vmem:[#allocation13 + $0x318] ss:$12 sps:$4 sm:$0xff]  }
 0x735   :  { %8313 = vmatprep.mubr.msk.bf16.mxu0 %vm9643_vm0, %v9642_v1 }
 0x736   :  { %8014 = vmatpush3.bf16.msra.mxu1 %v8930_v46  ;;  %v8997_v46 = vld [vmem:[#allocation13 + $0x304] ss:$12 sps:$4 sm:$0xff]  }
 0x737   :  { %8300 = vmatpush3.bf16.msra.mxu0 %v8931_v47  ;;  %8015 = vmatprep.subr.bf16.mxu1 %v8932_v48  ;;  %v9010_v47 = vld [vmem:[#allocation13 + $0x420] ss:$12 sps:$4 sm:$0xff]   ;;  %v9012_v48 = vld [vmem:[#allocation13 + $0x424] ss:$12 sps:$4 sm:$0xff]  }
 0x738   :  { %8301 = vmatprep.subr.bf16.mxu0 %v9642_v1 }
 0x73a   :  { %8016 = vmatpush3.bf16.msra.mxu1 %v8933_v50  ;;  %v8995_v50 = vld [vmem:[#allocation13 + $0x300] ss:$12 sps:$4 sm:$0xff]  }
 0x73b   :  { %8302 = vmatpush3.bf16.msra.mxu0 %v8934_v51  ;;  %8017 = vmatprep.subr.bf16.mxu1 %v8935_v53  ;;  %v9014_v51 = vld [vmem:[#allocation13 + $0x408] ss:$12 sps:$4 sm:$0xff]   ;;  %v9016_v53 = vld [vmem:[#allocation13 + $0x40c] ss:$12 sps:$4 sm:$0xff]  }
 0x73c   :  { %8303 = vmatprep.subr.bf16.mxu0 %v9642_v1 }
 0x73e   :  { %8018 = vmatpush3.bf16.msra.mxu1 %v8936_v54  ;;  %v9020_v54 = vld [vmem:[#allocation13 + $0x3f4] ss:$12 sps:$4 sm:$0xff]  }
 0x73f   :  { %8304 = vmatpush3.bf16.msra.mxu0 %v8937_v55  ;;  %8019 = vmatprep.subr.bf16.mxu1 %v8938_v34  ;;  %v9018_v55 = vld [vmem:[#allocation13 + $0x3f0] ss:$12 sps:$4 sm:$0xff]  }
 0x740   :  { %8305 = vmatprep.subr.bf16.mxu0 %v9642_v1  ;;  %v9024_v34 = vld [vmem:[#allocation13 + $0x3dc] ss:$12 sps:$4 sm:$0xff]  }
 0x742   :  { %8020 = vmatpush3.bf16.msra.mxu1 %v8939_v56  ;;  %v9022_v56 = vld [vmem:[#allocation13 + $0x3d8] ss:$12 sps:$4 sm:$0xff]  }
 0x743   :  { %8306 = vmatpush3.bf16.msra.mxu0 %v8940_v30  ;;  %8021 = vmatprep.subr.bf16.mxu1 %v8941_v57  ;;  %v9028_v30 = vld [vmem:[#allocation13 + $0x3c4] ss:$12 sps:$4 sm:$0xff]   ;;  %v9026_v57 = vld [vmem:[#allocation13 + $0x3c0] ss:$12 sps:$4 sm:$0xff]  }
 0x744   :  { %8307 = vmatprep.subr.bf16.mxu0 %v9642_v1 }
 0x746   :  { %8022 = vmatpush3.bf16.msra.mxu1 %v8942_v58  ;;  %v9030_v58 = vld [vmem:[#allocation13 + $0x3b0] ss:$12 sps:$4 sm:$0xff]  }
 0x747   :  { %8308 = vmatpush3.bf16.msra.mxu0 %v8943_v27  ;;  %8023 = vmatprep.subr.bf16.mxu1 %v8944_v59  ;;  %v3432_v27 = vld [vmem:[#allocation11 + $0x3] sm:$0x7] }
 0x748   :  { %8309 = vmatprep.subr.bf16.mxu0 %v9642_v1  ;;  %v3437_v59 = vrot.slane %v3432_v27, %v9816_v20 }
 0x74a   :  { %8024 = vmatpush3.bf16.msra.mxu1 %v8945_v60 }
 0x74b   :  { %8310 = vmatpush3.bf16.msra.mxu0 %v8946_v61  ;;  %8025 = vmatprep.subr.bf16.mxu1 %v8947_v62  ;;  %v3441_v61 = vrot.slane %v3432_v27, %v9818_v21 }
 0x74c   :  { %8311 = vmatprep.subr.bf16.mxu0 %v9642_v1 }
 0x74e   :  { %8026 = vmatpush3.bf16.msra.mxu1 %v8948_v0 }
 0x74f   :  { %8312 = vmatpush3.bf16.msra.mxu0 %v8949_v3  ;;  %4500 = vmatprep.subr.bf16.mxu1 %v8952_v5 }
 0x750   :  { %4541 = vmatprep.subr.bf16.mxu0 %v9000_v4 }
 0x751   :  { %3948 = vmatmul.mubr.bf16.vlgmr.msra.gmra.mxu1 %v3331_v43  ;;  %v9006_v43 = vld [vmem:[#allocation13 + $0x438] ss:$12 sps:$4 sm:$0xff]  }
 0x752   :  { %8314 = vmatmul.mubr.bf16.vlgmr.msra.gmra.mxu0 %v10030_v42  ;;  %4501 = vmatpush1.bf16.msra.mxu1 %v8950_v7  ;;  %v8994_v42 = vld [vmem:[#allocation13 + $0x31c] ss:$12 sps:$4 sm:$0xff]  }
 0x753   :  { %4502 = vmatprep.subr.bf16.mxu1 %v8955_v8  ;;  %4573 = vmatprep.mubr.bf16.mxu0 %v9644_v2 }
 0x754   :  { %4542 = vmatpush1.bf16.msra.mxu0 %v8998_v36 }
 0x755   :  { %4543 = vmatprep.subr.bf16.mxu0 %v9004_v40 }
 0x756   :  { %4503 = vmatpush1.bf16.msra.mxu1 %v8953_v9 }
 0x757   :  { %4504 = vmatprep.subr.bf16.mxu1 %v8958_v49 }
 0x758   :  { %4544 = vmatpush1.bf16.msra.mxu0 %v9002_v39  ;;  %v9029_v39 = vld [vmem:[#allocation13 + $0x3c8] ss:$12 sps:$4 sm:$0xff]  }
 0x759   :  { %4545 = vmatprep.subr.bf16.mxu0 %v9008_v63 }
 0x75a   :  { %4505 = vmatpush1.bf16.msra.mxu1 %v8956_v10 }
 0x75b   :  { %4506 = vmatprep.subr.bf16.mxu1 %v8961_v52 }
 0x75c   :  { %4546 = vmatpush1.bf16.msra.mxu0 %v9006_v43  ;;  %v9031_v43 = vld [vmem:[#allocation13 + $0x2f0] ss:$12 sps:$4 sm:$0xff]  }
 0x75d   :  { %4547 = vmatprep.subr.bf16.mxu0 %v9012_v48  ;;  %v9035_v48 = vld [vmem:[#allocation13 + $0x2c0] ss:$12 sps:$4 sm:$0xff]  }
 0x75e   :  { %4507 = vmatpush1.bf16.msra.mxu1 %v8959_v11 }
 0x75f   :  { %4508 = vmatprep.subr.bf16.mxu1 %v8964_v45 }
 0x760   :  { %4548 = vmatpush1.bf16.msra.mxu0 %v9010_v47  ;;  %v9034_v47 = vld [vmem:[#allocation13 + $0x380] ss:$12 sps:$4 sm:$0xff]  }
 0x761   :  { %4549 = vmatprep.subr.bf16.mxu0 %v9016_v53  ;;  %v9038_v53 = vld [vmem:[#allocation13 + $0x350] ss:$12 sps:$4 sm:$0xff]  }
 0x762   :  { %4509 = vmatpush1.bf16.msra.mxu1 %v8962_v12 }
 0x763   :  { %4510 = vmatprep.subr.bf16.mxu1 %v8967_v13 }
 0x764   :  { %4550 = vmatpush1.bf16.msra.mxu0 %v9014_v51  ;;  %v9037_v51 = vld [vmem:[#allocation13 + $0x2a8] ss:$12 sps:$4 sm:$0xff]  }
 0x765   :  { %4551 = vmatprep.subr.bf16.mxu0 %v9020_v54  ;;  %v9039_v54 = vld [vmem:[#allocation13 + $0x290] ss:$12 sps:$4 sm:$0xff]  }
 0x766   :  { %4511 = vmatpush1.bf16.msra.mxu1 %v8965_v14  ;;  %v9001_v14 = vld [vmem:[#allocation13 + $0x470] ss:$12 sps:$4 sm:$0xff]  }
 0x767   :  { %4512 = vmatprep.subr.bf16.mxu1 %v8970_v15 }
 0x768   :  { %4552 = vmatpush1.bf16.msra.mxu0 %v9018_v55  ;;  %v9040_v55 = vld [vmem:[#allocation13 + $0x338] ss:$12 sps:$4 sm:$0xff]  }
 0x769   :  { %4553 = vmatprep.subr.bf16.mxu0 %v9024_v34  ;;  %v9041_v34 = vld [vmem:[#allocation13 + $0x278] ss:$12 sps:$4 sm:$0xff]  }
 0x76a   :  { %4513 = vmatpush1.bf16.msra.mxu1 %v8968_v16  ;;  %v9005_v16 = vld [vmem:[#allocation13 + $0x458] ss:$12 sps:$4 sm:$0xff]  }
 0x76b   :  { %4514 = vmatprep.subr.bf16.mxu1 %v8973_v17  ;;  %v9009_v17 = vld [vmem:[#allocation13 + $0x440] ss:$12 sps:$4 sm:$0xff]  }
 0x76c   :  { %4554 = vmatpush1.bf16.msra.mxu0 %v9022_v56  ;;  %v9042_v56 = vld [vmem:[#allocation13 + $0x320] ss:$12 sps:$4 sm:$0xff]  }
 0x76d   :  { %4555 = vmatprep.subr.bf16.mxu0 %v9028_v30  ;;  %v9043_v30 = vld [vmem:[#allocation13 + $0x260] ss:$12 sps:$4 sm:$0xff]  }
 0x76e   :  { %4515 = vmatpush1.bf16.msra.mxu1 %v8971_v18  ;;  %v9013_v18 = vld [vmem:[#allocation13 + $0x428] ss:$12 sps:$4 sm:$0xff]  }
 0x76f   :  { %4516 = vmatprep.subr.bf16.mxu1 %v8976_v22  ;;  %v9017_v22 = vld [vmem:[#allocation13 + $0x410] ss:$12 sps:$4 sm:$0xff]  }
 0x770   :  { %4556 = vmatpush1.bf16.msra.mxu0 %v9026_v57  ;;  %v9044_v57 = vld [vmem:[#allocation13 + $0x308] ss:$12 sps:$4 sm:$0xff]  }
 0x771   :  { %8042 = vmatprep.subr.bf16.mxu0 %v9030_v58  ;;  %v9045_v58 = vld [vmem:[#allocation13 + $0x248] ss:$12 sps:$4 sm:$0xff]  }
 0x772   :  { %4517 = vmatpush2.bf16.msra.mxu1 %v8974_v24  ;;  %v9021_v24 = vld [vmem:[#allocation13 + $0x3f8] ss:$12 sps:$4 sm:$0xff]  }
 0x773   :  { %4518 = vmatprep.subr.bf16.mxu1 %v8979_v25 }
 0x776   :  { %4519 = vmatpush2.bf16.msra.mxu1 %v8977_v26 }
 0x777   :  { %4520 = vmatprep.subr.bf16.mxu1 %v8982_v29  ;;  %v3445_v29 = vrot.slane %v3432_v27, %v9814_v19  ;;  %v9046_v27 = vld [vmem:[#allocation8 + $0x528] ss:$12 sps:$4 sm:$0xff]  }
 0x77a   :  { %4521 = vmatpush2.bf16.msra.mxu1 %v8980_v31 }
 0x77b   :  { %4522 = vmatprep.subr.bf16.mxu1 %v8985_v32  ;;  %v9025_v32 = vld [vmem:[#allocation13 + $0x3e0] ss:$12 sps:$4 sm:$0xff]  }
 0x77e   :  { %4523 = vmatpush2.bf16.msra.mxu1 %v8983_v33 }
 0x77f   :  { %4524 = vmatprep.subr.bf16.mxu1 %v8988_v35 }
 0x782   :  { %4525 = vmatpush2.bf16.msra.mxu1 %v8986_v38 }
 0x783   :  { %4526 = vmatprep.subr.bf16.mxu1 %v8991_v6 }
 0x786   :  { %4527 = vmatpush2.bf16.msra.mxu1 %v8989_v41 }
 0x787   :  { %4528 = vmatprep.subr.bf16.mxu1 %v8994_v42 }
 0x78a   :  { %4529 = vmatpush2.bf16.msra.mxu1 %v8992_v44  ;;  %v9032_v44 = vld [vmem:[#allocation13 + $0x398] ss:$12 sps:$4 sm:$0xff]  }
 0x78b   :  { %4530 = vmatprep.subr.bf16.mxu1 %v8997_v46  ;;  %v9033_v46 = vld [vmem:[#allocation13 + $0x2d8] ss:$12 sps:$4 sm:$0xff]  }
 0x78e   :  { %4531 = vmatpush2.bf16.msra.mxu1 %v8995_v50  ;;  %v9036_v50 = vld [vmem:[#allocation13 + $0x368] ss:$12 sps:$4 sm:$0xff]  }
 0x78f   :  { %8317 = vmatprep.subr.bf16.mxu1 %v9642_v1 }
 0x7f1   :  { %v3908_v60 = vpop.f32.mrf.mxu1 }
 0x7f2   :  { %v3867_v62 = vpop.f32.mrf.mxu0 }
 0x7f3   :  { %v3868_v0 = vadd.f32 %v3867_v62, %v3437_v59  ;;  %v3910_v3 = vpop.f32.mrf.mxu1  ;;  %v9048_v59 = vld [vmem:[#allocation8 + $0x52c] ss:$12 sps:$4 sm:$0xff]   ;;  %v9054_v62 = vld [vmem:[#allocation8 + $0x4fc] ss:$12 sps:$4 sm:$0xff]  }
 0x7f4   :  { %v3869_v5 = vpop.f32.mrf.mxu0 }
 0x7f5   :  { %v3909_v7 = vadd.f32 %v3908_v60, %v3868_v0  ;;  %v3870_v8 = vadd.f32 %v3869_v5, %v3441_v61  ;;  %v3912_v9 = vpop.f32.mrf.mxu1  ;;  %v9051_v60 = vld [vmem:[#allocation8 + $0x514] ss:$12 sps:$4 sm:$0xff]   ;;  %v9049_v61 = vld [vmem:[#allocation8 + $0x510] ss:$12 sps:$4 sm:$0xff]   ;;  %v9052_v5 = vld [vmem:[#allocation8 + $0x4f8] ss:$12 sps:$4 sm:$0xff]  }
 0x7f6   :  { %v3871_v49 = vpop.f32.mrf.mxu0  ;;  %v9070_v0 = vld [vmem:[#allocation8 + $0x6a8] ss:$12 sps:$4 sm:$0xff]   ;;  %v9060_v9 = vld [vmem:[#allocation8 + $0x4cc] ss:$12 sps:$4 sm:$0xff]  }
 0x7f7   :  { %v3911_v10 = vadd.f32 %v3910_v3, %v3870_v8  ;;  %v3913_v52 = vpop.f32.mrf.mxu1  ;;  %v3995_v11 = vmax.f32 %v3909_v7, 0.0  ;;  %v9072_v3 = vld [vmem:[#allocation8 + $0x6ac] ss:$12 sps:$4 sm:$0xff]   ;;  %v9057_v7 = vld [vmem:[#allocation8 + $0x4e4] ss:$12 sps:$4 sm:$0xff]  }
 0x7f8   :  { %v3872_v45 = vpop.f32.mrf.mxu0  ;;  %v9055_v8 = vld [vmem:[#allocation8 + $0x4e0] ss:$12 sps:$4 sm:$0xff]   ;;  %v9058_v49 = vld [vmem:[#allocation8 + $0x4c8] ss:$12 sps:$4 sm:$0xff]   ;;  %v9061_v52 = vld [vmem:[#allocation8 + $0x4b0] ss:$12 sps:$4 sm:$0xff]  }
 0x7f9   :  { %v3996_v12 = vmax.f32 %v3911_v10, 0.0  ;;  %v10049_v15 = vpack.c.bf16 %v3995_v11, %v3995_v11  ;;  %v9063_v10 = vld [vmem:[#allocation8 + $0x4b4] ss:$12 sps:$4 sm:$0xff]   ;;  %v9066_v11 = vld [vmem:[#allocation8 + $0x49c] ss:$12 sps:$4 sm:$0xff]  }
 0x7fa   :  { %v9064_v45 = vld [vmem:[#allocation8 + $0x498] ss:$12 sps:$4 sm:$0xff]  }
 0x7fb   :  { %v3999_v13 = vpack.c.bf16 %v3996_v12, %v3996_v12  ;;  %v9069_v12 = vld [vmem:[#allocation8 + $0x484] ss:$12 sps:$4 sm:$0xff]  }
 0x7fd   :  { %4532 = vmatprep.mubr.bf16.mxu1 %v3999_v13 }
 0x7fe   :  { %4533 = vmatmul.mubr.bf16.vlgmr.msra.gmra.mxu1 %v10049_v15 }
 0x7ff   :  { %8318 = vmatpush3.bf16.msra.mxu1 %v9001_v14  ;;  %8333 = vmatprep.mubr.msk.bf16.mxu1 %vm9643_vm0, %v9642_v1  ;;  %v9075_v14 = vld [vmem:[#allocation8 + $0x5ec] ss:$12 sps:$4 sm:$0xff]  }
 0x800   :  { %8319 = vmatprep.subr.bf16.mxu1 %v9642_v1 }
 0x803   :  { %8320 = vmatpush3.bf16.msra.mxu1 %v9005_v16 }
 0x804   :  { %8321 = vmatprep.subr.bf16.mxu1 %v9642_v1 }
 0x807   :  { %8322 = vmatpush3.bf16.msra.mxu1 %v9009_v17 }
 0x808   :  { %8323 = vmatprep.subr.bf16.mxu1 %v9642_v1 }
 0x80b   :  { %8324 = vmatpush3.bf16.msra.mxu1 %v9013_v18 }
 0x80c   :  { %8325 = vmatprep.subr.bf16.mxu1 %v9642_v1 }
 0x80f   :  { %8326 = vmatpush3.bf16.msra.mxu1 %v9017_v22 }
 0x810   :  { %8327 = vmatprep.subr.bf16.mxu1 %v9642_v1 }
 0x811   :  { %v8027_v25 = vpop.f32.mrf.mxu1 }
 0x812   :  { %v3989_v26 = vpop.f32.mrf.mxu0 }
 0x813   :  { %v8028_v31 = vpop.f32.mrf.mxu1  ;;  %8328 = vmatpush3.bf16.msra.mxu1 %v9021_v24 }
 0x814   :  { %v8029_v33 = vadd.f32 %v8028_v31, %v8027_v25  ;;  %v8315_v35 = vpop.f32.mrf.mxu0  ;;  %8329 = vmatprep.subr.bf16.mxu1 %v9642_v1 }
 0x815   :  { %v8030_v36 = vpop.f32.mrf.mxu1 }
 0x816   :  { %v3950_v4 = vadd.f32 %v8029_v33, %v3445_v29  ;;  %v3992_v38 = vpop.f32.mrf.mxu0  ;;  %v4099_v36 = vld [vmem:[#allocation14 + $0x3] sm:$0x7] }
 0x817   :  { %v8031_v6 = vpop.f32.mrf.mxu1  ;;  %8330 = vmatpush3.bf16.msra.mxu1 %v9025_v32  ;;  %v4104_v38 = vrot.slane %v4099_v36, %v9816_v20 }
 0x818   :  { %v3990_v40 = vadd.f32 %v3989_v26, %v3950_v4  ;;  %v8316_v41 = vpop.f32.mrf.mxu0  ;;  %8331 = vmatprep.subr.bf16.mxu1 %v9642_v1  ;;  %v4108_v4 = vrot.slane %v4099_v36, %v9818_v21 }
 0x81a   :  { %v3997_v42 = vmax.f32 %v3990_v40, 0.0 }
 0x81b   :  { %8332 = vmatpush3.bf16.msra.mxu1 %v9029_v39 }
 0x81c   :  { %v4000_v63 = vpack.c.bf16 %v3997_v42, %v3997_v42  ;;  %5273 = vmatprep.subr.bf16.mxu1 %v9072_v3  ;;  %v9090_v3 = vld [vmem:[#allocation8 + $0x664] ss:$12 sps:$4 sm:$0xff]  }
 0x81e   :  { %4574 = vmatmul.mubr.bf16.vlgmr.msra.gmra.mxu0 %v4000_v63  ;;  %8334 = vmatmul.mubr.bf16.vlgmr.msra.gmra.mxu1 %v4000_v63 }
 0x81f   :  { %8043 = vmatpush3.bf16.msra.mxu0 %v9031_v43  ;;  %4614 = vmatprep.mubr.bf16.mxu0 %v3999_v13  ;;  %v9067_v13 = vld [vmem:[#allocation8 + $0x480] ss:$12 sps:$4 sm:$0xff]   ;;  %v4112_v43 = vrot.slane %v4099_v36, %v9814_v19 }
 0x820   :  { %8044 = vmatprep.subr.bf16.mxu0 %v9032_v44  ;;  %5305 = vmatprep.mubr.bf16.mxu1 %v9644_v2 }
 0x821   :  { %5274 = vmatpush1.bf16.msra.mxu1 %v9070_v0  ;;  %v9085_v0 = vld [vmem:[#allocation8 + $0x5b8] ss:$12 sps:$4 sm:$0xff]  }
 0x823   :  { %8045 = vmatpush3.bf16.msra.mxu0 %v9033_v46 }
 0x824   :  { %8046 = vmatprep.subr.bf16.mxu0 %v9034_v47 }
 0x827   :  { %8047 = vmatpush3.bf16.msra.mxu0 %v9035_v48 }
 0x828   :  { %8048 = vmatprep.subr.bf16.mxu0 %v9036_v50 }
 0x82b   :  { %8049 = vmatpush3.bf16.msra.mxu0 %v9037_v51 }
 0x82c   :  { %8050 = vmatprep.subr.bf16.mxu0 %v9038_v53 }
 0x82f   :  { %8051 = vmatpush3.bf16.msra.mxu0 %v9039_v54 }
 0x830   :  { %8052 = vmatprep.subr.bf16.mxu0 %v9040_v55 }
 0x833   :  { %8053 = vmatpush3.bf16.msra.mxu0 %v9041_v34 }
 0x834   :  { %8054 = vmatprep.subr.bf16.mxu0 %v9042_v56 }
 0x837   :  { %8055 = vmatpush3.bf16.msra.mxu0 %v9043_v30 }
 0x838   :  { %8056 = vmatprep.subr.bf16.mxu0 %v9044_v57 }
 0x83b   :  { %8057 = vmatpush3.bf16.msra.mxu0 %v9045_v58  ;;  %v9078_v58 = vld [vmem:[#allocation8 + $0x694] ss:$12 sps:$4 sm:$0xff]  }
 0x83c   :  { %5232 = vmatprep.subr.bf16.mxu0 %v9048_v59  ;;  %5275 = vmatprep.subr.bf16.mxu1 %v9078_v58  ;;  %v9079_v59 = vld [vmem:[#allocation8 + $0x5d0] ss:$12 sps:$4 sm:$0xff]  }
 0x83e   :  { %4615 = vmatmul.mubr.bf16.vlgmr.msra.gmra.mxu0 %v10049_v15  ;;  %v9073_v15 = vld [vmem:[#allocation8 + $0x5e8] ss:$12 sps:$4 sm:$0xff]  }
 0x83f   :  { %5233 = vmatpush1.bf16.msra.mxu0 %v9046_v27  ;;  %v9076_v27 = vld [vmem:[#allocation8 + $0x690] ss:$12 sps:$4 sm:$0xff]  }
 0x840   :  { %5234 = vmatprep.subr.bf16.mxu0 %v9051_v60  ;;  %5276 = vmatpush1.bf16.msra.mxu1 %v9076_v27  ;;  %v9084_v60 = vld [vmem:[#allocation8 + $0x67c] ss:$12 sps:$4 sm:$0xff]  }
 0x841   :  { %5277 = vmatprep.subr.bf16.mxu1 %v9084_v60  ;;  %v9122_v60 = vld [vmem:[#allocation8 + $0x518] ss:$12 sps:$4 sm:$0xff]  }
 0x843   :  { %5235 = vmatpush1.bf16.msra.mxu0 %v9049_v61  ;;  %v9082_v61 = vld [vmem:[#allocation8 + $0x678] ss:$12 sps:$4 sm:$0xff]  }
 0x844   :  { %5236 = vmatprep.subr.bf16.mxu0 %v9054_v62  ;;  %v9087_v62 = vld [vmem:[#allocation8 + $0x5bc] ss:$12 sps:$4 sm:$0xff]   ;;  %5278 = vmatpush1.bf16.msra.mxu1 %v9082_v61  ;;  %v9123_v61 = vld [vmem:[#allocation8 + $0x698] ss:$12 sps:$4 sm:$0xff]  }
 0x845   :  { %5279 = vmatprep.subr.bf16.mxu1 %v9090_v3  ;;  %v9126_v3 = vld [vmem:[#allocation8 + $0x680] ss:$12 sps:$4 sm:$0xff]  }
 0x847   :  { %5237 = vmatpush1.bf16.msra.mxu0 %v9052_v5  ;;  %v9088_v5 = vld [vmem:[#allocation8 + $0x660] ss:$12 sps:$4 sm:$0xff]  }
 0x848   :  { %5238 = vmatprep.subr.bf16.mxu0 %v9057_v7  ;;  %v9091_v7 = vld [vmem:[#allocation8 + $0x5a0] ss:$12 sps:$4 sm:$0xff]   ;;  %5280 = vmatpush1.bf16.msra.mxu1 %v9088_v5  ;;  %v9127_v5 = vld [vmem:[#allocation8 + $0x5a8] ss:$12 sps:$4 sm:$0xff]  }
 0x84b   :  { %5239 = vmatpush1.bf16.msra.mxu0 %v9055_v8  ;;  %v9093_v8 = vld [vmem:[#allocation8 + $0x5a4] ss:$12 sps:$4 sm:$0xff]  }
 0x84c   :  { %5240 = vmatprep.subr.bf16.mxu0 %v9060_v9  ;;  %v9096_v9 = vld [vmem:[#allocation8 + $0x64c] ss:$12 sps:$4 sm:$0xff]  }
 0x84d   :  { %5281 = vmatprep.subr.bf16.mxu1 %v9096_v9  ;;  %v9130_v9 = vld [vmem:[#allocation8 + $0x590] ss:$12 sps:$4 sm:$0xff]  }
 0x84f   :  { %5241 = vmatpush1.bf16.msra.mxu0 %v9058_v49  ;;  %v9094_v49 = vld [vmem:[#allocation8 + $0x648] ss:$12 sps:$4 sm:$0xff]  }
 0x850   :  { %5242 = vmatprep.subr.bf16.mxu0 %v9063_v10  ;;  %v9099_v10 = vld [vmem:[#allocation8 + $0x58c] ss:$12 sps:$4 sm:$0xff]   ;;  %5282 = vmatpush1.bf16.msra.mxu1 %v9094_v49  ;;  %v9131_v49 = vld [vmem:[#allocation8 + $0x4d0] ss:$12 sps:$4 sm:$0xff]  }
 0x853   :  { %5243 = vmatpush1.bf16.msra.mxu0 %v9061_v52  ;;  %v9097_v52 = vld [vmem:[#allocation8 + $0x588] ss:$12 sps:$4 sm:$0xff]  }
 0x854   :  { %5244 = vmatprep.subr.bf16.mxu0 %v9066_v11  ;;  %v9102_v11 = vld [vmem:[#allocation8 + $0x634] ss:$12 sps:$4 sm:$0xff]  }
 0x855   :  { %5283 = vmatprep.subr.bf16.mxu1 %v9102_v11  ;;  %v9134_v11 = vld [vmem:[#allocation8 + $0x4b8] ss:$12 sps:$4 sm:$0xff]  }
 0x857   :  { %5245 = vmatpush1.bf16.msra.mxu0 %v9064_v45  ;;  %v9105_v45 = vld [vmem:[#allocation8 + $0x574] ss:$12 sps:$4 sm:$0xff]  }
 0x858   :  { %5246 = vmatprep.subr.bf16.mxu0 %v9069_v12  ;;  %v9100_v12 = vld [vmem:[#allocation8 + $0x630] ss:$12 sps:$4 sm:$0xff]  }
 0x859   :  { %5284 = vmatpush1.bf16.msra.mxu1 %v9100_v12  ;;  %v9136_v12 = vld [vmem:[#allocation8 + $0x560] ss:$12 sps:$4 sm:$0xff]  }
 0x85b   :  { %5247 = vmatpush1.bf16.msra.mxu0 %v9067_v13  ;;  %v9103_v13 = vld [vmem:[#allocation8 + $0x570] ss:$12 sps:$4 sm:$0xff]  }
 0x85c   :  { %5248 = vmatprep.subr.bf16.mxu0 %v9075_v14  ;;  %v9108_v14 = vld [vmem:[#allocation8 + $0x61c] ss:$12 sps:$4 sm:$0xff]  }
 0x85d   :  { %5285 = vmatprep.subr.bf16.mxu1 %v9108_v14  ;;  %v9138_v14 = vld [vmem:[#allocation8 + $0x620] ss:$12 sps:$4 sm:$0xff]  }
 0x85f   :  { %5249 = vmatpush2.bf16.msra.mxu0 %v9073_v15  ;;  %v9111_v15 = vld [vmem:[#allocation8 + $0x55c] ss:$12 sps:$4 sm:$0xff]  }
 0x8be   :  { %v4534_v16 = vpop.f32.mrf.mxu1 }
 0x8bf   :  { %v4535_v39 = vadd.f32 %v4534_v16, %v4104_v38  ;;  %v9106_v16 = vld [vmem:[#allocation8 + $0x618] ss:$12 sps:$4 sm:$0xff]   ;;  %v4666_v38 = vld [vmem:[#allocation17 + $0x3] sm:$0x7] }
 0x8c0   :  { %v4536_v17 = vpop.f32.mrf.mxu1  ;;  %5286 = vmatpush1.bf16.msra.mxu1 %v9106_v16  ;;  %v9140_v16 = vld [vmem:[#allocation8 + $0x488] ss:$12 sps:$4 sm:$0xff]  }
 0x8c1   :  { %v4537_v6 = vadd.f32 %v4536_v17, %v4108_v4  ;;  %v9109_v17 = vld [vmem:[#allocation8 + $0x558] ss:$12 sps:$4 sm:$0xff]  }
 0x8c2   :  { %v4538_v18 = vpop.f32.mrf.mxu1 }
 0x8c3   :  { %v9114_v18 = vld [vmem:[#allocation8 + $0x604] ss:$12 sps:$4 sm:$0xff]  }
 0x8c4   :  { %v4539_v22 = vpop.f32.mrf.mxu1  ;;  %5287 = vmatprep.subr.bf16.mxu1 %v9114_v18  ;;  %v9142_v18 = vld [vmem:[#allocation10 + $0x528] ss:$12 sps:$4 sm:$0xff]  }
 0x8c5   :  { %v9117_v22 = vld [vmem:[#allocation8 + $0x544] ss:$12 sps:$4 sm:$0xff]  }
 0x8de   :  { %v4575_v24 = vpop.f32.mrf.mxu0  ;;  %v4656_v25 = vpop.f32.mrf.mxu1 }
 0x8df   :  { %v4576_v42 = vadd.f32 %v4575_v24, %v4535_v39  ;;  %v9112_v24 = vld [vmem:[#allocation8 + $0x600] ss:$12 sps:$4 sm:$0xff]   ;;  %v4700_v39 = vrot.slane %v4666_v38, %v9818_v21 }
 0x8e0   :  { %v4577_v26 = vpop.f32.mrf.mxu0  ;;  %v8335_v29 = vpop.f32.mrf.mxu1  ;;  %5288 = vmatpush1.bf16.msra.mxu1 %v9112_v24  ;;  %v9147_v24 = vld [vmem:[#allocation10 + $0x514] ss:$12 sps:$4 sm:$0xff]  }
 0x8e1   :  { %v4578_v40 = vadd.f32 %v4577_v26, %v4537_v6  ;;  %v10071_v48 = vadd.f32 %v4576_v42, %v10024_v37  ;;  %v9118_v26 = vld [vmem:[#allocation8 + $0x5f0] ss:$12 sps:$4 sm:$0xff]   ;;  %v4668_v6 = vld [vmem:[#allocation19 + $0x3] sm:$0x7] }
 0x8e2   :  { %v4579_v31 = vpop.f32.mrf.mxu0  ;;  %v4659_v32 = vpop.f32.mrf.mxu1  ;;  %8073 = vmatprep.subr.bf16.mxu1 %v9118_v26  ;;  %v9150_v26 = vld [vmem:[#allocation10 + $0x4fc] ss:$12 sps:$4 sm:$0xff]  }
 0x8e3   :  { %v10068_v44 = vadd.f32 %v4578_v40, %v10020_v28  ;;  %v4674_v28 = vmul.f32 %v10071_v48, %v10071_v48  ;;  %v4704_v40 = vrot.slane %v4666_v38, %v9814_v19 }
 0x8e4   :  { %v4580_v33 = vpop.f32.mrf.mxu0  ;;  %v8336_v35 = vpop.f32.mrf.mxu1 }
 0x8e5   :  { %v4675_v54 = vmul.f32 %v10068_v44, %v10068_v44  ;;  %v4669_v34 = vadd.f32 %v10068_v44, %v10071_v48 }
 0x8e7   :  { %v4677_v30 = vadd.f32 %v4675_v54, %v4674_v28 }
 0x8fe   :  { %v8058_v41 = vpop.f32.mrf.mxu0 }
 0x900   :  { %v8059_v63 = vpop.f32.mrf.mxu0 }
 0x901   :  { %v8060_v46 = vadd.f32 %v8059_v63, %v8058_v41  ;;  %v4696_v63 = vrot.slane %v4666_v38, %v9816_v20  ;;  %v9159_v38 = vld [vmem:[#allocation10 + $0x4b4] ss:$12 sps:$4 sm:$0xff]  }
 0x902   :  { %v8061_v47 = vpop.f32.mrf.mxu0 }
 0x903   :  { %v4617_v50 = vadd.f32 %v8060_v46, %v4112_v43  ;;  %v4719_v47 = vrot.slane %v4668_v6, %v9818_v21 }
 0x904   :  { %v8062_v51 = vpop.f32.mrf.mxu0 }
 0x905   :  { %v4657_v53 = vadd.f32 %v4656_v25, %v4617_v50  ;;  %v9115_v25 = vld [vmem:[#allocation8 + $0x540] ss:$12 sps:$4 sm:$0xff]   ;;  %v4723_v50 = vrot.slane %v4668_v6, %v9814_v19 }
 0x907   :  { %v10076_v55 = vadd.f32 %v4657_v53, %v10022_v23  ;;  %v9081_v23 = vld [vmem:[#allocation8 + $0x5d4] ss:$12 sps:$4 sm:$0xff]  }
 0x908   :  { %5250 = vmatprep.subr.bf16.mxu0 %v9081_v23  ;;  %v9120_v23 = vld [vmem:[#allocation8 + $0x6b0] ss:$12 sps:$4 sm:$0xff]  }
 0x909   :  { %v4670_v56 = vadd.f32 %v4669_v34, %v10076_v55  ;;  %v4676_v37 = vmul.f32 %v10076_v55, %v10076_v55  ;;  %5251 = vmatpush2.bf16.msra.mxu0 %v9079_v59  ;;  %v4715_v34 = vrot.slane %v4668_v6, %v9816_v20  ;;  %v9121_v59 = vld [vmem:[#allocation8 + $0x5d8] ss:$12 sps:$4 sm:$0xff]   ;;  %v9157_v6 = vld [vmem:[#allocation10 + $0x4b0] ss:$12 sps:$4 sm:$0xff]  }
 0x90a   :  { %5252 = vmatprep.subr.bf16.mxu0 %v9087_v62  ;;  %v9124_v62 = vld [vmem:[#allocation8 + $0x5c0] ss:$12 sps:$4 sm:$0xff]  }
 0x90b   :  { %4671 = vadd.xlane.f32.xlu0 %v4670_v56  ;;  %v4678_v57 = vadd.f32 %v4677_v30, %v4676_v37  ;;  %v9119_v30 = vld [vmem:[#allocation8 + $0x530] ss:$12 sps:$4 sm:$0xff]  }
 0x90d   :  { %4679 = vadd.xlane.f32.xlu1 %v4678_v57  ;;  %5253 = vmatpush2.bf16.msra.mxu0 %v9085_v0  ;;  %v9125_v0 = vld [vmem:[#allocation8 + $0x500] ss:$12 sps:$4 sm:$0xff]  }
 0x90e   :  { %5254 = vmatprep.subr.bf16.mxu0 %v9093_v8  ;;  %v9129_v8 = vld [vmem:[#allocation8 + $0x668] ss:$12 sps:$4 sm:$0xff]  }
 0x911   :  { %5255 = vmatpush2.bf16.msra.mxu0 %v9091_v7  ;;  %v9128_v7 = vld [vmem:[#allocation8 + $0x4e8] ss:$12 sps:$4 sm:$0xff]  }
 0x912   :  { %5256 = vmatprep.subr.bf16.mxu0 %v9099_v10  ;;  %v9132_v10 = vld [vmem:[#allocation8 + $0x650] ss:$12 sps:$4 sm:$0xff]  }
 0x915   :  { %5257 = vmatpush2.bf16.msra.mxu0 %v9097_v52  ;;  %v9133_v52 = vld [vmem:[#allocation8 + $0x578] ss:$12 sps:$4 sm:$0xff]  }
 0x916   :  { %5258 = vmatprep.subr.bf16.mxu0 %v9105_v45  ;;  %v9135_v45 = vld [vmem:[#allocation8 + $0x638] ss:$12 sps:$4 sm:$0xff]  }
 0x919   :  { %5259 = vmatpush2.bf16.msra.mxu0 %v9103_v13  ;;  %v9137_v13 = vld [vmem:[#allocation8 + $0x4a0] ss:$12 sps:$4 sm:$0xff]  }
 0x91a   :  { %5260 = vmatprep.subr.bf16.mxu0 %v9111_v15  ;;  %v9139_v15 = vld [vmem:[#allocation8 + $0x548] ss:$12 sps:$4 sm:$0xff]  }
 0x91d   :  { %5261 = vmatpush2.bf16.msra.mxu0 %v9109_v17  ;;  %v9141_v17 = vld [vmem:[#allocation8 + $0x608] ss:$12 sps:$4 sm:$0xff]  }
 0x91e   :  { %5262 = vmatprep.subr.bf16.mxu0 %v9117_v22  ;;  %v9144_v22 = vld [vmem:[#allocation10 + $0x52c] ss:$12 sps:$4 sm:$0xff]  }
 0x921   :  { %5263 = vmatpush2.bf16.msra.mxu0 %v9115_v25  ;;  %v9145_v25 = vld [vmem:[#allocation10 + $0x510] ss:$12 sps:$4 sm:$0xff]  }
 0x922   :  { %8337 = vmatprep.subr.bf16.mxu0 %v9642_v1 }
 0x994   :  { %v4672_v29 = vpop.xlane.xlu0 %4671 }
 0x995   :  { %v4673_v31 = vmul.f32 0.0033333334, %v4672_v29  ;;  %v9166_v29 = vld [vmem:[#allocation10 + $0x6a8] ss:$12 sps:$4 sm:$0xff]  }
 0x996   :  { %v4680_v32 = vpop.xlane.xlu1 %4679 }
 0x997   :  { %v4681_v33 = vmul.f32 0.0033333334, %v4680_v32  ;;  %v4682_v35 = vmul.f32 %v4673_v31, %v4673_v31  ;;  %v4684_v41 = vsub.f32 %v10071_v48, %v4673_v31  ;;  %v4685_v42 = vsub.f32 %v10068_v44, %v4673_v31  ;;  %v9148_v32 = vld [vmem:[#allocation10 + $0x4f8] ss:$12 sps:$4 sm:$0xff]  }
 0x998   :  { %v4686_v43 = vsub.f32 %v10076_v55, %v4673_v31  ;;  %v9168_v31 = vld [vmem:[#allocation10 + $0x6ac] ss:$12 sps:$4 sm:$0xff]  }
 0x999   :  { %v4683_v36 = vsub.f32 %v4681_v33, %v4682_v35  ;;  %v9153_v33 = vld [vmem:[#allocation10 + $0x4e4] ss:$12 sps:$4 sm:$0xff]   ;;  %v9151_v35 = vld [vmem:[#allocation10 + $0x4e0] ss:$12 sps:$4 sm:$0xff]  }
 0x99b   :  { %v4687_v4 = vadd.f32 1e-05, %v4683_v36  ;;  %v9156_v36 = vld [vmem:[#allocation10 + $0x4cc] ss:$12 sps:$4 sm:$0xff]  }
 0x99d   :  { %9364 = vrsqrt.f32 %v4687_v4  ;;  %v9154_v4 = vld [vmem:[#allocation10 + $0x4c8] ss:$12 sps:$4 sm:$0xff]  }
 0x9aa   :  { %v9365_v46 = vpop.eup %9364 }
 0x9ab   :  { %v4690_v51 = vmul.f32 %v9365_v46, %v4685_v42  ;;  %v4691_v53 = vmul.f32 %v9365_v46, %v4686_v43  ;;  %v4689_v54 = vmul.f32 %v9365_v46, %v4684_v41  ;;  %v9165_v41 = vld [vmem:[#allocation10 + $0x484] ss:$12 sps:$4 sm:$0xff]   ;;  %v9163_v42 = vld [vmem:[#allocation10 + $0x480] ss:$12 sps:$4 sm:$0xff]  }
 0x9ac   :  { %v9171_v43 = vld [vmem:[#allocation10 + $0x5ec] ss:$12 sps:$4 sm:$0xff]  }
 0x9ad   :  { %v4709_v28 = vmul.f32 %v4700_v39, %v4690_v51  ;;  %v4710_v56 = vmul.f32 %v4704_v40, %v4691_v53  ;;  %v4708_v37 = vmul.f32 %v4696_v63, %v4689_v54  ;;  %v9162_v39 = vld [vmem:[#allocation10 + $0x49c] ss:$12 sps:$4 sm:$0xff]   ;;  %v9160_v40 = vld [vmem:[#allocation10 + $0x498] ss:$12 sps:$4 sm:$0xff]  }
 0x9ae   :  { %v9169_v63 = vld [vmem:[#allocation10 + $0x5e8] ss:$12 sps:$4 sm:$0xff]  }
 0x9af   :  { %v10095_v48 = vadd.f32 %v4719_v47, %v4709_v28  ;;  %v10097_v44 = vadd.f32 %v4723_v50, %v4710_v56  ;;  %v10099_v55 = vadd.f32 %v4715_v34, %v4708_v37  ;;  %v7633_v56 = vld [vmem:[%s10250_s4 + $0x6] sm:$0x7] }
 0x9b0   :  { %v4840_v37 = vrot.slane %v7633_v56, %v9818_v21 }
 0x9b1   :  { %v4731_v57 = vpack.c.bf16 %v10095_v48, %v10095_v48  ;;  %v4732_v58 = vpack.c.bf16 %v10097_v44, %v10097_v44  ;;  %v4730_v27 = vpack.c.bf16 %v10099_v55, %v10099_v55 }
 0x9b3   :  { %5264 = vmatprep.mubr.bf16.mxu0 %v4731_v57  ;;  %5306 = vmatmul.mubr.bf16.vlgmr.msra.gmra.mxu1 %v4732_v58 }
 0x9b4   :  { %8074 = vmatpush3.bf16.msra.mxu1 %v9119_v30  ;;  %5265 = vmatmul.mubr.bf16.vlgmr.msra.gmra.mxu0 %v4730_v27  ;;  %v4836_v30 = vrot.slane %v7633_v56, %v9816_v20 }
 0x9b5   :  { %5346 = vmatprep.mubr.bf16.mxu1 %v4731_v57  ;;  %8338 = vmatpush3.bf16.msra.mxu0 %v9120_v23 }
 0x9b6   :  { %8075 = vmatprep.subr.bf16.mxu1 %v9121_v59  ;;  %8339 = vmatprep.subr.bf16.mxu0 %v9642_v1 }
 0x9b7   :  { %8353 = vmatprep.mubr.msk.bf16.mxu0 %vm9643_vm0, %v9642_v1 }
 0x9b8   :  { %8076 = vmatpush3.bf16.msra.mxu1 %v9122_v60 }
 0x9b9   :  { %8340 = vmatpush3.bf16.msra.mxu0 %v9123_v61  ;;  %8077 = vmatprep.subr.bf16.mxu1 %v9124_v62  ;;  %v4844_v61 = vrot.slane %v7633_v56, %v9814_v19 }
 0x9ba   :  { %8341 = vmatprep.subr.bf16.mxu0 %v9642_v1 }
 0x9bc   :  { %8078 = vmatpush3.bf16.msra.mxu1 %v9125_v0 }
 0x9bd   :  { %8342 = vmatpush3.bf16.msra.mxu0 %v9126_v3  ;;  %8079 = vmatprep.subr.bf16.mxu1 %v9127_v5 }
 0x9be   :  { %8343 = vmatprep.subr.bf16.mxu0 %v9642_v1 }
 0x9c0   :  { %8080 = vmatpush3.bf16.msra.mxu1 %v9128_v7 }
 0x9c1   :  { %8344 = vmatpush3.bf16.msra.mxu0 %v9129_v8  ;;  %8081 = vmatprep.subr.bf16.mxu1 %v9130_v9 }
 0x9c2   :  { %8345 = vmatprep.subr.bf16.mxu0 %v9642_v1 }
 0x9c4   :  { %8082 = vmatpush3.bf16.msra.mxu1 %v9131_v49 }
 0x9c5   :  { %8346 = vmatpush3.bf16.msra.mxu0 %v9132_v10  ;;  %8083 = vmatprep.subr.bf16.mxu1 %v9133_v52 }
 0x9c6   :  { %8347 = vmatprep.subr.bf16.mxu0 %v9642_v1 }
 0x9c8   :  { %8084 = vmatpush3.bf16.msra.mxu1 %v9134_v11 }
 0x9c9   :  { %8348 = vmatpush3.bf16.msra.mxu0 %v9135_v45  ;;  %8085 = vmatprep.subr.bf16.mxu1 %v9136_v12 }
 0x9ca   :  { %8349 = vmatprep.subr.bf16.mxu0 %v9642_v1 }
 0x9cc   :  { %8086 = vmatpush3.bf16.msra.mxu1 %v9137_v13 }
 0x9cd   :  { %8350 = vmatpush3.bf16.msra.mxu0 %v9138_v14  ;;  %8087 = vmatprep.subr.bf16.mxu1 %v9139_v15 }
 0x9ce   :  { %8351 = vmatprep.subr.bf16.mxu0 %v9642_v1 }
 0x9d0   :  { %8088 = vmatpush3.bf16.msra.mxu1 %v9140_v16 }
 0x9d1   :  { %8352 = vmatpush3.bf16.msra.mxu0 %v9141_v17  ;;  %5964 = vmatprep.subr.bf16.mxu1 %v9144_v22  ;;  %v9174_v17 = vld [vmem:[#allocation10 + $0x694] ss:$12 sps:$4 sm:$0xff]   ;;  %v9175_v22 = vld [vmem:[#allocation10 + $0x5d0] ss:$12 sps:$4 sm:$0xff]  }
 0x9d2   :  { %6005 = vmatprep.subr.bf16.mxu0 %v9168_v31  ;;  %v9186_v31 = vld [vmem:[#allocation10 + $0x664] ss:$12 sps:$4 sm:$0xff]  }
 0x9d3   :  { %5347 = vmatmul.mubr.bf16.vlgmr.msra.gmra.mxu1 %v4730_v27 }
 0x9d4   :  { %8354 = vmatmul.mubr.bf16.vlgmr.msra.gmra.mxu0 %v4732_v58  ;;  %5965 = vmatpush1.bf16.msra.mxu1 %v9142_v18  ;;  %v9172_v18 = vld [vmem:[#allocation10 + $0x690] ss:$12 sps:$4 sm:$0xff]  }
 0x9d5   :  { %6037 = vmatprep.mubr.bf16.mxu0 %v9644_v2  ;;  %5966 = vmatprep.subr.bf16.mxu1 %v9147_v24  ;;  %v9180_v24 = vld [vmem:[#allocation10 + $0x67c] ss:$12 sps:$4 sm:$0xff]  }
 0x9d6   :  { %6006 = vmatpush1.bf16.msra.mxu0 %v9166_v29  ;;  %v9181_v29 = vld [vmem:[#allocation10 + $0x5b8] ss:$12 sps:$4 sm:$0xff]  }
 0x9d7   :  { %6007 = vmatprep.subr.bf16.mxu0 %v9174_v17 }
 0x9d8   :  { %5967 = vmatpush1.bf16.msra.mxu1 %v9145_v25  ;;  %v9178_v25 = vld [vmem:[#allocation10 + $0x678] ss:$12 sps:$4 sm:$0xff]  }
 0x9d9   :  { %5968 = vmatprep.subr.bf16.mxu1 %v9150_v26  ;;  %v9183_v26 = vld [vmem:[#allocation10 + $0x5bc] ss:$12 sps:$4 sm:$0xff]  }
 0x9da   :  { %6008 = vmatpush1.bf16.msra.mxu0 %v9172_v18 }
 0x9db   :  { %6009 = vmatprep.subr.bf16.mxu0 %v9180_v24  ;;  %v9218_v24 = vld [vmem:[#allocation10 + $0x518] ss:$12 sps:$4 sm:$0xff]  }
 0x9dc   :  { %5969 = vmatpush1.bf16.msra.mxu1 %v9148_v32  ;;  %v9184_v32 = vld [vmem:[#allocation10 + $0x660] ss:$12 sps:$4 sm:$0xff]  }
 0x9dd   :  { %5970 = vmatprep.subr.bf16.mxu1 %v9153_v33  ;;  %v9187_v33 = vld [vmem:[#allocation10 + $0x5a0] ss:$12 sps:$4 sm:$0xff]  }
 0x9de   :  { %6010 = vmatpush1.bf16.msra.mxu0 %v9178_v25  ;;  %v9219_v25 = vld [vmem:[#allocation10 + $0x698] ss:$12 sps:$4 sm:$0xff]  }
 0x9df   :  { %6011 = vmatprep.subr.bf16.mxu0 %v9186_v31  ;;  %v9222_v31 = vld [vmem:[#allocation10 + $0x680] ss:$12 sps:$4 sm:$0xff]  }
 0x9e0   :  { %5971 = vmatpush1.bf16.msra.mxu1 %v9151_v35  ;;  %v9189_v35 = vld [vmem:[#allocation10 + $0x5a4] ss:$12 sps:$4 sm:$0xff]  }
 0x9e1   :  { %5972 = vmatprep.subr.bf16.mxu1 %v9156_v36  ;;  %v9192_v36 = vld [vmem:[#allocation10 + $0x64c] ss:$12 sps:$4 sm:$0xff]  }
 0x9e2   :  { %6012 = vmatpush1.bf16.msra.mxu0 %v9184_v32  ;;  %v9223_v32 = vld [vmem:[#allocation10 + $0x5a8] ss:$12 sps:$4 sm:$0xff]  }
 0x9e3   :  { %6013 = vmatprep.subr.bf16.mxu0 %v9192_v36  ;;  %v9226_v36 = vld [vmem:[#allocation10 + $0x590] ss:$12 sps:$4 sm:$0xff]  }
 0x9e4   :  { %5973 = vmatpush1.bf16.msra.mxu1 %v9154_v4  ;;  %v9190_v4 = vld [vmem:[#allocation10 + $0x648] ss:$12 sps:$4 sm:$0xff]  }
 0x9e5   :  { %5974 = vmatprep.subr.bf16.mxu1 %v9159_v38  ;;  %v9195_v38 = vld [vmem:[#allocation10 + $0x58c] ss:$12 sps:$4 sm:$0xff]  }
 0x9e6   :  { %6014 = vmatpush1.bf16.msra.mxu0 %v9190_v4  ;;  %v9227_v4 = vld [vmem:[#allocation10 + $0x4d0] ss:$12 sps:$4 sm:$0xff]  }
 0x9e8   :  { %5975 = vmatpush1.bf16.msra.mxu1 %v9157_v6  ;;  %v9193_v6 = vld [vmem:[#allocation10 + $0x588] ss:$12 sps:$4 sm:$0xff]  }
 0x9e9   :  { %5976 = vmatprep.subr.bf16.mxu1 %v9162_v39  ;;  %v9198_v39 = vld [vmem:[#allocation10 + $0x634] ss:$12 sps:$4 sm:$0xff]  }
 0x9ea   :  { %6015 = vmatprep.subr.bf16.mxu0 %v9198_v39  ;;  %v9230_v39 = vld [vmem:[#allocation10 + $0x4b8] ss:$12 sps:$4 sm:$0xff]  }
 0x9ec   :  { %5977 = vmatpush1.bf16.msra.mxu1 %v9160_v40  ;;  %v9201_v40 = vld [vmem:[#allocation10 + $0x574] ss:$12 sps:$4 sm:$0xff]  }
 0x9ed   :  { %5978 = vmatprep.subr.bf16.mxu1 %v9165_v41  ;;  %v9196_v41 = vld [vmem:[#allocation10 + $0x630] ss:$12 sps:$4 sm:$0xff]  }
 0x9ee   :  { %6016 = vmatpush1.bf16.msra.mxu0 %v9196_v41  ;;  %v9232_v41 = vld [vmem:[#allocation10 + $0x560] ss:$12 sps:$4 sm:$0xff]  }
 0x9f0   :  { %5979 = vmatpush1.bf16.msra.mxu1 %v9163_v42  ;;  %v9199_v42 = vld [vmem:[#allocation10 + $0x570] ss:$12 sps:$4 sm:$0xff]  }
 0x9f1   :  { %5980 = vmatprep.subr.bf16.mxu1 %v9171_v43  ;;  %v9204_v43 = vld [vmem:[#allocation10 + $0x61c] ss:$12 sps:$4 sm:$0xff]  }
 0x9f2   :  { %6017 = vmatprep.subr.bf16.mxu0 %v9204_v43  ;;  %v9234_v43 = vld [vmem:[#allocation10 + $0x620] ss:$12 sps:$4 sm:$0xff]  }
 0x9f4   :  { %5981 = vmatpush2.bf16.msra.mxu1 %v9169_v63  ;;  %v9207_v63 = vld [vmem:[#allocation10 + $0x55c] ss:$12 sps:$4 sm:$0xff]  }
 0xa73   :  { %v5307_v46 = vpop.f32.mrf.mxu1 }
 0xa74   :  { %v5266_v47 = vpop.f32.mrf.mxu0 }
 0xa75   :  { %v5309_v50 = vpop.f32.mrf.mxu1  ;;  %v5267_v58 = vadd.f32 %v5266_v47, %v4836_v30  ;;  %v9205_v47 = vld [vmem:[#allocation10 + $0x558] ss:$12 sps:$4 sm:$0xff]  }
 0xa76   :  { %v5268_v51 = vpop.f32.mrf.mxu0 }
 0xa77   :  { %v5311_v53 = vpop.f32.mrf.mxu1  ;;  %v5269_v57 = vadd.f32 %v5268_v51, %v4840_v37  ;;  %v5308_v59 = vadd.f32 %v5307_v46, %v5267_v58  ;;  %v9202_v46 = vld [vmem:[#allocation10 + $0x618] ss:$12 sps:$4 sm:$0xff]  }
 0xa78   :  { %v5270_v54 = vpop.f32.mrf.mxu0  ;;  %v9213_v51 = vld [vmem:[#allocation10 + $0x544] ss:$12 sps:$4 sm:$0xff]   ;;  %6018 = vmatpush1.bf16.msra.mxu0 %v9202_v46  ;;  %v9208_v53 = vld [vmem:[#allocation10 + $0x600] ss:$12 sps:$4 sm:$0xff]   ;;  %v9236_v46 = vld [vmem:[#allocation10 + $0x488] ss:$12 sps:$4 sm:$0xff]  }
 0xa79   :  { %v5312_v34 = vpop.f32.mrf.mxu1  ;;  %v5310_v27 = vadd.f32 %v5309_v50, %v5269_v57  ;;  %v10127_v8 = vadd.f32 %v5308_v59, %v10099_v55  ;;  %v9210_v50 = vld [vmem:[#allocation10 + $0x604] ss:$12 sps:$4 sm:$0xff]   ;;  %v9211_v54 = vld [vmem:[#allocation10 + $0x540] ss:$12 sps:$4 sm:$0xff]   ;;  %v5400_v59 = vld [vmem:[#allocation16 + $0x6] sm:$0x7] }
 0xa7a   :  { %v5271_v28 = vpop.f32.mrf.mxu0  ;;  %6019 = vmatprep.subr.bf16.mxu0 %v9210_v50  ;;  %v9214_v34 = vld [vmem:[#allocation10 + $0x5f0] ss:$12 sps:$4 sm:$0xff]   ;;  %v9240_v50 = vld [vmem:[#allocation13 + $0x52c] ss:$12 sps:$4 sm:$0xff]  }
 0xa7b   :  { %v10124_v0 = vadd.f32 %v5310_v27, %v10095_v48  ;;  %v5406_v13 = vmul.f32 %v10127_v8, %v10127_v8 }
 0xa7c   :  { %6020 = vmatpush1.bf16.msra.mxu0 %v9208_v53  ;;  %v9243_v53 = vld [vmem:[#allocation13 + $0x514] ss:$12 sps:$4 sm:$0xff]  }
 0xa7d   :  { %v5407_v45 = vmul.f32 %v10124_v0, %v10124_v0  ;;  %v5401_v48 = vadd.f32 %v10124_v0, %v10127_v8  ;;  %8104 = vmatprep.subr.bf16.mxu0 %v9214_v34  ;;  %v9246_v34 = vld [vmem:[#allocation13 + $0x4fc] ss:$12 sps:$4 sm:$0xff]  }
 0xa7f   :  { %v5409_v15 = vadd.f32 %v5407_v45, %v5406_v13 }
 0xa93   :  { %v8089_v23 = vpop.f32.mrf.mxu1 }
 0xa94   :  { %v5388_v60 = vpop.f32.mrf.mxu0 }
 0xa95   :  { %v8090_v62 = vpop.f32.mrf.mxu1 }
 0xa96   :  { %v8091_v3 = vadd.f32 %v8090_v62, %v8089_v23  ;;  %v8355_v5 = vpop.f32.mrf.mxu0  ;;  %v7706_v23 = vld [vmem:[%s10255_s9 + $0x6] sm:$0x7] }
 0xa97   :  { %v8092_v7 = vpop.f32.mrf.mxu1 }
 0xa98   :  { %v5349_v9 = vadd.f32 %v8091_v3, %v4844_v61  ;;  %v5391_v49 = vpop.f32.mrf.mxu0  ;;  %v5436_v61 = vrot.slane %v7706_v23, %v9814_v19  ;;  %v5428_v7 = vrot.slane %v7706_v23, %v9816_v20 }
 0xa99   :  { %v8093_v10 = vpop.f32.mrf.mxu1  ;;  %v5451_v49 = vrot.slane %v5400_v59, %v9818_v21 }
 0xa9a   :  { %v5389_v52 = vadd.f32 %v5388_v60, %v5349_v9  ;;  %v8356_v11 = vpop.f32.mrf.mxu0  ;;  %v5432_v60 = vrot.slane %v7706_v23, %v9818_v21  ;;  %v5455_v10 = vrot.slane %v5400_v59, %v9814_v19  ;;  %v9258_v23 = vld [vmem:[#allocation13 + $0x49c] ss:$12 sps:$4 sm:$0xff]  }
 0xa9c   :  { %v10132_v12 = vadd.f32 %v5389_v52, %v10097_v44  ;;  %v9177_v44 = vld [vmem:[#allocation10 + $0x5d4] ss:$12 sps:$4 sm:$0xff]  }
 0xa9d   :  { %5982 = vmatprep.subr.bf16.mxu1 %v9177_v44  ;;  %v9216_v44 = vld [vmem:[#allocation10 + $0x6b0] ss:$12 sps:$4 sm:$0xff]  }
 0xa9e   :  { %v5402_v55 = vadd.f32 %v5401_v48, %v10132_v12  ;;  %v5408_v14 = vmul.f32 %v10132_v12, %v10132_v12  ;;  %5983 = vmatpush2.bf16.msra.mxu1 %v9175_v22  ;;  %v5447_v48 = vrot.slane %v5400_v59, %v9816_v20  ;;  %v9217_v22 = vld [vmem:[#allocation10 + $0x5d8] ss:$12 sps:$4 sm:$0xff]  }
 0xa9f   :  { %5984 = vmatprep.subr.bf16.mxu1 %v9183_v26  ;;  %v9220_v26 = vld [vmem:[#allocation10 + $0x5c0] ss:$12 sps:$4 sm:$0xff]  }
 0xaa0   :  { %5403 = vadd.xlane.f32.xlu0 %v5402_v55  ;;  %v5410_v16 = vadd.f32 %v5409_v15, %v5408_v14  ;;  %v9215_v15 = vld [vmem:[#allocation10 + $0x530] ss:$12 sps:$4 sm:$0xff]  }
 0xaa1   :  { %v9256_v59 = vld [vmem:[#allocation13 + $0x498] ss:$12 sps:$4 sm:$0xff]  }
 0xaa2   :  { %5411 = vadd.xlane.f32.xlu1 %v5410_v16  ;;  %5985 = vmatpush2.bf16.msra.mxu1 %v9181_v29  ;;  %v9221_v29 = vld [vmem:[#allocation10 + $0x500] ss:$12 sps:$4 sm:$0xff]  }
 0xaa3   :  { %5986 = vmatprep.subr.bf16.mxu1 %v9189_v35  ;;  %v9225_v35 = vld [vmem:[#allocation10 + $0x668] ss:$12 sps:$4 sm:$0xff]  }
 0xaa6   :  { %5987 = vmatpush2.bf16.msra.mxu1 %v9187_v33  ;;  %v9224_v33 = vld [vmem:[#allocation10 + $0x4e8] ss:$12 sps:$4 sm:$0xff]  }
 0xaa7   :  { %5988 = vmatprep.subr.bf16.mxu1 %v9195_v38  ;;  %v9228_v38 = vld [vmem:[#allocation10 + $0x650] ss:$12 sps:$4 sm:$0xff]  }
 0xaaa   :  { %5989 = vmatpush2.bf16.msra.mxu1 %v9193_v6  ;;  %v9229_v6 = vld [vmem:[#allocation10 + $0x578] ss:$12 sps:$4 sm:$0xff]  }
 0xaab   :  { %5990 = vmatprep.subr.bf16.mxu1 %v9201_v40  ;;  %v9231_v40 = vld [vmem:[#allocation10 + $0x638] ss:$12 sps:$4 sm:$0xff]  }
 0xaae   :  { %5991 = vmatpush2.bf16.msra.mxu1 %v9199_v42  ;;  %v9233_v42 = vld [vmem:[#allocation10 + $0x4a0] ss:$12 sps:$4 sm:$0xff]  }
 0xaaf   :  { %5992 = vmatprep.subr.bf16.mxu1 %v9207_v63  ;;  %v9235_v63 = vld [vmem:[#allocation10 + $0x548] ss:$12 sps:$4 sm:$0xff]  }
 0xab2   :  { %5993 = vmatpush2.bf16.msra.mxu1 %v9205_v47  ;;  %v9237_v47 = vld [vmem:[#allocation10 + $0x608] ss:$12 sps:$4 sm:$0xff]  }
 0xab3   :  { %5994 = vmatprep.subr.bf16.mxu1 %v9213_v51  ;;  %v9238_v51 = vld [vmem:[#allocation13 + $0x528] ss:$12 sps:$4 sm:$0xff]  }
 0xab6   :  { %5995 = vmatpush2.bf16.msra.mxu1 %v9211_v54  ;;  %v9241_v54 = vld [vmem:[#allocation13 + $0x510] ss:$12 sps:$4 sm:$0xff]  }
 0xab7   :  { %8357 = vmatprep.subr.bf16.mxu1 %v9642_v1 }
 0xb29   :  { %v5404_v28 = vpop.xlane.xlu0 %5403 }
 0xb2a   :  { %v5405_v56 = vmul.f32 0.0033333334, %v5404_v28  ;;  %v9244_v28 = vld [vmem:[#allocation13 + $0x4f8] ss:$12 sps:$4 sm:$0xff]  }
 0xb2b   :  { %v5412_v37 = vpop.xlane.xlu1 %5411 }
 0xb2c   :  { %v5413_v30 = vmul.f32 0.0033333334, %v5412_v37  ;;  %v5414_v57 = vmul.f32 %v5405_v56, %v5405_v56  ;;  %v5416_v62 = vsub.f32 %v10127_v8, %v5405_v56  ;;  %v5417_v3 = vsub.f32 %v10124_v0, %v5405_v56  ;;  %v9247_v37 = vld [vmem:[#allocation13 + $0x4e0] ss:$12 sps:$4 sm:$0xff]  }
 0xb2d   :  { %v5418_v5 = vsub.f32 %v10132_v12, %v5405_v56  ;;  %v9249_v56 = vld [vmem:[#allocation13 + $0x4e4] ss:$12 sps:$4 sm:$0xff]  }
 0xb2e   :  { %v5415_v58 = vsub.f32 %v5413_v30, %v5414_v57  ;;  %v9252_v30 = vld [vmem:[#allocation13 + $0x4cc] ss:$12 sps:$4 sm:$0xff]   ;;  %v9250_v57 = vld [vmem:[#allocation13 + $0x4c8] ss:$12 sps:$4 sm:$0xff]  }
 0xb30   :  { %v5419_v27 = vadd.f32 1e-05, %v5415_v58  ;;  %v9255_v58 = vld [vmem:[#allocation13 + $0x4b4] ss:$12 sps:$4 sm:$0xff]  }
 0xb32   :  { %9366 = vrsqrt.f32 %v5419_v27  ;;  %v9253_v27 = vld [vmem:[#allocation13 + $0x4b0] ss:$12 sps:$4 sm:$0xff]  }
 0xb3f   :  { %v9367_v9 = vpop.eup %9366 }
 0xb40   :  { %v5422_v52 = vmul.f32 %v9367_v9, %v5417_v3  ;;  %v5423_v11 = vmul.f32 %v9367_v9, %v5418_v5  ;;  %v5421_v45 = vmul.f32 %v9367_v9, %v5416_v62  ;;  %v9262_v62 = vld [vmem:[#allocation13 + $0x5e8] ss:$12 sps:$4 sm:$0xff]   ;;  %v9265_v5 = vld [vmem:[#allocation13 + $0x5d0] ss:$12 sps:$4 sm:$0xff]   ;;  %v9268_v9 = vld [vmem:[#allocation13 + $0x5b8] ss:$12 sps:$4 sm:$0xff]  }
 0xb41   :  { %v9267_v3 = vld [vmem:[#allocation13 + $0x5d4] ss:$12 sps:$4 sm:$0xff]  }
 0xb42   :  { %v5441_v13 = vmul.f32 %v5432_v60, %v5422_v52  ;;  %v5442_v55 = vmul.f32 %v5436_v61, %v5423_v11  ;;  %v5440_v14 = vmul.f32 %v5428_v7, %v5421_v45  ;;  %v9259_v60 = vld [vmem:[#allocation13 + $0x480] ss:$12 sps:$4 sm:$0xff]   ;;  %v9270_v7 = vld [vmem:[#allocation13 + $0x5bc] ss:$12 sps:$4 sm:$0xff]  }
 0xb43   :  { %v9264_v61 = vld [vmem:[#allocation13 + $0x5ec] ss:$12 sps:$4 sm:$0xff]   ;;  %v9286_v11 = vld [vmem:[#allocation13 + $0x6a8] ss:$12 sps:$4 sm:$0xff]  }
 0xb44   :  { %v10154_v8 = vadd.f32 %v5451_v49, %v5441_v13  ;;  %v10156_v0 = vadd.f32 %v5455_v10, %v5442_v55  ;;  %v10158_v12 = vadd.f32 %v5447_v48, %v5440_v14  ;;  %v9273_v49 = vld [vmem:[#allocation13 + $0x5a4] ss:$12 sps:$4 sm:$0xff]   ;;  %v9271_v10 = vld [vmem:[#allocation13 + $0x5a0] ss:$12 sps:$4 sm:$0xff]   ;;  %v9274_v48 = vld [vmem:[#allocation13 + $0x588] ss:$12 sps:$4 sm:$0xff]  }
 0xb45   :  { %v9276_v52 = vld [vmem:[#allocation13 + $0x58c] ss:$12 sps:$4 sm:$0xff]   ;;  %v9279_v13 = vld [vmem:[#allocation13 + $0x574] ss:$12 sps:$4 sm:$0xff]   ;;  %v9290_v55 = vld [vmem:[#allocation13 + $0x690] ss:$12 sps:$4 sm:$0xff]  }
 0xb46   :  { %v5463_v16 = vpack.c.bf16 %v10154_v8, %v10154_v8  ;;  %v10164_v17 = vpack.c.bf16 %v10156_v0, %v10156_v0  ;;  %v5462_v18 = vpack.c.bf16 %v10158_v12, %v10158_v12  ;;  %v9288_v45 = vld [vmem:[#allocation13 + $0x6ac] ss:$12 sps:$4 sm:$0xff]   ;;  %v9292_v14 = vld [vmem:[#allocation13 + $0x694] ss:$12 sps:$4 sm:$0xff]  }
 0xb48   :  { %5996 = vmatprep.mubr.bf16.mxu1 %v5463_v16  ;;  %6038 = vmatmul.mubr.bf16.vlgmr.msra.gmra.mxu0 %v10164_v17 }
 0xb49   :  { %8105 = vmatpush3.bf16.msra.mxu0 %v9215_v15  ;;  %5997 = vmatmul.mubr.bf16.vlgmr.msra.gmra.mxu1 %v5462_v18  ;;  %v9277_v15 = vld [vmem:[#allocation13 + $0x570] ss:$12 sps:$4 sm:$0xff]  }
 0xb4a   :  { %6078 = vmatprep.mubr.bf16.mxu0 %v5463_v16  ;;  %8358 = vmatpush3.bf16.msra.mxu1 %v9216_v44  ;;  %v9282_v16 = vld [vmem:[#allocation13 + $0x55c] ss:$12 sps:$4 sm:$0xff]   ;;  %v9280_v44 = vld [vmem:[#allocation13 + $0x558] ss:$12 sps:$4 sm:$0xff]  }
 0xb4b   :  { %8106 = vmatprep.subr.bf16.mxu0 %v9217_v22  ;;  %8359 = vmatprep.subr.bf16.mxu1 %v9642_v1  ;;  %v9285_v22 = vld [vmem:[#allocation13 + $0x544] ss:$12 sps:$4 sm:$0xff]  }
 0xb4c   :  { %8373 = vmatprep.mubr.msk.bf16.mxu1 %vm9643_vm0, %v9642_v1 }
 0xb4d   :  { %8107 = vmatpush3.bf16.msra.mxu0 %v9218_v24  ;;  %v9298_v24 = vld [vmem:[#allocation13 + $0x660] ss:$12 sps:$4 sm:$0xff]  }
 0xb4e   :  { %8360 = vmatpush3.bf16.msra.mxu1 %v9219_v25  ;;  %8108 = vmatprep.subr.bf16.mxu0 %v9220_v26  ;;  %v9300_v25 = vld [vmem:[#allocation13 + $0x664] ss:$12 sps:$4 sm:$0xff]   ;;  %v9283_v26 = vld [vmem:[#allocation13 + $0x540] ss:$12 sps:$4 sm:$0xff]  }
 0xb4f   :  { %8361 = vmatprep.subr.bf16.mxu1 %v9642_v1 }
 0xb51   :  { %8109 = vmatpush3.bf16.msra.mxu0 %v9221_v29  ;;  %v9302_v29 = vld [vmem:[#allocation13 + $0x648] ss:$12 sps:$4 sm:$0xff]  }
 0xb52   :  { %8362 = vmatpush3.bf16.msra.mxu1 %v9222_v31  ;;  %8110 = vmatprep.subr.bf16.mxu0 %v9223_v32  ;;  %v9304_v31 = vld [vmem:[#allocation13 + $0x64c] ss:$12 sps:$4 sm:$0xff]   ;;  %v9308_v32 = vld [vmem:[#allocation13 + $0x634] ss:$12 sps:$4 sm:$0xff]  }
 0xb53   :  { %8363 = vmatprep.subr.bf16.mxu1 %v9642_v1 }
 0xb55   :  { %8111 = vmatpush3.bf16.msra.mxu0 %v9224_v33  ;;  %v9306_v33 = vld [vmem:[#allocation13 + $0x630] ss:$12 sps:$4 sm:$0xff]  }
 0xb56   :  { %8364 = vmatpush3.bf16.msra.mxu1 %v9225_v35  ;;  %8112 = vmatprep.subr.bf16.mxu0 %v9226_v36  ;;  %v9312_v35 = vld [vmem:[#allocation13 + $0x61c] ss:$12 sps:$4 sm:$0xff]   ;;  %v9310_v36 = vld [vmem:[#allocation13 + $0x618] ss:$12 sps:$4 sm:$0xff]  }
 0xb57   :  { %8365 = vmatprep.subr.bf16.mxu1 %v9642_v1 }
 0xb59   :  { %8113 = vmatpush3.bf16.msra.mxu0 %v9227_v4  ;;  %v9316_v4 = vld [vmem:[#allocation13 + $0x604] ss:$12 sps:$4 sm:$0xff]  }
 0xb5a   :  { %8366 = vmatpush3.bf16.msra.mxu1 %v9228_v38  ;;  %8114 = vmatprep.subr.bf16.mxu0 %v9229_v6  ;;  %v9314_v38 = vld [vmem:[#allocation13 + $0x600] ss:$12 sps:$4 sm:$0xff]   ;;  %v9318_v6 = vld [vmem:[#allocation13 + $0x5f0] ss:$12 sps:$4 sm:$0xff]  }
 0xb5b   :  { %8367 = vmatprep.subr.bf16.mxu1 %v9642_v1 }
 0xb5d   :  { %8115 = vmatpush3.bf16.msra.mxu0 %v9230_v39  ;;  %v5563_v39 = vld [vmem:[#allocation11 + $0x6] sm:$0x7] }
 0xb5e   :  { %8368 = vmatpush3.bf16.msra.mxu1 %v9231_v40  ;;  %8116 = vmatprep.subr.bf16.mxu0 %v9232_v41  ;;  %v5568_v40 = vrot.slane %v5563_v39, %v9816_v20 }
 0xb5f   :  { %8369 = vmatprep.subr.bf16.mxu1 %v9642_v1 }
 0xb61   :  { %8117 = vmatpush3.bf16.msra.mxu0 %v9233_v42  ;;  %v5572_v42 = vrot.slane %v5563_v39, %v9818_v21 }
 0xb62   :  { %8370 = vmatpush3.bf16.msra.mxu1 %v9234_v43  ;;  %8118 = vmatprep.subr.bf16.mxu0 %v9235_v63 }
 0xb63   :  { %8371 = vmatprep.subr.bf16.mxu1 %v9642_v1 }
 0xb65   :  { %8119 = vmatpush3.bf16.msra.mxu0 %v9236_v46 }
 0xb66   :  { %8372 = vmatpush3.bf16.msra.mxu1 %v9237_v47  ;;  %6631 = vmatprep.subr.bf16.mxu0 %v9240_v50 }
 0xb67   :  { %6672 = vmatprep.subr.bf16.mxu1 %v9288_v45 }
 0xb68   :  { %6079 = vmatmul.mubr.bf16.vlgmr.msra.gmra.mxu0 %v5462_v18  ;;  %v9296_v18 = vld [vmem:[#allocation13 + $0x67c] ss:$12 sps:$4 sm:$0xff]  }
 0xb69   :  { %8374 = vmatmul.mubr.bf16.vlgmr.msra.gmra.mxu1 %v10164_v17  ;;  %6632 = vmatpush1.bf16.msra.mxu0 %v9238_v51  ;;  %v9294_v17 = vld [vmem:[#allocation13 + $0x678] ss:$12 sps:$4 sm:$0xff]  }
 0xb6a   :  { %6633 = vmatprep.subr.bf16.mxu0 %v9243_v53  ;;  %6704 = vmatprep.mubr.bf16.mxu1 %v9644_v2  ;;  %v9261_v2 = vld [vmem:[#allocation13 + $0x484] ss:$12 sps:$4 sm:$0xff]  }
 0xb6b   :  { %6673 = vmatpush1.bf16.msra.mxu1 %v9286_v11 }
 0xb6c   :  { %6674 = vmatprep.subr.bf16.mxu1 %v9292_v14 }
 0xb6d   :  { %6634 = vmatpush1.bf16.msra.mxu0 %v9241_v54 }
 0xb6e   :  { %6635 = vmatprep.subr.bf16.mxu0 %v9246_v34 }
 0xb6f   :  { %6675 = vmatpush1.bf16.msra.mxu1 %v9290_v55 }
 0xb70   :  { %6676 = vmatprep.subr.bf16.mxu1 %v9296_v18  ;;  %v9320_v18 = vld [vmem:[#allocation13 + $0x5d8] ss:$12 sps:$4 sm:$0xff]  }
 0xb71   :  { %6636 = vmatpush1.bf16.msra.mxu0 %v9244_v28 }
 0xb72   :  { %6637 = vmatprep.subr.bf16.mxu0 %v9249_v56 }
 0xb73   :  { %6677 = vmatpush1.bf16.msra.mxu1 %v9294_v17 }
 0xb74   :  { %6678 = vmatprep.subr.bf16.mxu1 %v9300_v25  ;;  %v9324_v25 = vld [vmem:[#allocation13 + $0x5a8] ss:$12 sps:$4 sm:$0xff]  }
 0xb75   :  { %6638 = vmatpush1.bf16.msra.mxu0 %v9247_v37 }
 0xb76   :  { %6639 = vmatprep.subr.bf16.mxu0 %v9252_v30 }
 0xb77   :  { %6679 = vmatpush1.bf16.msra.mxu1 %v9298_v24  ;;  %v9323_v24 = vld [vmem:[#allocation13 + $0x500] ss:$12 sps:$4 sm:$0xff]  }
 0xb78   :  { %6680 = vmatprep.subr.bf16.mxu1 %v9304_v31  ;;  %v9327_v31 = vld [vmem:[#allocation13 + $0x4d0] ss:$12 sps:$4 sm:$0xff]  }
 0xb79   :  { %6640 = vmatpush1.bf16.msra.mxu0 %v9250_v57 }
 0xb7a   :  { %6641 = vmatprep.subr.bf16.mxu0 %v9255_v58  ;;  %v9289_v58 = vld [vmem:[#allocation13 + $0x6b0] ss:$12 sps:$4 sm:$0xff]  }
 0xb7b   :  { %6681 = vmatpush1.bf16.msra.mxu1 %v9302_v29  ;;  %v9326_v29 = vld [vmem:[#allocation13 + $0x590] ss:$12 sps:$4 sm:$0xff]  }
 0xb7c   :  { %6682 = vmatprep.subr.bf16.mxu1 %v9308_v32  ;;  %v9328_v32 = vld [vmem:[#allocation13 + $0x578] ss:$12 sps:$4 sm:$0xff]  }
 0xb7d   :  { %6642 = vmatpush1.bf16.msra.mxu0 %v9253_v27 }
 0xb7e   :  { %6643 = vmatprep.subr.bf16.mxu0 %v9258_v23  ;;  %v9293_v23 = vld [vmem:[#allocation13 + $0x698] ss:$12 sps:$4 sm:$0xff]  }
 0xb7f   :  { %6683 = vmatpush1.bf16.msra.mxu1 %v9306_v33  ;;  %v9329_v33 = vld [vmem:[#allocation13 + $0x4b8] ss:$12 sps:$4 sm:$0xff]  }
 0xb80   :  { %6684 = vmatprep.subr.bf16.mxu1 %v9312_v35  ;;  %v9330_v35 = vld [vmem:[#allocation13 + $0x560] ss:$12 sps:$4 sm:$0xff]  }
 0xb81   :  { %6644 = vmatpush1.bf16.msra.mxu0 %v9256_v59  ;;  %v9297_v59 = vld [vmem:[#allocation13 + $0x680] ss:$12 sps:$4 sm:$0xff]  }
 0xb82   :  { %6645 = vmatprep.subr.bf16.mxu0 %v9261_v2  ;;  %v9301_v2 = vld [vmem:[#allocation13 + $0x668] ss:$12 sps:$4 sm:$0xff]  }
 0xb83   :  { %6685 = vmatpush1.bf16.msra.mxu1 %v9310_v36  ;;  %v9331_v36 = vld [vmem:[#allocation13 + $0x4a0] ss:$12 sps:$4 sm:$0xff]  }
 0xb84   :  { %6686 = vmatprep.subr.bf16.mxu1 %v9316_v4  ;;  %v9332_v4 = vld [vmem:[#allocation13 + $0x548] ss:$12 sps:$4 sm:$0xff]  }
 0xb85   :  { %6646 = vmatpush1.bf16.msra.mxu0 %v9259_v60  ;;  %v9305_v60 = vld [vmem:[#allocation13 + $0x650] ss:$12 sps:$4 sm:$0xff]  }
 0xb86   :  { %6647 = vmatprep.subr.bf16.mxu0 %v9264_v61  ;;  %v9309_v61 = vld [vmem:[#allocation13 + $0x638] ss:$12 sps:$4 sm:$0xff]  }
 0xb87   :  { %6687 = vmatpush1.bf16.msra.mxu1 %v9314_v38  ;;  %v9333_v38 = vld [vmem:[#allocation13 + $0x488] ss:$12 sps:$4 sm:$0xff]  }
 0xb88   :  { %8135 = vmatprep.subr.bf16.mxu1 %v9318_v6  ;;  %v9334_v6 = vld [vmem:[#allocation20 + $0x78] sm:$0xff]  }
 0xb89   :  { %6648 = vmatpush2.bf16.msra.mxu0 %v9262_v62 }
 0xb8a   :  { %6649 = vmatprep.subr.bf16.mxu0 %v9267_v3 }
 0xb8d   :  { %6650 = vmatpush2.bf16.msra.mxu0 %v9265_v5  ;;  %v5576_v5 = vrot.slane %v5563_v39, %v9814_v19  ;;  %v9335_v39 = vld [vmem:[#allocation20 + $0xb8] sm:$0xff]  }
 0xb8e   :  { %6651 = vmatprep.subr.bf16.mxu0 %v9270_v7 }
 0xb91   :  { %6652 = vmatpush2.bf16.msra.mxu0 %v9268_v9  ;;  %v9313_v9 = vld [vmem:[#allocation13 + $0x620] ss:$12 sps:$4 sm:$0xff]  }
 0xb92   :  { %6653 = vmatprep.subr.bf16.mxu0 %v9273_v49 }
 0xb95   :  { %6654 = vmatpush2.bf16.msra.mxu0 %v9271_v10 }
 0xb96   :  { %6655 = vmatprep.subr.bf16.mxu0 %v9276_v52 }
 0xb99   :  { %6656 = vmatpush2.bf16.msra.mxu0 %v9274_v48 }
 0xb9a   :  { %6657 = vmatprep.subr.bf16.mxu0 %v9279_v13  ;;  %v9317_v13 = vld [vmem:[#allocation13 + $0x608] ss:$12 sps:$4 sm:$0xff]  }
 0xb9d   :  { %6658 = vmatpush2.bf16.msra.mxu0 %v9277_v15 }
 0xb9e   :  { %6659 = vmatprep.subr.bf16.mxu0 %v9282_v16  ;;  %v9319_v16 = vld [vmem:[#allocation13 + $0x530] ss:$12 sps:$4 sm:$0xff]  }
 0xba1   :  { %6660 = vmatpush2.bf16.msra.mxu0 %v9280_v44  ;;  %v9321_v44 = vld [vmem:[#allocation13 + $0x518] ss:$12 sps:$4 sm:$0xff]  }
 0xba2   :  { %6661 = vmatprep.subr.bf16.mxu0 %v9285_v22  ;;  %v9322_v22 = vld [vmem:[#allocation13 + $0x5c0] ss:$12 sps:$4 sm:$0xff]  }
 0xba5   :  { %6662 = vmatpush2.bf16.msra.mxu0 %v9283_v26  ;;  %v9325_v26 = vld [vmem:[#allocation13 + $0x4e8] ss:$12 sps:$4 sm:$0xff]  }
 0xba6   :  { %8377 = vmatprep.subr.bf16.mxu0 %v9642_v1 }
 0xc08   :  { %v6039_v41 = vpop.f32.mrf.mxu0 }
 0xc09   :  { %v5998_v43 = vpop.f32.mrf.mxu1 }
 0xc0a   :  { %v5999_v63 = vadd.f32 %v5998_v43, %v5568_v40  ;;  %v6041_v46 = vpop.f32.mrf.mxu0 }
 0xc0b   :  { %v6000_v47 = vpop.f32.mrf.mxu1 }
 0xc0c   :  { %v6040_v50 = vadd.f32 %v6039_v41, %v5999_v63  ;;  %v6001_v51 = vadd.f32 %v6000_v47, %v5572_v42  ;;  %v6043_v53 = vpop.f32.mrf.mxu0 }
 0xc0d   :  { %v6002_v54 = vpop.f32.mrf.mxu1 }
 0xc0e   :  { %v6042_v34 = vadd.f32 %v6041_v46, %v6001_v51  ;;  %v6044_v28 = vpop.f32.mrf.mxu0  ;;  %v6126_v56 = vmax.f32 %v6040_v50, 0.0 }
 0xc0f   :  { %v6003_v37 = vpop.f32.mrf.mxu1  ;;  %v6230_v28 = vld [vmem:[#allocation14 + $0x6] sm:$0x7] }
 0xc10   :  { %v6127_v30 = vmax.f32 %v6042_v34, 0.0  ;;  %v10183_v27 = vpack.c.bf16 %v6126_v56, %v6126_v56  ;;  %v6239_v56 = vrot.slane %v6230_v28, %v9818_v21  ;;  %v6235_v37 = vrot.slane %v6230_v28, %v9816_v20 }
 0xc12   :  { %v6130_v57 = vpack.c.bf16 %v6127_v30, %v6127_v30 }
 0xc14   :  { %6663 = vmatprep.mubr.bf16.mxu0 %v6130_v57 }
 0xc15   :  { %6664 = vmatmul.mubr.bf16.vlgmr.msra.gmra.mxu0 %v10183_v27 }
 0xc16   :  { %8378 = vmatpush3.bf16.msra.mxu0 %v9289_v58  ;;  %8393 = vmatprep.mubr.msk.bf16.mxu0 %vm9643_vm0, %v9642_v1 }
 0xc17   :  { %8379 = vmatprep.subr.bf16.mxu0 %v9642_v1 }
 0xc1a   :  { %8380 = vmatpush3.bf16.msra.mxu0 %v9293_v23 }
 0xc1b   :  { %8381 = vmatprep.subr.bf16.mxu0 %v9642_v1 }
 0xc1e   :  { %8382 = vmatpush3.bf16.msra.mxu0 %v9297_v59  ;;  %v6243_v59 = vrot.slane %v6230_v28, %v9814_v19 }
 0xc1f   :  { %8383 = vmatprep.subr.bf16.mxu0 %v9642_v1 }
 0xc22   :  { %8384 = vmatpush3.bf16.msra.mxu0 %v9301_v2 }
 0xc23   :  { %8385 = vmatprep.subr.bf16.mxu0 %v9642_v1 }
 0xc26   :  { %8386 = vmatpush3.bf16.msra.mxu0 %v9305_v60 }
 0xc27   :  { %8387 = vmatprep.subr.bf16.mxu0 %v9642_v1 }
 0xc28   :  { %v8120_v62 = vpop.f32.mrf.mxu0 }
 0xc29   :  { %v6120_v3 = vpop.f32.mrf.mxu1 }
 0xc2a   :  { %v8121_v7 = vpop.f32.mrf.mxu0  ;;  %8388 = vmatpush3.bf16.msra.mxu0 %v9309_v61 }
 0xc2b   :  { %v8122_v49 = vadd.f32 %v8121_v7, %v8120_v62  ;;  %v8375_v10 = vpop.f32.mrf.mxu1  ;;  %8389 = vmatprep.subr.bf16.mxu0 %v9642_v1 }
 0xc2c   :  { %v8123_v52 = vpop.f32.mrf.mxu0 }
 0xc2d   :  { %v6081_v11 = vadd.f32 %v8122_v49, %v5576_v5  ;;  %v6123_v45 = vpop.f32.mrf.mxu1 }
 0xc2e   :  { %v8124_v48 = vpop.f32.mrf.mxu0  ;;  %8390 = vmatpush3.bf16.msra.mxu0 %v9313_v9 }
 0xc2f   :  { %v6121_v55 = vadd.f32 %v6120_v3, %v6081_v11  ;;  %v8376_v14 = vpop.f32.mrf.mxu1  ;;  %8391 = vmatprep.subr.bf16.mxu0 %v9642_v1 }
 0xc30   :  { %v9339_v14 = vld [vmem:[#allocation20 + $0x30] sm:$0xff]  }
 0xc31   :  { %v6128_v15 = vmax.f32 %v6121_v55, 0.0  ;;  %v9337_v55 = vld [vmem:[#allocation20 + $0x70] sm:$0xff]  }
 0xc32   :  { %8392 = vmatpush3.bf16.msra.mxu0 %v9317_v13  ;;  %v9336_v13 = vld [vmem:[#allocation20 + $0x38] sm:$0xff]  }
 0xc33   :  { %v6131_v17 = vpack.c.bf16 %v6128_v15, %v6128_v15  ;;  %8397 = vmatprep.subr.bf16.mxu0 %v9642_v1  ;;  %v9340_v15 = vld [vmem:[#allocation20 + $0x68] sm:$0xff]  }
 0xc35   :  { %6705 = vmatmul.mubr.bf16.vlgmr.msra.gmra.mxu1 %v6131_v17  ;;  %8394 = vmatmul.mubr.bf16.vlgmr.msra.gmra.mxu0 %v6131_v17  ;;  %v9342_v17 = vld [vmem:[#allocation20 + $0x28] sm:$0xff]  }
 0xc36   :  { %8136 = vmatpush3.bf16.msra.mxu1 %v9319_v16  ;;  %6745 = vmatprep.mubr.bf16.mxu1 %v6130_v57  ;;  %v9341_v16 = vld [vmem:[#allocation20 + $0xa8] sm:$0xff]  }
 0xc37   :  { %8137 = vmatprep.subr.bf16.mxu1 %v9320_v18  ;;  %8413 = vmatprep.mubr.msk.bf16.mxu0 %vm9643_vm0, %v9642_v1  ;;  %v9343_v18 = vld [vmem:[#allocation20 + $0x60] sm:$0xff]  }
 0xc38   :  { %8398 = vmatpush3.bf16.msra.mxu0 %v9335_v39 }
 0xc39   :  { %8399 = vmatprep.subr.bf16.mxu0 %v9642_v1 }
 0xc3a   :  { %8138 = vmatpush3.bf16.msra.mxu1 %v9321_v44  ;;  %v9344_v44 = vld [vmem:[#allocation20 + $0xa0] sm:$0xff]  }
 0xc3b   :  { %8139 = vmatprep.subr.bf16.mxu1 %v9322_v22  ;;  %v9345_v22 = vld [vmem:[#allocation20 + $0x20] sm:$0xff]  }
 0xc3e   :  { %8140 = vmatpush3.bf16.msra.mxu1 %v9323_v24  ;;  %v9346_v24 = vld [vmem:[#allocation20 + $0x58] sm:$0xff]  }
 0xc3f   :  { %8141 = vmatprep.subr.bf16.mxu1 %v9324_v25  ;;  %v9347_v25 = vld [vmem:[#allocation20 + $0x98] sm:$0xff]  }
 0xc42   :  { %8142 = vmatpush3.bf16.msra.mxu1 %v9325_v26  ;;  %v9348_v26 = vld [vmem:[#allocation20 + $0x18] sm:$0xff]  }
 0xc43   :  { %8143 = vmatprep.subr.bf16.mxu1 %v9326_v29  ;;  %v9349_v29 = vld [vmem:[#allocation20 + $0x50] sm:$0xff]  }
 0xc46   :  { %8144 = vmatpush3.bf16.msra.mxu1 %v9327_v31  ;;  %v9350_v31 = vld [vmem:[#allocation20 + $0x90] sm:$0xff]  }
 0xc47   :  { %8145 = vmatprep.subr.bf16.mxu1 %v9328_v32  ;;  %v9351_v32 = vld [vmem:[#allocation20 + $0x10] sm:$0xff]  }
 0xc4a   :  { %8146 = vmatpush3.bf16.msra.mxu1 %v9329_v33  ;;  %v9352_v33 = vld [vmem:[#allocation20 + $0x48] sm:$0xff]  }
 0xc4b   :  { %8147 = vmatprep.subr.bf16.mxu1 %v9330_v35  ;;  %v9353_v35 = vld [vmem:[#allocation20 + $0x88] sm:$0xff]  }
 0xc4e   :  { %8148 = vmatpush3.bf16.msra.mxu1 %v9331_v36  ;;  %v9354_v36 = vld [vmem:[#allocation20 + $0x8] sm:$0xff]  }
 0xc4f   :  { %8149 = vmatprep.subr.bf16.mxu1 %v9332_v4  ;;  %v9355_v4 = vld [vmem:[#allocation20 + $0x40] sm:$0xff]  }
 0xc52   :  { %8150 = vmatpush3.bf16.msra.mxu1 %v9333_v38  ;;  %v9356_v38 = vld [vmem:[#allocation20 + $0x80] sm:$0xff]  }
 0xc53   :  { %8166 = vmatprep.subr.bf16.mxu1 %v9334_v6  ;;  %v9357_v6 = vld [vmem:[#allocation20] sm:$0xff]  }
 0xc55   :  { %6746 = vmatmul.mubr.bf16.vlgmr.msra.gmra.mxu1 %v10183_v27 }
 0xc56   :  { %8167 = vmatpush3.bf16.msra.mxu1 %v9336_v13 }
 0xc57   :  { %8168 = vmatprep.subr.bf16.mxu1 %v9337_v55  ;;  %v7876_v55 = vld [vmem:[%s10261_s15] ss:$0 sm:$0xff] }
 0xc5a   :  { %8169 = vmatpush3.bf16.msra.mxu1 %v9339_v14 }
 0xc5b   :  { %8170 = vmatprep.subr.bf16.mxu1 %v9340_v15  ;;  %v7877_v15 = vld [vmem:[#allocation2] ss:$0 sm:$0xff] }
 0xc5e   :  { %8171 = vmatpush3.bf16.msra.mxu1 %v9342_v17 }
 0xc5f   :  { %8172 = vmatprep.subr.bf16.mxu1 %v9343_v18 }
 0xc62   :  { %8173 = vmatpush3.bf16.msra.mxu1 %v9345_v22 }
 0xc63   :  { %8174 = vmatprep.subr.bf16.mxu1 %v9346_v24 }
 0xc66   :  { %8175 = vmatpush3.bf16.msra.mxu1 %v9348_v26 }
 0xc67   :  { %8176 = vmatprep.subr.bf16.mxu1 %v9349_v29 }
 0xc6a   :  { %8177 = vmatpush3.bf16.msra.mxu1 %v9351_v32 }
 0xc6b   :  { %8178 = vmatprep.subr.bf16.mxu1 %v9352_v33 }
 0xc6e   :  { %8179 = vmatpush3.bf16.msra.mxu1 %v9354_v36 }
 0xc6f   :  { %8180 = vmatprep.subr.bf16.mxu1 %v9355_v4 }
 0xc72   :  { %8181 = vmatpush3.bf16.msra.mxu1 %v9357_v6 }
 0xcd5   :  { %v6665_v40 = vpop.f32.mrf.mxu0 }
 0xcd6   :  { %v6666_v57 = vadd.f32 %v6665_v40, %v6235_v37 }
 0xcd7   :  { %v6667_v41 = vpop.f32.mrf.mxu0 }
 0xcd8   :  { %v6668_v30 = vadd.f32 %v6667_v41, %v6239_v56 }
 0xcd9   :  { %v6669_v42 = vpop.f32.mrf.mxu0 }
 0xcdb   :  { %v6670_v43 = vpop.f32.mrf.mxu0 }
 0xcf5   :  { %v6706_v63 = vpop.f32.mrf.mxu1  ;;  %v6787_v46 = vpop.f32.mrf.mxu0 }
 0xcf6   :  { %v6707_v23 = vadd.f32 %v6706_v63, %v6666_v57 }
 0xcf7   :  { %v6708_v47 = vpop.f32.mrf.mxu1  ;;  %v8395_v50 = vpop.f32.mrf.mxu0 }
 0xcf8   :  { %v6709_v58 = vadd.f32 %v6708_v47, %v6668_v30  ;;  %v10208_v3 = vadd.f32 %v6707_v23, %v10158_v12  ;;  %v6797_v47 = vld [vmem:[#allocation17 + $0x6] sm:$0x7]  ;;  %v6799_v50 = vld [vmem:[#allocation19 + $0x6] sm:$0x7] }
 0xcf9   :  { %v6710_v51 = vpop.f32.mrf.mxu1  ;;  %v6790_v53 = vpop.f32.mrf.mxu0  ;;  %v6827_v28 = vrot.slane %v6797_v47, %v9816_v20  ;;  %v6850_v37 = vrot.slane %v6799_v50, %v9818_v21  ;;  %v6854_v30 = vrot.slane %v6799_v50, %v9814_v19  ;;  %v6846_v23 = vrot.slane %v6799_v50, %v9816_v20 }
 0xcfa   :  { %v10205_v60 = vadd.f32 %v6709_v58, %v10154_v8  ;;  %v6805_v8 = vmul.f32 %v10208_v3, %v10208_v3  ;;  %v6831_v51 = vrot.slane %v6797_v47, %v9818_v21  ;;  %v6835_v53 = vrot.slane %v6797_v47, %v9814_v19 }
 0xcfb   :  { %v6711_v54 = vpop.f32.mrf.mxu1  ;;  %v8396_v34 = vpop.f32.mrf.mxu0 }
 0xcfc   :  { %v6806_v49 = vmul.f32 %v10205_v60, %v10205_v60  ;;  %v6800_v52 = vadd.f32 %v10205_v60, %v10208_v3 }
 0xcfe   :  { %v6808_v45 = vadd.f32 %v6806_v49, %v6805_v8 }
 0xd15   :  { %v8151_v27 = vpop.f32.mrf.mxu1 }
 0xd17   :  { %v8152_v2 = vpop.f32.mrf.mxu1 }
 0xd18   :  { %v8153_v61 = vadd.f32 %v8152_v2, %v8151_v27 }
 0xd19   :  { %v8154_v62 = vpop.f32.mrf.mxu1 }
 0xd1a   :  { %v6748_v5 = vadd.f32 %v8153_v61, %v6243_v59 }
 0xd1b   :  { %v8155_v7 = vpop.f32.mrf.mxu1 }
 0xd1c   :  { %v6788_v9 = vadd.f32 %v6787_v46, %v6748_v5 }
 0xd1e   :  { %v10213_v10 = vadd.f32 %v6788_v9, %v10156_v0  ;;  %v9338_v0 = vld [vmem:[#allocation20 + $0xb0] sm:$0xff]  }
 0xd1f   :  { %8400 = vmatpush3.bf16.msra.mxu0 %v9338_v0 }
 0xd20   :  { %v6801_v11 = vadd.f32 %v6800_v52, %v10213_v10  ;;  %v6807_v12 = vmul.f32 %v10213_v10, %v10213_v10  ;;  %8401 = vmatprep.subr.bf16.mxu0 %v9642_v1 }
 0xd22   :  { %6802 = vadd.xlane.f32.xlu0 %v6801_v11  ;;  %v6809_v48 = vadd.f32 %v6808_v45, %v6807_v12 }
 0xd23   :  { %8402 = vmatpush3.bf16.msra.mxu0 %v9341_v16 }
 0xd24   :  { %6810 = vadd.xlane.f32.xlu1 %v6809_v48  ;;  %8403 = vmatprep.subr.bf16.mxu0 %v9642_v1 }
 0xd27   :  { %8404 = vmatpush3.bf16.msra.mxu0 %v9344_v44 }
 0xd28   :  { %8405 = vmatprep.subr.bf16.mxu0 %v9642_v1 }
 0xd2b   :  { %8406 = vmatpush3.bf16.msra.mxu0 %v9347_v25 }
 0xd2c   :  { %8407 = vmatprep.subr.bf16.mxu0 %v9642_v1 }
 0xd2f   :  { %8408 = vmatpush3.bf16.msra.mxu0 %v9350_v31 }
 0xd30   :  { %8409 = vmatprep.subr.bf16.mxu0 %v9642_v1 }
 0xd33   :  { %8410 = vmatpush3.bf16.msra.mxu0 %v9353_v35 }
 0xd34   :  { %8411 = vmatprep.subr.bf16.mxu0 %v9642_v1 }
 0xd37   :  { %8412 = vmatpush3.bf16.msra.mxu0 %v9356_v38 }
 0xdab   :  { %v6803_v39 = vpop.xlane.xlu0 %6802 }
 0xdac   :  { %v6804_v40 = vmul.f32 0.0033333334, %v6803_v39 }
 0xdad   :  { %v6811_v41 = vpop.xlane.xlu1 %6810 }
 0xdae   :  { %v6812_v42 = vmul.f32 0.0033333334, %v6811_v41  ;;  %v6813_v43 = vmul.f32 %v6804_v40, %v6804_v40  ;;  %v6815_v1 = vsub.f32 %v10208_v3, %v6804_v40  ;;  %v6816_v54 = vsub.f32 %v10205_v60, %v6804_v40 }
 0xdaf   :  { %v6817_v34 = vsub.f32 %v10213_v10, %v6804_v40  ;;  %v7851_v10 = vld [vmem:[%s10260_s14] ss:$0 sm:$0xff] }
 0xdb0   :  { %v6814_v63 = vsub.f32 %v6812_v42, %v6813_v43 }
 0xdb2   :  { %v6818_v46 = vadd.f32 1e-05, %v6814_v63 }
 0xdb4   :  { %9368 = vrsqrt.f32 %v6818_v46 }
 0xdc1   :  { %v9369_v56 = vpop.eup %9368 }
 0xdc2   :  { %v6821_v57 = vmul.f32 %v9369_v56, %v6816_v54  ;;  %v6822_v58 = vmul.f32 %v9369_v56, %v6817_v34  ;;  %v6820_v27 = vmul.f32 %v9369_v56, %v6815_v1 }
 0xdc4   :  { %v6840_v59 = vmul.f32 %v6831_v51, %v6821_v57  ;;  %v6841_v2 = vmul.f32 %v6835_v53, %v6822_v58  ;;  %v6839_v61 = vmul.f32 %v6827_v28, %v6820_v27 }
 0xdc6   :  { %v6859_v62 = vadd.f32 %v6850_v37, %v6840_v59  ;;  %v6860_v3 = vadd.f32 %v6854_v30, %v6841_v2  ;;  %v6858_v60 = vadd.f32 %v6846_v23, %v6839_v61 }
 0xdc8   :  { %v6862_v5 = vpack.c.bf16 %v6859_v62, %v6859_v62  ;;  %v6863_v7 = vpack.c.bf16 %v6860_v3, %v6860_v3  ;;  %v6861_v9 = vpack.c.bf16 %v6858_v60, %v6858_v60 }
 0xdca   :  { %7095 = vmatprep.mubr.bf16.mxu1 %v6862_v5  ;;  %8414 = vmatmul.mubr.bf16.vlgmr.msra.gmra.mxu0 %v6863_v7 }
 0xdcb   :  { %7096 = vmatmul.mubr.bf16.vlgmr.msra.gmra.mxu1 %v6861_v9 }
 0xe8a   :  { %v7137_v21 = vpop.f32.mrf.mxu0 }
 0xe8b   :  { %v8182_v49 = vpop.f32.mrf.mxu1 }
 0xe8c   :  { %v8415_v19 = vpop.f32.mrf.mxu0 }
 0xe8d   :  { %v8183_v20 = vpop.f32.mrf.mxu1 }
 0xe8e   :  { %v8184_v52 = vadd.f32 %v8183_v20, %v8182_v49  ;;  %v7140_v8 = vpop.f32.mrf.mxu0 }
 0xe8f   :  { %v8185_v11 = vpop.f32.mrf.mxu1 }
 0xe90   :  { %v7098_v12 = vadd.f32 %v8184_v52, %v7851_v10  ;;  %v8416_v45 = vpop.f32.mrf.mxu0 }
 0xe91   :  { %v8186_v48 = vpop.f32.mrf.mxu1 }
 0xe92   :  { %v7138_v13 = vadd.f32 %v7137_v21, %v7098_v12 }
 0xe94   :  { %v7143_v0 = vmax.f32 %v7138_v13, 0.0 }
 0xe96   :  { %v7151_v14 = vmul.f32 %v7876_v55, %v7143_v0 }
 0xe98   :  { %7152 = vadd.xlane.f32.xlu0 %v7151_v14 }
 0xf21   :  { %v7153_v16 = vpop.xlane.xlu0 %7152 }
 0xf22   :  { %v7161_v17 = vadd.f32 %v7877_v15, %v7153_v16 }
 0xf24   :  { %7163 = vst.msk [vmem:[%s10263_s17] sm:$0xff] %vm7162_vm1, %v7161_v17 }
 0xf25   :  { %7168 = vsyncpa [#allocation4], 1 }
 0xf26   :  { %7169 = vsyncpa [#allocation6], 1 }
 0xf27   :  { %7170 = vsyncpa [#allocation9], 1 }
 0xf28   :  { %7171 = vsyncpa [#allocation12], 1 }
 0xf29   :  { %7172 = vsyncpa [#allocation15], 1 }
 0xf2a   :  { %7173 = vsyncpa [#allocation18], 1 }
 0xf2b   :  { %7174 = vsyncpa [#allocation21], 1 }

</bundles_post_ra>
